<compile_context>
chip_gen: v6e
topology: v6e:2x2x1
jax: 0.10.0
libtpu: 0.0.40
codegen_flags: <defaults>
</compile_context>

<pallas_src>
import functools
import math

import jax
import jax.numpy as jnp
import numpy as np
from jax.experimental import pallas as pl
from jax.experimental.pallas import tpu as pltpu


# -------------------------- synthetic BERT config --------------------------

VOCAB = 100
MAX_POS = 64
TYPE_VOCAB = 2
HIDDEN = 32
NUM_HEADS = 2
HEAD_DIM = HIDDEN // NUM_HEADS
INTERMEDIATE = 64
NUM_LAYERS = 4   # hidden_states has NUM_LAYERS+1 entries; we take the last 4
LN_EPS = 1e-12

LANE = 128       # TPU lane width; everything is padded to 128-lane slots

assert NUM_LAYERS >= 4, "last-4 accumulation assumes >= 4 encoder layers"
assert HIDDEN <= LANE and INTERMEDIATE <= LANE and HEAD_DIM <= LANE
assert HIDDEN % NUM_HEADS == 0


def _gelu_tanh(y):
    # tanh-approx GELU ("gelu_new"); exact-erf variant differs ~1e-3.
    return 0.5 * y * (1.0 + jnp.tanh(0.7978845608028654 * (y + 0.044715 * y * y * y)))


# ------------------------------ Pallas kernel -------------------------------

def _bert_stack_kernel(
    emb_ref, mask_ref, embln_ref, wqkv_ref, wo_ref, w1_ref, w2_ref, vec_ref,
    out_ref, *, S, H, num_heads, num_layers, eps):
    """One grid step == one batch element; the whole encoder stack runs in-kernel.

    Activations are lane-padded [S, 128] tiles (real values in lanes 0..H-1,
    zeros elsewhere), so every slice is 128-lane aligned and the final store is
    a full-width unmasked vst.
    """
    f32 = jnp.float32
    bf16 = jnp.bfloat16
    inv_h = 1.0 / H

    # Lane mask over the H real lanes (hoisted; used by every layernorm).
    lane_mask = (jax.lax.broadcasted_iota(jnp.int32, (1, LANE), 1) < H).astype(f32)

    def ln(x, g, b):
        # Layernorm over the H real lanes of a lane-padded tile.
        mu = jnp.sum(x, axis=-1, keepdims=True) * inv_h
        xc = (x - mu) * lane_mask
        var = jnp.sum(xc * xc, axis=-1, keepdims=True) * inv_h
        # Pad lanes stay exactly zero because b is zero-padded and xc is masked.
        return xc * jax.lax.rsqrt(var + eps) * g + b

    def mm(x, w):
        # bf16 operands on the MXU, f32 accumulation.
        return jnp.dot(x.astype(bf16), w, preferred_element_type=f32)

    emb = emb_ref[0]                      # [S, 128] f32, lane-padded embedding sum
    kbias = mask_ref[0]                   # [1, S]   additive key-mask bias (f32)

    h = ln(emb, embln_ref[0:1], embln_ref[1:2])   # fused embedding layernorm
    acc = jnp.zeros_like(h)                       # last-4 accumulator (raw sum)

    # Statically unrolled layer loop; h / acc are plain loop-carried values
    # (no per-layer grid steps, no VMEM scratch carry, no per-layer DMAs).
    for l in range(num_layers):
        vec = vec_ref[l]                  # [16, 128] packed per-layer vectors (f32)
        wo_l = wo_ref[l]                  # [num_heads*128, 128] bf16

        # Fused QKV projection; 1/sqrt(head_dim) is pre-folded into the Q slot.
        qkv = mm(h, wqkv_ref[l])          # [S, num_heads*3*128] f32

        # Attention: static head loop, every slice 128-lane aligned; the
        # per-head output projection is accumulated (no concatenates).
        attn = None
        for hh in range(num_heads):
            base = 3 * hh * LANE
            q = qkv[:, base:base + LANE] + vec[3 * hh + 0:3 * hh + 1]
            k = qkv[:, base + LANE:base + 2 * LANE] + vec[3 * hh + 1:3 * hh + 2]
            v = qkv[:, base + 2 * LANE:base + 3 * LANE] + vec[3 * hh + 2:3 * hh + 3]

            s = jax.lax.dot_general(      # q . k^T without an explicit transpose
                q.astype(bf16), k.astype(bf16),
                (((1,), (1,)), ((), ())), preferred_element_type=f32)   # [S, S]
            s = s + kbias
            s = s - jnp.max(s, axis=-1, keepdims=True)
            p = jnp.exp(s)
            p = p * pl.reciprocal(jnp.sum(p, axis=-1, keepdims=True), approx=True)

            ctx = jnp.dot(p.astype(bf16), v.astype(bf16),
                          preferred_element_type=f32)                   # [S, 128]
            part = mm(ctx, wo_l[hh * LANE:(hh + 1) * LANE, :])          # [S, 128]
            attn = part if attn is None else attn + part

        # Output bias + residual fused into layernorm 1.
        h1 = ln(attn + vec[6:7] + h, vec[7:8], vec[8:9])

        # FFN (GELU) + residual fused into layernorm 2.
        inter = _gelu_tanh(mm(h1, w1_ref[l]) + vec[9:10])
        ffn = mm(inter, w2_ref[l]) + vec[10:11]
        h = ln(ffn + h1, vec[11:12], vec[12:13])

        if l >= num_layers - 4:           # fold 0.25*sum(hidden_states[-4:])
            acc = acc + h                 # raw sum; 0.25 applied once below

    out_ref[0] = 0.25 * acc               # one lane-dense [S, 128] store


def bert_stack(emb_p, mask_bias, kp, B, S):
    kernel = functools.partial(
        _bert_stack_kernel, S=S, H=HIDDEN, num_heads=NUM_HEADS,
        num_layers=NUM_LAYERS, eps=LN_EPS)
    L = NUM_LAYERS

    return pl.pallas_call(
        kernel,
        out_shape=jax.ShapeDtypeStruct((B, S, LANE), jnp.float32),
        grid=(B,),
        in_specs=[
            pl.BlockSpec((1, S, LANE), lambda b: (b, 0, 0)),                  # emb (padded)
            pl.BlockSpec((1, 1, S), lambda b: (b, 0, 0)),                     # key-mask bias
            pl.BlockSpec((2, LANE), lambda b: (0, 0)),                        # emb LN g/b
            pl.BlockSpec((L, LANE, NUM_HEADS * 3 * LANE), lambda b: (0, 0, 0)),  # wqkv (padded)
            pl.BlockSpec((L, NUM_HEADS * LANE, LANE), lambda b: (0, 0, 0)),      # wo   (padded)
            pl.BlockSpec((L, LANE, LANE), lambda b: (0, 0, 0)),                  # w1   (padded)
            pl.BlockSpec((L, LANE, LANE), lambda b: (0, 0, 0)),                  # w2   (padded)
            pl.BlockSpec((L, 16, LANE), lambda b: (0, 0, 0)),                    # packed vectors
        ],
        out_specs=pl.BlockSpec((1, S, LANE), lambda b: (b, 0, 0)),
        compiler_params=pltpu.CompilerParams(
            dimension_semantics=("parallel",),      # one batch row per TensorCore (v7x)
            vmem_limit_bytes=32 * 1024 * 1024),     # footprint ~3 MiB; plenty of headroom
    )(emb_p, mask_bias, kp["embln"], kp["wqkv"], kp["wo"], kp["w1"], kp["w2"], kp["vec"])


# ------------------------------ params & packing -----------------------------

def init_params(key):
    """Natural (PyTorch-like) parameter shapes, f32."""
    std = 0.02
    keys = iter(jax.random.split(key, 12))
    nrm = lambda shape: (std * jax.random.normal(next(keys), shape)).astype(jnp.float32)
    L, H, I = NUM_LAYERS, HIDDEN, INTERMEDIATE
    return {
        "word_emb": nrm((VOCAB, H)),
        "pos_emb": nrm((MAX_POS, H)),
        "tok_emb": nrm((TYPE_VOCAB, H)),
        "emb_ln_g": jnp.ones((H,), jnp.float32),
        "emb_ln_b": jnp.zeros((H,), jnp.float32),
        "wqkv": nrm((L, H, 3 * H)),
        "bqkv": nrm((L, 3 * H)),
        "wo": nrm((L, H, H)),
        "bo": nrm((L, H)),
        "ln1_g": jnp.ones((L, H), jnp.float32),
        "ln1_b": jnp.zeros((L, H), jnp.float32),
        "w1": nrm((L, H, I)),
        "b1": nrm((L, I)),
        "w2": nrm((L, I, H)),
        "b2": nrm((L, H)),
        "ln2_g": jnp.ones((L, H), jnp.float32),
        "ln2_b": jnp.zeros((L, H), jnp.float32),
    }


def pack_params(p):
    """Lane-pad weights into 128-lane slots, pack small vectors into one slab,
    fold 1/sqrt(head_dim) into the Q slot (exact: 0.25 is a power of two)."""
    f32, bf16 = jnp.float32, jnp.bfloat16
    L, H, NH, HD, I = NUM_LAYERS, HIDDEN, NUM_HEADS, HEAD_DIM, INTERMEDIATE
    scale = 1.0 / math.sqrt(HD)

    wq = p["wqkv"][:, :, :H] * scale
    wk = p["wqkv"][:, :, H:2 * H]
    wv = p["wqkv"][:, :, 2 * H:]
    wqkv_p = jnp.zeros((L, LANE, NH * 3 * LANE), f32)
    for hh in range(NH):
        base = 3 * hh * LANE
        hs = slice(hh * HD, (hh + 1) * HD)
        wqkv_p = wqkv_p.at[:, :H, base:base + HD].set(wq[:, :, hs])
        wqkv_p = wqkv_p.at[:, :H, base + LANE:base + LANE + HD].set(wk[:, :, hs])
        wqkv_p = wqkv_p.at[:, :H, base + 2 * LANE:base + 2 * LANE + HD].set(wv[:, :, hs])

    wo_p = jnp.zeros((L, NH * LANE, LANE), f32)
    for hh in range(NH):
        wo_p = wo_p.at[:, hh * LANE:hh * LANE + HD, :H].set(
            p["wo"][:, hh * HD:(hh + 1) * HD, :])

    w1_p = jnp.zeros((L, LANE, LANE), f32).at[:, :H, :I].set(p["w1"])
    w2_p = jnp.zeros((L, LANE, LANE), f32).at[:, :I, :H].set(p["w2"])

    # One packed slab for every small per-layer vector (rows of 128 lanes):
    #   rows 0..5: q/k/v biases per head (q pre-scaled), 6: bo, 7/8: ln1 g/b,
    #   9: b1, 10: b2, 11/12: ln2 g/b, 13..15: unused.
    vec = jnp.zeros((L, 16, LANE), f32)
    bq = p["bqkv"][:, :H] * scale
    bk = p["bqkv"][:, H:2 * H]
    bv = p["bqkv"][:, 2 * H:]
    for hh in range(NH):
        hs = slice(hh * HD, (hh + 1) * HD)
        vec = vec.at[:, 3 * hh + 0, :HD].set(bq[:, hs])
        vec = vec.at[:, 3 * hh + 1, :HD].set(bk[:, hs])
        vec = vec.at[:, 3 * hh + 2, :HD].set(bv[:, hs])
    vec = vec.at[:, 6, :H].set(p["bo"])
    vec = vec.at[:, 7, :H].set(p["ln1_g"])
    vec = vec.at[:, 8, :H].set(p["ln1_b"])
    vec = vec.at[:, 9, :I].set(p["b1"])
    vec = vec.at[:, 10, :H].set(p["b2"])
    vec = vec.at[:, 11, :H].set(p["ln2_g"])
    vec = vec.at[:, 12, :H].set(p["ln2_b"])

    embln = jnp.zeros((2, LANE), f32)
    embln = embln.at[0, :H].set(p["emb_ln_g"])
    embln = embln.at[1, :H].set(p["emb_ln_b"])

    return {
        "word_emb": p["word_emb"], "pos_emb": p["pos_emb"], "tok_emb": p["tok_emb"],
        "embln": embln,
        "wqkv": wqkv_p.astype(bf16), "wo": wo_p.astype(bf16),
        "w1": w1_p.astype(bf16), "w2": w2_p.astype(bf16),
        "vec": vec,
    }


# --------------------------------- forward -----------------------------------

def bert_embedding_forward(kparams, word_ids, attention_mask):
    """Equivalent of BertEmbedding.forward: 0.25 * sum(hidden_states[-4:])."""
    B, S = word_ids.shape
    f32 = jnp.float32
    # Embedding lookup (data-dependent gather) kept in plain JAX glue.
    we = jnp.take(kparams["word_emb"], word_ids, axis=0)            # [B, S, H]
    pe = kparams["pos_emb"][None, :S, :]                            # [1, S, H]
    te = kparams["tok_emb"][0][None, None, :]                       # token_type_ids = 0
    emb = we + pe + te
    emb_p = jnp.pad(emb, ((0, 0), (0, 0), (0, LANE - HIDDEN)))      # lane-pad to 128
    # Additive key mask in f32 (kept out of bf16 so -1e9 cannot saturate).
    mask_bias = ((1.0 - attention_mask.astype(f32)) * -1e9)[:, None, :]   # [B, 1, S]
    out_p = bert_stack(emb_p, mask_bias, kparams, B, S)             # [B, S, 128]
    return out_p[:, :, :HIDDEN]                                     # [B, S, H]


# -------------------------- pure-JAX reference check -------------------------

def _reference_forward(params, word_ids, attention_mask):
    B, S = word_ids.shape
    M = B * S
    f32, bf16 = jnp.float32, jnp.bfloat16
    we = jnp.take(params["word_emb"], word_ids, axis=0)
    pe = params["pos_emb"][None, :S, :]
    te = params["tok_emb"][0][None, None, :]
    h = (we + pe + te).reshape(M, HIDDEN)

    def ln(x, g, b):
        mu = jnp.mean(x, -1, keepdims=True)
        var = jnp.mean((x - mu) ** 2, -1, keepdims=True)
        return (x - mu) * jax.lax.rsqrt(var + LN_EPS) * g + b

    def mm(x, w, b):   # mirrors the kernel's bf16-operand matmuls
        return jnp.dot(x.astype(bf16), w.astype(bf16), preferred_element_type=f32) + b

    h = ln(h, params["emb_ln_g"], params["emb_ln_b"])
    mask = ((1.0 - attention_mask.astype(f32)) * -1e9)[:, None, None, :]  # [B,1,1,S]
    acc = jnp.zeros((M, HIDDEN), f32)
    for l in range(NUM_LAYERS):
        qkv = mm(h, params["wqkv"][l], params["bqkv"][l])
        q, k, v = jnp.split(qkv, 3, axis=-1)
        heads = lambda x: x.reshape(B, S, NUM_HEADS, HEAD_DIM).transpose(0, 2, 1, 3)
        qh, kh, vh = heads(q), heads(k), heads(v)
        s = jnp.einsum("bhqd,bhkd->bhqk", qh.astype(bf16), kh.astype(bf16),
                       preferred_element_type=f32)
        s = s / math.sqrt(HEAD_DIM) + mask
        p = jax.nn.softmax(s, axis=-1)
        ctx = jnp.einsum("bhqk,bhkd->bhqd", p.astype(bf16), vh.astype(bf16),
                         preferred_element_type=f32)
        ctx = ctx.transpose(0, 2, 1, 3).reshape(M, HIDDEN)
        h1 = ln(mm(ctx, params["wo"][l], params["bo"][l]) + h,
                params["ln1_g"][l], params["ln1_b"][l])
        ffn = _gelu_tanh(mm(h1, params["w1"][l], params["b1"][l]))
        ffn = mm(ffn, params["w2"][l], params["b2"][l])
        h = ln(ffn + h1, params["ln2_g"][l], params["ln2_b"][l])
        if l >= NUM_LAYERS - 4:
            acc = acc + 0.25 * h
    return acc.reshape(B, S, HIDDEN)


# ----------------------------------- main ------------------------------------

if __name__ == "__main__":
    B, S = 2, 8
    key = jax.random.PRNGKey(0)
    k_param, k_ids = jax.random.split(key)

    params = init_params(k_param)          # natural (PyTorch-like) shapes
    kparams = pack_params(params)          # lane-padded / packed kernel layout
    word_ids = jax.random.randint(k_ids, (B, S), 0, VOCAB, dtype=jnp.int32)
    attention_mask = jnp.ones((B, S), jnp.int32).at[1, 6:].set(0)  # pad tail of seq 1

    out = jax.jit(bert_embedding_forward)(kparams, word_ids, attention_mask)
    out = jax.block_until_ready(out)

    assert out.shape == (B, S, HIDDEN) and out.dtype == jnp.float32
    assert bool(jnp.all(jnp.isfinite(out)))

    ref = jax.jit(_reference_forward)(params, word_ids, attention_mask)
    ref = jax.block_until_ready(ref)
    # pl.reciprocal(approx=True) + tanh-GELU + bf16 matmuls => small (<1e-2) deviation.
    np.testing.assert_allclose(np.asarray(out), np.asarray(ref), atol=5e-2, rtol=5e-2)

    print("KERNEL_OK")
</pallas_src>

<mosaic_0001>
module attributes {stable_mosaic.version = 11 : i64} {
  func.func @_bert_stack_kernel(%arg0: i32, %arg1: memref<1x8x128xf32, #tpu.memory_space<vmem>>, %arg2: memref<1x1x8xf32, #tpu.memory_space<vmem>>, %arg3: memref<2x128xf32, #tpu.memory_space<vmem>>, %arg4: memref<4x128x768xbf16, #tpu.memory_space<vmem>>, %arg5: memref<4x256x128xbf16, #tpu.memory_space<vmem>>, %arg6: memref<4x128x128xbf16, #tpu.memory_space<vmem>>, %arg7: memref<4x128x128xbf16, #tpu.memory_space<vmem>>, %arg8: memref<4x16x128xf32, #tpu.memory_space<vmem>>, %arg9: memref<1x8x128xf32, #tpu.memory_space<vmem>>) attributes {dimension_semantics = [#tpu.dimension_semantics<parallel>], iteration_bounds = array<i64: 2>, scalar_prefetch = 0 : i64, scratch_operands = 0 : i64, tpu.core_type = #tpu.core_type<tc>, window_params = [{transform_indices = @transform_0, window_bounds = array<i64: 1, 8, 128>}, {transform_indices = @transform_1, window_bounds = array<i64: 1, 1, 8>}, {pipeline_mode = #tpu.pipeline_mode<synchronous>, transform_indices = @transform_2, window_bounds = array<i64: 2, 128>}, {pipeline_mode = #tpu.pipeline_mode<synchronous>, transform_indices = @transform_3, window_bounds = array<i64: 4, 128, 768>}, {pipeline_mode = #tpu.pipeline_mode<synchronous>, transform_indices = @transform_4, window_bounds = array<i64: 4, 256, 128>}, {pipeline_mode = #tpu.pipeline_mode<synchronous>, transform_indices = @transform_5, window_bounds = array<i64: 4, 128, 128>}, {pipeline_mode = #tpu.pipeline_mode<synchronous>, transform_indices = @transform_6, window_bounds = array<i64: 4, 128, 128>}, {pipeline_mode = #tpu.pipeline_mode<synchronous>, transform_indices = @transform_7, window_bounds = array<i64: 4, 16, 128>}, {transform_indices = @transform_8, window_bounds = array<i64: 1, 8, 128>}]} {
    %0 = tpu.iota {dimensions = array<i32: 1>} : vector<1x128xi32>
    %c32_i32 = arith.constant 32 : i32
    %1 = vector.broadcast %c32_i32 : i32 to vector<1x128xi32>
    %2 = arith.cmpi slt, %0, %1 : vector<1x128xi32>
    %3 = arith.extui %2 : vector<1x128xi1> to vector<1x128xi32>
    %4 = arith.sitofp %3 : vector<1x128xi32> to vector<1x128xf32>
    %c0 = arith.constant 0 : index
    %c0_0 = arith.constant 0 : index
    %c0_1 = arith.constant 0 : index
    %5 = vector.load %arg1[%c0, %c0_0, %c0_1] : memref<1x8x128xf32, #tpu.memory_space<vmem>>, vector<1x8x128xf32>
    %6 = vector.shape_cast %5 : vector<1x8x128xf32> to vector<8x128xf32>
    %c0_2 = arith.constant 0 : index
    %c0_3 = arith.constant 0 : index
    %c0_4 = arith.constant 0 : index
    %7 = vector.load %arg2[%c0_2, %c0_3, %c0_4] : memref<1x1x8xf32, #tpu.memory_space<vmem>>, vector<1x1x8xf32>
    %8 = vector.shape_cast %7 : vector<1x1x8xf32> to vector<1x8xf32>
    %c0_5 = arith.constant 0 : index
    %c0_6 = arith.constant 0 : index
    %9 = vector.load %arg3[%c0_5, %c0_6] : memref<2x128xf32, #tpu.memory_space<vmem>>, vector<1x128xf32>
    %c1 = arith.constant 1 : index
    %c0_7 = arith.constant 0 : index
    %10 = vector.load %arg3[%c1, %c0_7] : memref<2x128xf32, #tpu.memory_space<vmem>>, vector<1x128xf32>
    %cst = arith.constant dense<0.000000e+00> : vector<8xf32>
    %11 = vector.multi_reduction <add>, %6, %cst [1] : vector<8x128xf32> to vector<8xf32>
    %12 = vector.shape_cast %11 : vector<8xf32> to vector<8x1xf32>
    %cst_8 = arith.constant 3.125000e-02 : f32
    %13 = vector.broadcast %cst_8 : f32 to vector<8x1xf32>
    %14 = arith.mulf %12, %13 : vector<8x1xf32>
    %15 = vector.broadcast %14 : vector<8x1xf32> to vector<8x128xf32>
    %16 = arith.subf %6, %15 : vector<8x128xf32>
    %17 = vector.broadcast %4 : vector<1x128xf32> to vector<8x128xf32>
    %18 = arith.mulf %16, %17 : vector<8x128xf32>
    %19 = arith.mulf %18, %18 : vector<8x128xf32>
    %cst_9 = arith.constant dense<0.000000e+00> : vector<8xf32>
    %20 = vector.multi_reduction <add>, %19, %cst_9 [1] : vector<8x128xf32> to vector<8xf32>
    %21 = vector.shape_cast %20 : vector<8xf32> to vector<8x1xf32>
    %cst_10 = arith.constant 3.125000e-02 : f32
    %22 = vector.broadcast %cst_10 : f32 to vector<8x1xf32>
    %23 = arith.mulf %21, %22 : vector<8x1xf32>
    %cst_11 = arith.constant 9.99999996E-13 : f32
    %24 = vector.broadcast %cst_11 : f32 to vector<8x1xf32>
    %25 = arith.addf %23, %24 : vector<8x1xf32>
    %26 = math.rsqrt %25 : vector<8x1xf32>
    %27 = vector.broadcast %26 : vector<8x1xf32> to vector<8x128xf32>
    %28 = arith.mulf %18, %27 : vector<8x128xf32>
    %29 = vector.broadcast %9 : vector<1x128xf32> to vector<8x128xf32>
    %30 = arith.mulf %28, %29 : vector<8x128xf32>
    %31 = vector.broadcast %10 : vector<1x128xf32> to vector<8x128xf32>
    %32 = arith.addf %30, %31 : vector<8x128xf32>
    %cst_12 = arith.constant 0.000000e+00 : f32
    %33 = vector.broadcast %cst_12 : f32 to vector<8x128xf32>
    %c0_13 = arith.constant 0 : index
    %c0_14 = arith.constant 0 : index
    %c0_15 = arith.constant 0 : index
    %34 = vector.load %arg8[%c0_13, %c0_14, %c0_15] : memref<4x16x128xf32, #tpu.memory_space<vmem>>, vector<1x16x128xf32>
    %35 = vector.shape_cast %34 : vector<1x16x128xf32> to vector<16x128xf32>
    %c0_16 = arith.constant 0 : index
    %c0_17 = arith.constant 0 : index
    %c0_18 = arith.constant 0 : index
    %36 = vector.load %arg5[%c0_16, %c0_17, %c0_18] : memref<4x256x128xbf16, #tpu.memory_space<vmem>>, vector<1x256x128xbf16>
    %37 = vector.shape_cast %36 : vector<1x256x128xbf16> to vector<256x128xbf16>
    %c0_19 = arith.constant 0 : index
    %c0_20 = arith.constant 0 : index
    %c0_21 = arith.constant 0 : index
    %38 = vector.load %arg4[%c0_19, %c0_20, %c0_21] : memref<4x128x768xbf16, #tpu.memory_space<vmem>>, vector<1x128x768xbf16>
    %39 = vector.shape_cast %38 : vector<1x128x768xbf16> to vector<128x768xbf16>
    %40 = arith.truncf %32 : vector<8x128xf32> to vector<8x128xbf16>
    %cst_22 = arith.constant dense<0.000000e+00> : vector<8x768xf32>
    %41 = tpu.matmul %40, %39, %cst_22 {dimension_numbers = #tpu.dot_dimension_numbers<[1], [0], [0], [1], [0, 0, 1, 1], [], []>} : vector<8x128xbf16>, vector<128x768xbf16>, vector<8x768xf32> -> vector<8x768xf32>
    %42 = vector.extract_strided_slice %41 {offsets = [0, 0], sizes = [8, 128], strides = [1, 1]} : vector<8x768xf32> to vector<8x128xf32>
    %43 = vector.extract_strided_slice %35 {offsets = [0, 0], sizes = [1, 128], strides = [1, 1]} : vector<16x128xf32> to vector<1x128xf32>
    %44 = vector.broadcast %43 : vector<1x128xf32> to vector<8x128xf32>
    %45 = arith.addf %42, %44 : vector<8x128xf32>
    %46 = vector.extract_strided_slice %41 {offsets = [0, 128], sizes = [8, 128], strides = [1, 1]} : vector<8x768xf32> to vector<8x128xf32>
    %47 = vector.extract_strided_slice %35 {offsets = [1, 0], sizes = [1, 128], strides = [1, 1]} : vector<16x128xf32> to vector<1x128xf32>
    %48 = vector.broadcast %47 : vector<1x128xf32> to vector<8x128xf32>
    %49 = arith.addf %46, %48 : vector<8x128xf32>
    %50 = vector.extract_strided_slice %41 {offsets = [0, 256], sizes = [8, 128], strides = [1, 1]} : vector<8x768xf32> to vector<8x128xf32>
    %51 = vector.extract_strided_slice %35 {offsets = [2, 0], sizes = [1, 128], strides = [1, 1]} : vector<16x128xf32> to vector<1x128xf32>
    %52 = vector.broadcast %51 : vector<1x128xf32> to vector<8x128xf32>
    %53 = arith.addf %50, %52 : vector<8x128xf32>
    %54 = arith.truncf %45 : vector<8x128xf32> to vector<8x128xbf16>
    %55 = arith.truncf %49 : vector<8x128xf32> to vector<8x128xbf16>
    %cst_23 = arith.constant dense<0.000000e+00> : vector<8x8xf32>
    %56 = tpu.matmul %54, %55, %cst_23 {dimension_numbers = #tpu.dot_dimension_numbers<[1], [1], [0], [0], [0, 0, 1, 0], [], []>} : vector<8x128xbf16>, vector<8x128xbf16>, vector<8x8xf32> -> vector<8x8xf32>
    %57 = vector.broadcast %8 : vector<1x8xf32> to vector<8x8xf32>
    %58 = arith.addf %56, %57 : vector<8x8xf32>
    %cst_24 = arith.constant dense<0xFF800000> : vector<8xf32>
    %59 = vector.multi_reduction <maximumf>, %58, %cst_24 [1] : vector<8x8xf32> to vector<8xf32>
    %60 = vector.shape_cast %59 : vector<8xf32> to vector<8x1xf32>
    %61 = vector.broadcast %60 : vector<8x1xf32> to vector<8x8xf32>
    %62 = arith.subf %58, %61 : vector<8x8xf32>
    %63 = math.exp %62 : vector<8x8xf32>
    %cst_25 = arith.constant dense<0.000000e+00> : vector<8xf32>
    %64 = vector.multi_reduction <add>, %63, %cst_25 [1] : vector<8x8xf32> to vector<8xf32>
    %65 = vector.shape_cast %64 : vector<8xf32> to vector<8x1xf32>
    %66 = tpu.reciprocal %65 {approx = true} : vector<8x1xf32> -> vector<8x1xf32>
    %67 = vector.broadcast %66 : vector<8x1xf32> to vector<8x8xf32>
    %68 = arith.mulf %63, %67 : vector<8x8xf32>
    %69 = arith.truncf %68 : vector<8x8xf32> to vector<8x8xbf16>
    %70 = arith.truncf %53 : vector<8x128xf32> to vector<8x128xbf16>
    %cst_26 = arith.constant dense<0.000000e+00> : vector<8x128xf32>
    %71 = tpu.matmul %69, %70, %cst_26 {dimension_numbers = #tpu.dot_dimension_numbers<[1], [0], [0], [1], [0, 0, 1, 1], [], []>} : vector<8x8xbf16>, vector<8x128xbf16>, vector<8x128xf32> -> vector<8x128xf32>
    %72 = vector.extract_strided_slice %37 {offsets = [0, 0], sizes = [128, 128], strides = [1, 1]} : vector<256x128xbf16> to vector<128x128xbf16>
    %73 = arith.truncf %71 : vector<8x128xf32> to vector<8x128xbf16>
    %cst_27 = arith.constant dense<0.000000e+00> : vector<8x128xf32>
    %74 = tpu.matmul %73, %72, %cst_27 {dimension_numbers = #tpu.dot_dimension_numbers<[1], [0], [0], [1], [0, 0, 1, 1], [], []>} : vector<8x128xbf16>, vector<128x128xbf16>, vector<8x128xf32> -> vector<8x128xf32>
    %75 = vector.extract_strided_slice %41 {offsets = [0, 384], sizes = [8, 128], strides = [1, 1]} : vector<8x768xf32> to vector<8x128xf32>
    %76 = vector.extract_strided_slice %35 {offsets = [3, 0], sizes = [1, 128], strides = [1, 1]} : vector<16x128xf32> to vector<1x128xf32>
    %77 = vector.broadcast %76 : vector<1x128xf32> to vector<8x128xf32>
    %78 = arith.addf %75, %77 : vector<8x128xf32>
    %79 = vector.extract_strided_slice %41 {offsets = [0, 512], sizes = [8, 128], strides = [1, 1]} : vector<8x768xf32> to vector<8x128xf32>
    %80 = vector.extract_strided_slice %35 {offsets = [4, 0], sizes = [1, 128], strides = [1, 1]} : vector<16x128xf32> to vector<1x128xf32>
    %81 = vector.broadcast %80 : vector<1x128xf32> to vector<8x128xf32>
    %82 = arith.addf %79, %81 : vector<8x128xf32>
    %83 = vector.extract_strided_slice %41 {offsets = [0, 640], sizes = [8, 128], strides = [1, 1]} : vector<8x768xf32> to vector<8x128xf32>
    %84 = vector.extract_strided_slice %35 {offsets = [5, 0], sizes = [1, 128], strides = [1, 1]} : vector<16x128xf32> to vector<1x128xf32>
    %85 = vector.broadcast %84 : vector<1x128xf32> to vector<8x128xf32>
    %86 = arith.addf %83, %85 : vector<8x128xf32>
    %87 = arith.truncf %78 : vector<8x128xf32> to vector<8x128xbf16>
    %88 = arith.truncf %82 : vector<8x128xf32> to vector<8x128xbf16>
    %cst_28 = arith.constant dense<0.000000e+00> : vector<8x8xf32>
    %89 = tpu.matmul %87, %88, %cst_28 {dimension_numbers = #tpu.dot_dimension_numbers<[1], [1], [0], [0], [0, 0, 1, 0], [], []>} : vector<8x128xbf16>, vector<8x128xbf16>, vector<8x8xf32> -> vector<8x8xf32>
    %90 = vector.broadcast %8 : vector<1x8xf32> to vector<8x8xf32>
    %91 = arith.addf %89, %90 : vector<8x8xf32>
    %cst_29 = arith.constant dense<0xFF800000> : vector<8xf32>
    %92 = vector.multi_reduction <maximumf>, %91, %cst_29 [1] : vector<8x8xf32> to vector<8xf32>
    %93 = vector.shape_cast %92 : vector<8xf32> to vector<8x1xf32>
    %94 = vector.broadcast %93 : vector<8x1xf32> to vector<8x8xf32>
    %95 = arith.subf %91, %94 : vector<8x8xf32>
    %96 = math.exp %95 : vector<8x8xf32>
    %cst_30 = arith.constant dense<0.000000e+00> : vector<8xf32>
    %97 = vector.multi_reduction <add>, %96, %cst_30 [1] : vector<8x8xf32> to vector<8xf32>
    %98 = vector.shape_cast %97 : vector<8xf32> to vector<8x1xf32>
    %99 = tpu.reciprocal %98 {approx = true} : vector<8x1xf32> -> vector<8x1xf32>
    %100 = vector.broadcast %99 : vector<8x1xf32> to vector<8x8xf32>
    %101 = arith.mulf %96, %100 : vector<8x8xf32>
    %102 = arith.truncf %101 : vector<8x8xf32> to vector<8x8xbf16>
    %103 = arith.truncf %86 : vector<8x128xf32> to vector<8x128xbf16>
    %cst_31 = arith.constant dense<0.000000e+00> : vector<8x128xf32>
    %104 = tpu.matmul %102, %103, %cst_31 {dimension_numbers = #tpu.dot_dimension_numbers<[1], [0], [0], [1], [0, 0, 1, 1], [], []>} : vector<8x8xbf16>, vector<8x128xbf16>, vector<8x128xf32> -> vector<8x128xf32>
    %105 = vector.extract_strided_slice %37 {offsets = [128, 0], sizes = [128, 128], strides = [1, 1]} : vector<256x128xbf16> to vector<128x128xbf16>
    %106 = arith.truncf %104 : vector<8x128xf32> to vector<8x128xbf16>
    %cst_32 = arith.constant dense<0.000000e+00> : vector<8x128xf32>
    %107 = tpu.matmul %106, %105, %cst_32 {dimension_numbers = #tpu.dot_dimension_numbers<[1], [0], [0], [1], [0, 0, 1, 1], [], []>} : vector<8x128xbf16>, vector<128x128xbf16>, vector<8x128xf32> -> vector<8x128xf32>
    %108 = arith.addf %74, %107 : vector<8x128xf32>
    %109 = vector.extract_strided_slice %35 {offsets = [6, 0], sizes = [1, 128], strides = [1, 1]} : vector<16x128xf32> to vector<1x128xf32>
    %110 = vector.broadcast %109 : vector<1x128xf32> to vector<8x128xf32>
    %111 = arith.addf %108, %110 : vector<8x128xf32>
    %112 = arith.addf %111, %32 : vector<8x128xf32>
    %113 = vector.extract_strided_slice %35 {offsets = [7, 0], sizes = [1, 128], strides = [1, 1]} : vector<16x128xf32> to vector<1x128xf32>
    %114 = vector.extract_strided_slice %35 {offsets = [8, 0], sizes = [1, 128], strides = [1, 1]} : vector<16x128xf32> to vector<1x128xf32>
    %cst_33 = arith.constant dense<0.000000e+00> : vector<8xf32>
    %115 = vector.multi_reduction <add>, %112, %cst_33 [1] : vector<8x128xf32> to vector<8xf32>
    %116 = vector.shape_cast %115 : vector<8xf32> to vector<8x1xf32>
    %cst_34 = arith.constant 3.125000e-02 : f32
    %117 = vector.broadcast %cst_34 : f32 to vector<8x1xf32>
    %118 = arith.mulf %116, %117 : vector<8x1xf32>
    %119 = vector.broadcast %118 : vector<8x1xf32> to vector<8x128xf32>
    %120 = arith.subf %112, %119 : vector<8x128xf32>
    %121 = vector.broadcast %4 : vector<1x128xf32> to vector<8x128xf32>
    %122 = arith.mulf %120, %121 : vector<8x128xf32>
    %123 = arith.mulf %122, %122 : vector<8x128xf32>
    %cst_35 = arith.constant dense<0.000000e+00> : vector<8xf32>
    %124 = vector.multi_reduction <add>, %123, %cst_35 [1] : vector<8x128xf32> to vector<8xf32>
    %125 = vector.shape_cast %124 : vector<8xf32> to vector<8x1xf32>
    %cst_36 = arith.constant 3.125000e-02 : f32
    %126 = vector.broadcast %cst_36 : f32 to vector<8x1xf32>
    %127 = arith.mulf %125, %126 : vector<8x1xf32>
    %cst_37 = arith.constant 9.99999996E-13 : f32
    %128 = vector.broadcast %cst_37 : f32 to vector<8x1xf32>
    %129 = arith.addf %127, %128 : vector<8x1xf32>
    %130 = math.rsqrt %129 : vector<8x1xf32>
    %131 = vector.broadcast %130 : vector<8x1xf32> to vector<8x128xf32>
    %132 = arith.mulf %122, %131 : vector<8x128xf32>
    %133 = vector.broadcast %113 : vector<1x128xf32> to vector<8x128xf32>
    %134 = arith.mulf %132, %133 : vector<8x128xf32>
    %135 = vector.broadcast %114 : vector<1x128xf32> to vector<8x128xf32>
    %136 = arith.addf %134, %135 : vector<8x128xf32>
    %c0_38 = arith.constant 0 : index
    %c0_39 = arith.constant 0 : index
    %c0_40 = arith.constant 0 : index
    %137 = vector.load %arg6[%c0_38, %c0_39, %c0_40] : memref<4x128x128xbf16, #tpu.memory_space<vmem>>, vector<1x128x128xbf16>
    %138 = vector.shape_cast %137 : vector<1x128x128xbf16> to vector<128x128xbf16>
    %139 = arith.truncf %136 : vector<8x128xf32> to vector<8x128xbf16>
    %cst_41 = arith.constant dense<0.000000e+00> : vector<8x128xf32>
    %140 = tpu.matmul %139, %138, %cst_41 {dimension_numbers = #tpu.dot_dimension_numbers<[1], [0], [0], [1], [0, 0, 1, 1], [], []>} : vector<8x128xbf16>, vector<128x128xbf16>, vector<8x128xf32> -> vector<8x128xf32>
    %141 = vector.extract_strided_slice %35 {offsets = [9, 0], sizes = [1, 128], strides = [1, 1]} : vector<16x128xf32> to vector<1x128xf32>
    %142 = vector.broadcast %141 : vector<1x128xf32> to vector<8x128xf32>
    %143 = arith.addf %140, %142 : vector<8x128xf32>
    %cst_42 = arith.constant 5.000000e-01 : f32
    %144 = vector.broadcast %cst_42 : f32 to vector<8x128xf32>
    %145 = arith.mulf %144, %143 : vector<8x128xf32>
    %cst_43 = arith.constant 4.471500e-02 : f32
    %146 = vector.broadcast %cst_43 : f32 to vector<8x128xf32>
    %147 = arith.mulf %146, %143 : vector<8x128xf32>
    %148 = arith.mulf %147, %143 : vector<8x128xf32>
    %149 = arith.mulf %148, %143 : vector<8x128xf32>
    %150 = arith.addf %143, %149 : vector<8x128xf32>
    %cst_44 = arith.constant 0.797884583 : f32
    %151 = vector.broadcast %cst_44 : f32 to vector<8x128xf32>
    %152 = arith.mulf %151, %150 : vector<8x128xf32>
    %153 = math.tanh %152 : vector<8x128xf32>
    %cst_45 = arith.constant 1.000000e+00 : f32
    %154 = vector.broadcast %cst_45 : f32 to vector<8x128xf32>
    %155 = arith.addf %154, %153 : vector<8x128xf32>
    %156 = arith.mulf %145, %155 : vector<8x128xf32>
    %c0_46 = arith.constant 0 : index
    %c0_47 = arith.constant 0 : index
    %c0_48 = arith.constant 0 : index
    %157 = vector.load %arg7[%c0_46, %c0_47, %c0_48] : memref<4x128x128xbf16, #tpu.memory_space<vmem>>, vector<1x128x128xbf16>
    %158 = vector.shape_cast %157 : vector<1x128x128xbf16> to vector<128x128xbf16>
    %159 = arith.truncf %156 : vector<8x128xf32> to vector<8x128xbf16>
    %cst_49 = arith.constant dense<0.000000e+00> : vector<8x128xf32>
    %160 = tpu.matmul %159, %158, %cst_49 {dimension_numbers = #tpu.dot_dimension_numbers<[1], [0], [0], [1], [0, 0, 1, 1], [], []>} : vector<8x128xbf16>, vector<128x128xbf16>, vector<8x128xf32> -> vector<8x128xf32>
    %161 = vector.extract_strided_slice %35 {offsets = [10, 0], sizes = [1, 128], strides = [1, 1]} : vector<16x128xf32> to vector<1x128xf32>
    %162 = vector.broadcast %161 : vector<1x128xf32> to vector<8x128xf32>
    %163 = arith.addf %160, %162 : vector<8x128xf32>
    %164 = arith.addf %163, %136 : vector<8x128xf32>
    %165 = vector.extract_strided_slice %35 {offsets = [11, 0], sizes = [1, 128], strides = [1, 1]} : vector<16x128xf32> to vector<1x128xf32>
    %166 = vector.extract_strided_slice %35 {offsets = [12, 0], sizes = [1, 128], strides = [1, 1]} : vector<16x128xf32> to vector<1x128xf32>
    %cst_50 = arith.constant dense<0.000000e+00> : vector<8xf32>
    %167 = vector.multi_reduction <add>, %164, %cst_50 [1] : vector<8x128xf32> to vector<8xf32>
    %168 = vector.shape_cast %167 : vector<8xf32> to vector<8x1xf32>
    %cst_51 = arith.constant 3.125000e-02 : f32
    %169 = vector.broadcast %cst_51 : f32 to vector<8x1xf32>
    %170 = arith.mulf %168, %169 : vector<8x1xf32>
    %171 = vector.broadcast %170 : vector<8x1xf32> to vector<8x128xf32>
    %172 = arith.subf %164, %171 : vector<8x128xf32>
    %173 = vector.broadcast %4 : vector<1x128xf32> to vector<8x128xf32>
    %174 = arith.mulf %172, %173 : vector<8x128xf32>
    %175 = arith.mulf %174, %174 : vector<8x128xf32>
    %cst_52 = arith.constant dense<0.000000e+00> : vector<8xf32>
    %176 = vector.multi_reduction <add>, %175, %cst_52 [1] : vector<8x128xf32> to vector<8xf32>
    %177 = vector.shape_cast %176 : vector<8xf32> to vector<8x1xf32>
    %cst_53 = arith.constant 3.125000e-02 : f32
    %178 = vector.broadcast %cst_53 : f32 to vector<8x1xf32>
    %179 = arith.mulf %177, %178 : vector<8x1xf32>
    %cst_54 = arith.constant 9.99999996E-13 : f32
    %180 = vector.broadcast %cst_54 : f32 to vector<8x1xf32>
    %181 = arith.addf %179, %180 : vector<8x1xf32>
    %182 = math.rsqrt %181 : vector<8x1xf32>
    %183 = vector.broadcast %182 : vector<8x1xf32> to vector<8x128xf32>
    %184 = arith.mulf %174, %183 : vector<8x128xf32>
    %185 = vector.broadcast %165 : vector<1x128xf32> to vector<8x128xf32>
    %186 = arith.mulf %184, %185 : vector<8x128xf32>
    %187 = vector.broadcast %166 : vector<1x128xf32> to vector<8x128xf32>
    %188 = arith.addf %186, %187 : vector<8x128xf32>
    %189 = arith.addf %33, %188 : vector<8x128xf32>
    %c1_55 = arith.constant 1 : index
    %c0_56 = arith.constant 0 : index
    %c0_57 = arith.constant 0 : index
    %190 = vector.load %arg8[%c1_55, %c0_56, %c0_57] : memref<4x16x128xf32, #tpu.memory_space<vmem>>, vector<1x16x128xf32>
    %191 = vector.shape_cast %190 : vector<1x16x128xf32> to vector<16x128xf32>
    %c1_58 = arith.constant 1 : index
    %c0_59 = arith.constant 0 : index
    %c0_60 = arith.constant 0 : index
    %192 = vector.load %arg5[%c1_58, %c0_59, %c0_60] : memref<4x256x128xbf16, #tpu.memory_space<vmem>>, vector<1x256x128xbf16>
    %193 = vector.shape_cast %192 : vector<1x256x128xbf16> to vector<256x128xbf16>
    %c1_61 = arith.constant 1 : index
    %c0_62 = arith.constant 0 : index
    %c0_63 = arith.constant 0 : index
    %194 = vector.load %arg4[%c1_61, %c0_62, %c0_63] : memref<4x128x768xbf16, #tpu.memory_space<vmem>>, vector<1x128x768xbf16>
    %195 = vector.shape_cast %194 : vector<1x128x768xbf16> to vector<128x768xbf16>
    %196 = arith.truncf %188 : vector<8x128xf32> to vector<8x128xbf16>
    %cst_64 = arith.constant dense<0.000000e+00> : vector<8x768xf32>
    %197 = tpu.matmul %196, %195, %cst_64 {dimension_numbers = #tpu.dot_dimension_numbers<[1], [0], [0], [1], [0, 0, 1, 1], [], []>} : vector<8x128xbf16>, vector<128x768xbf16>, vector<8x768xf32> -> vector<8x768xf32>
    %198 = vector.extract_strided_slice %197 {offsets = [0, 0], sizes = [8, 128], strides = [1, 1]} : vector<8x768xf32> to vector<8x128xf32>
    %199 = vector.extract_strided_slice %191 {offsets = [0, 0], sizes = [1, 128], strides = [1, 1]} : vector<16x128xf32> to vector<1x128xf32>
    %200 = vector.broadcast %199 : vector<1x128xf32> to vector<8x128xf32>
    %201 = arith.addf %198, %200 : vector<8x128xf32>
    %202 = vector.extract_strided_slice %197 {offsets = [0, 128], sizes = [8, 128], strides = [1, 1]} : vector<8x768xf32> to vector<8x128xf32>
    %203 = vector.extract_strided_slice %191 {offsets = [1, 0], sizes = [1, 128], strides = [1, 1]} : vector<16x128xf32> to vector<1x128xf32>
    %204 = vector.broadcast %203 : vector<1x128xf32> to vector<8x128xf32>
    %205 = arith.addf %202, %204 : vector<8x128xf32>
    %206 = vector.extract_strided_slice %197 {offsets = [0, 256], sizes = [8, 128], strides = [1, 1]} : vector<8x768xf32> to vector<8x128xf32>
    %207 = vector.extract_strided_slice %191 {offsets = [2, 0], sizes = [1, 128], strides = [1, 1]} : vector<16x128xf32> to vector<1x128xf32>
    %208 = vector.broadcast %207 : vector<1x128xf32> to vector<8x128xf32>
    %209 = arith.addf %206, %208 : vector<8x128xf32>
    %210 = arith.truncf %201 : vector<8x128xf32> to vector<8x128xbf16>
    %211 = arith.truncf %205 : vector<8x128xf32> to vector<8x128xbf16>
    %cst_65 = arith.constant dense<0.000000e+00> : vector<8x8xf32>
    %212 = tpu.matmul %210, %211, %cst_65 {dimension_numbers = #tpu.dot_dimension_numbers<[1], [1], [0], [0], [0, 0, 1, 0], [], []>} : vector<8x128xbf16>, vector<8x128xbf16>, vector<8x8xf32> -> vector<8x8xf32>
    %213 = vector.broadcast %8 : vector<1x8xf32> to vector<8x8xf32>
    %214 = arith.addf %212, %213 : vector<8x8xf32>
    %cst_66 = arith.constant dense<0xFF800000> : vector<8xf32>
    %215 = vector.multi_reduction <maximumf>, %214, %cst_66 [1] : vector<8x8xf32> to vector<8xf32>
    %216 = vector.shape_cast %215 : vector<8xf32> to vector<8x1xf32>
    %217 = vector.broadcast %216 : vector<8x1xf32> to vector<8x8xf32>
    %218 = arith.subf %214, %217 : vector<8x8xf32>
    %219 = math.exp %218 : vector<8x8xf32>
    %cst_67 = arith.constant dense<0.000000e+00> : vector<8xf32>
    %220 = vector.multi_reduction <add>, %219, %cst_67 [1] : vector<8x8xf32> to vector<8xf32>
    %221 = vector.shape_cast %220 : vector<8xf32> to vector<8x1xf32>
    %222 = tpu.reciprocal %221 {approx = true} : vector<8x1xf32> -> vector<8x1xf32>
    %223 = vector.broadcast %222 : vector<8x1xf32> to vector<8x8xf32>
    %224 = arith.mulf %219, %223 : vector<8x8xf32>
    %225 = arith.truncf %224 : vector<8x8xf32> to vector<8x8xbf16>
    %226 = arith.truncf %209 : vector<8x128xf32> to vector<8x128xbf16>
    %cst_68 = arith.constant dense<0.000000e+00> : vector<8x128xf32>
    %227 = tpu.matmul %225, %226, %cst_68 {dimension_numbers = #tpu.dot_dimension_numbers<[1], [0], [0], [1], [0, 0, 1, 1], [], []>} : vector<8x8xbf16>, vector<8x128xbf16>, vector<8x128xf32> -> vector<8x128xf32>
    %228 = vector.extract_strided_slice %193 {offsets = [0, 0], sizes = [128, 128], strides = [1, 1]} : vector<256x128xbf16> to vector<128x128xbf16>
    %229 = arith.truncf %227 : vector<8x128xf32> to vector<8x128xbf16>
    %cst_69 = arith.constant dense<0.000000e+00> : vector<8x128xf32>
    %230 = tpu.matmul %229, %228, %cst_69 {dimension_numbers = #tpu.dot_dimension_numbers<[1], [0], [0], [1], [0, 0, 1, 1], [], []>} : vector<8x128xbf16>, vector<128x128xbf16>, vector<8x128xf32> -> vector<8x128xf32>
    %231 = vector.extract_strided_slice %197 {offsets = [0, 384], sizes = [8, 128], strides = [1, 1]} : vector<8x768xf32> to vector<8x128xf32>
    %232 = vector.extract_strided_slice %191 {offsets = [3, 0], sizes = [1, 128], strides = [1, 1]} : vector<16x128xf32> to vector<1x128xf32>
    %233 = vector.broadcast %232 : vector<1x128xf32> to vector<8x128xf32>
    %234 = arith.addf %231, %233 : vector<8x128xf32>
    %235 = vector.extract_strided_slice %197 {offsets = [0, 512], sizes = [8, 128], strides = [1, 1]} : vector<8x768xf32> to vector<8x128xf32>
    %236 = vector.extract_strided_slice %191 {offsets = [4, 0], sizes = [1, 128], strides = [1, 1]} : vector<16x128xf32> to vector<1x128xf32>
    %237 = vector.broadcast %236 : vector<1x128xf32> to vector<8x128xf32>
    %238 = arith.addf %235, %237 : vector<8x128xf32>
    %239 = vector.extract_strided_slice %197 {offsets = [0, 640], sizes = [8, 128], strides = [1, 1]} : vector<8x768xf32> to vector<8x128xf32>
    %240 = vector.extract_strided_slice %191 {offsets = [5, 0], sizes = [1, 128], strides = [1, 1]} : vector<16x128xf32> to vector<1x128xf32>
    %241 = vector.broadcast %240 : vector<1x128xf32> to vector<8x128xf32>
    %242 = arith.addf %239, %241 : vector<8x128xf32>
    %243 = arith.truncf %234 : vector<8x128xf32> to vector<8x128xbf16>
    %244 = arith.truncf %238 : vector<8x128xf32> to vector<8x128xbf16>
    %cst_70 = arith.constant dense<0.000000e+00> : vector<8x8xf32>
    %245 = tpu.matmul %243, %244, %cst_70 {dimension_numbers = #tpu.dot_dimension_numbers<[1], [1], [0], [0], [0, 0, 1, 0], [], []>} : vector<8x128xbf16>, vector<8x128xbf16>, vector<8x8xf32> -> vector<8x8xf32>
    %246 = vector.broadcast %8 : vector<1x8xf32> to vector<8x8xf32>
    %247 = arith.addf %245, %246 : vector<8x8xf32>
    %cst_71 = arith.constant dense<0xFF800000> : vector<8xf32>
    %248 = vector.multi_reduction <maximumf>, %247, %cst_71 [1] : vector<8x8xf32> to vector<8xf32>
    %249 = vector.shape_cast %248 : vector<8xf32> to vector<8x1xf32>
    %250 = vector.broadcast %249 : vector<8x1xf32> to vector<8x8xf32>
    %251 = arith.subf %247, %250 : vector<8x8xf32>
    %252 = math.exp %251 : vector<8x8xf32>
    %cst_72 = arith.constant dense<0.000000e+00> : vector<8xf32>
    %253 = vector.multi_reduction <add>, %252, %cst_72 [1] : vector<8x8xf32> to vector<8xf32>
    %254 = vector.shape_cast %253 : vector<8xf32> to vector<8x1xf32>
    %255 = tpu.reciprocal %254 {approx = true} : vector<8x1xf32> -> vector<8x1xf32>
    %256 = vector.broadcast %255 : vector<8x1xf32> to vector<8x8xf32>
    %257 = arith.mulf %252, %256 : vector<8x8xf32>
    %258 = arith.truncf %257 : vector<8x8xf32> to vector<8x8xbf16>
    %259 = arith.truncf %242 : vector<8x128xf32> to vector<8x128xbf16>
    %cst_73 = arith.constant dense<0.000000e+00> : vector<8x128xf32>
    %260 = tpu.matmul %258, %259, %cst_73 {dimension_numbers = #tpu.dot_dimension_numbers<[1], [0], [0], [1], [0, 0, 1, 1], [], []>} : vector<8x8xbf16>, vector<8x128xbf16>, vector<8x128xf32> -> vector<8x128xf32>
    %261 = vector.extract_strided_slice %193 {offsets = [128, 0], sizes = [128, 128], strides = [1, 1]} : vector<256x128xbf16> to vector<128x128xbf16>
    %262 = arith.truncf %260 : vector<8x128xf32> to vector<8x128xbf16>
    %cst_74 = arith.constant dense<0.000000e+00> : vector<8x128xf32>
    %263 = tpu.matmul %262, %261, %cst_74 {dimension_numbers = #tpu.dot_dimension_numbers<[1], [0], [0], [1], [0, 0, 1, 1], [], []>} : vector<8x128xbf16>, vector<128x128xbf16>, vector<8x128xf32> -> vector<8x128xf32>
    %264 = arith.addf %230, %263 : vector<8x128xf32>
    %265 = vector.extract_strided_slice %191 {offsets = [6, 0], sizes = [1, 128], strides = [1, 1]} : vector<16x128xf32> to vector<1x128xf32>
    %266 = vector.broadcast %265 : vector<1x128xf32> to vector<8x128xf32>
    %267 = arith.addf %264, %266 : vector<8x128xf32>
    %268 = arith.addf %267, %188 : vector<8x128xf32>
    %269 = vector.extract_strided_slice %191 {offsets = [7, 0], sizes = [1, 128], strides = [1, 1]} : vector<16x128xf32> to vector<1x128xf32>
    %270 = vector.extract_strided_slice %191 {offsets = [8, 0], sizes = [1, 128], strides = [1, 1]} : vector<16x128xf32> to vector<1x128xf32>
    %cst_75 = arith.constant dense<0.000000e+00> : vector<8xf32>
    %271 = vector.multi_reduction <add>, %268, %cst_75 [1] : vector<8x128xf32> to vector<8xf32>
    %272 = vector.shape_cast %271 : vector<8xf32> to vector<8x1xf32>
    %cst_76 = arith.constant 3.125000e-02 : f32
    %273 = vector.broadcast %cst_76 : f32 to vector<8x1xf32>
    %274 = arith.mulf %272, %273 : vector<8x1xf32>
    %275 = vector.broadcast %274 : vector<8x1xf32> to vector<8x128xf32>
    %276 = arith.subf %268, %275 : vector<8x128xf32>
    %277 = vector.broadcast %4 : vector<1x128xf32> to vector<8x128xf32>
    %278 = arith.mulf %276, %277 : vector<8x128xf32>
    %279 = arith.mulf %278, %278 : vector<8x128xf32>
    %cst_77 = arith.constant dense<0.000000e+00> : vector<8xf32>
    %280 = vector.multi_reduction <add>, %279, %cst_77 [1] : vector<8x128xf32> to vector<8xf32>
    %281 = vector.shape_cast %280 : vector<8xf32> to vector<8x1xf32>
    %cst_78 = arith.constant 3.125000e-02 : f32
    %282 = vector.broadcast %cst_78 : f32 to vector<8x1xf32>
    %283 = arith.mulf %281, %282 : vector<8x1xf32>
    %cst_79 = arith.constant 9.99999996E-13 : f32
    %284 = vector.broadcast %cst_79 : f32 to vector<8x1xf32>
    %285 = arith.addf %283, %284 : vector<8x1xf32>
    %286 = math.rsqrt %285 : vector<8x1xf32>
    %287 = vector.broadcast %286 : vector<8x1xf32> to vector<8x128xf32>
    %288 = arith.mulf %278, %287 : vector<8x128xf32>
    %289 = vector.broadcast %269 : vector<1x128xf32> to vector<8x128xf32>
    %290 = arith.mulf %288, %289 : vector<8x128xf32>
    %291 = vector.broadcast %270 : vector<1x128xf32> to vector<8x128xf32>
    %292 = arith.addf %290, %291 : vector<8x128xf32>
    %c1_80 = arith.constant 1 : index
    %c0_81 = arith.constant 0 : index
    %c0_82 = arith.constant 0 : index
    %293 = vector.load %arg6[%c1_80, %c0_81, %c0_82] : memref<4x128x128xbf16, #tpu.memory_space<vmem>>, vector<1x128x128xbf16>
    %294 = vector.shape_cast %293 : vector<1x128x128xbf16> to vector<128x128xbf16>
    %295 = arith.truncf %292 : vector<8x128xf32> to vector<8x128xbf16>
    %cst_83 = arith.constant dense<0.000000e+00> : vector<8x128xf32>
    %296 = tpu.matmul %295, %294, %cst_83 {dimension_numbers = #tpu.dot_dimension_numbers<[1], [0], [0], [1], [0, 0, 1, 1], [], []>} : vector<8x128xbf16>, vector<128x128xbf16>, vector<8x128xf32> -> vector<8x128xf32>
    %297 = vector.extract_strided_slice %191 {offsets = [9, 0], sizes = [1, 128], strides = [1, 1]} : vector<16x128xf32> to vector<1x128xf32>
    %298 = vector.broadcast %297 : vector<1x128xf32> to vector<8x128xf32>
    %299 = arith.addf %296, %298 : vector<8x128xf32>
    %cst_84 = arith.constant 5.000000e-01 : f32
    %300 = vector.broadcast %cst_84 : f32 to vector<8x128xf32>
    %301 = arith.mulf %300, %299 : vector<8x128xf32>
    %cst_85 = arith.constant 4.471500e-02 : f32
    %302 = vector.broadcast %cst_85 : f32 to vector<8x128xf32>
    %303 = arith.mulf %302, %299 : vector<8x128xf32>
    %304 = arith.mulf %303, %299 : vector<8x128xf32>
    %305 = arith.mulf %304, %299 : vector<8x128xf32>
    %306 = arith.addf %299, %305 : vector<8x128xf32>
    %cst_86 = arith.constant 0.797884583 : f32
    %307 = vector.broadcast %cst_86 : f32 to vector<8x128xf32>
    %308 = arith.mulf %307, %306 : vector<8x128xf32>
    %309 = math.tanh %308 : vector<8x128xf32>
    %cst_87 = arith.constant 1.000000e+00 : f32
    %310 = vector.broadcast %cst_87 : f32 to vector<8x128xf32>
    %311 = arith.addf %310, %309 : vector<8x128xf32>
    %312 = arith.mulf %301, %311 : vector<8x128xf32>
    %c1_88 = arith.constant 1 : index
    %c0_89 = arith.constant 0 : index
    %c0_90 = arith.constant 0 : index
    %313 = vector.load %arg7[%c1_88, %c0_89, %c0_90] : memref<4x128x128xbf16, #tpu.memory_space<vmem>>, vector<1x128x128xbf16>
    %314 = vector.shape_cast %313 : vector<1x128x128xbf16> to vector<128x128xbf16>
    %315 = arith.truncf %312 : vector<8x128xf32> to vector<8x128xbf16>
    %cst_91 = arith.constant dense<0.000000e+00> : vector<8x128xf32>
    %316 = tpu.matmul %315, %314, %cst_91 {dimension_numbers = #tpu.dot_dimension_numbers<[1], [0], [0], [1], [0, 0, 1, 1], [], []>} : vector<8x128xbf16>, vector<128x128xbf16>, vector<8x128xf32> -> vector<8x128xf32>
    %317 = vector.extract_strided_slice %191 {offsets = [10, 0], sizes = [1, 128], strides = [1, 1]} : vector<16x128xf32> to vector<1x128xf32>
    %318 = vector.broadcast %317 : vector<1x128xf32> to vector<8x128xf32>
    %319 = arith.addf %316, %318 : vector<8x128xf32>
    %320 = arith.addf %319, %292 : vector<8x128xf32>
    %321 = vector.extract_strided_slice %191 {offsets = [11, 0], sizes = [1, 128], strides = [1, 1]} : vector<16x128xf32> to vector<1x128xf32>
    %322 = vector.extract_strided_slice %191 {offsets = [12, 0], sizes = [1, 128], strides = [1, 1]} : vector<16x128xf32> to vector<1x128xf32>
    %cst_92 = arith.constant dense<0.000000e+00> : vector<8xf32>
    %323 = vector.multi_reduction <add>, %320, %cst_92 [1] : vector<8x128xf32> to vector<8xf32>
    %324 = vector.shape_cast %323 : vector<8xf32> to vector<8x1xf32>
    %cst_93 = arith.constant 3.125000e-02 : f32
    %325 = vector.broadcast %cst_93 : f32 to vector<8x1xf32>
    %326 = arith.mulf %324, %325 : vector<8x1xf32>
    %327 = vector.broadcast %326 : vector<8x1xf32> to vector<8x128xf32>
    %328 = arith.subf %320, %327 : vector<8x128xf32>
    %329 = vector.broadcast %4 : vector<1x128xf32> to vector<8x128xf32>
    %330 = arith.mulf %328, %329 : vector<8x128xf32>
    %331 = arith.mulf %330, %330 : vector<8x128xf32>
    %cst_94 = arith.constant dense<0.000000e+00> : vector<8xf32>
    %332 = vector.multi_reduction <add>, %331, %cst_94 [1] : vector<8x128xf32> to vector<8xf32>
    %333 = vector.shape_cast %332 : vector<8xf32> to vector<8x1xf32>
    %cst_95 = arith.constant 3.125000e-02 : f32
    %334 = vector.broadcast %cst_95 : f32 to vector<8x1xf32>
    %335 = arith.mulf %333, %334 : vector<8x1xf32>
    %cst_96 = arith.constant 9.99999996E-13 : f32
    %336 = vector.broadcast %cst_96 : f32 to vector<8x1xf32>
    %337 = arith.addf %335, %336 : vector<8x1xf32>
    %338 = math.rsqrt %337 : vector<8x1xf32>
    %339 = vector.broadcast %338 : vector<8x1xf32> to vector<8x128xf32>
    %340 = arith.mulf %330, %339 : vector<8x128xf32>
    %341 = vector.broadcast %321 : vector<1x128xf32> to vector<8x128xf32>
    %342 = arith.mulf %340, %341 : vector<8x128xf32>
    %343 = vector.broadcast %322 : vector<1x128xf32> to vector<8x128xf32>
    %344 = arith.addf %342, %343 : vector<8x128xf32>
    %345 = arith.addf %189, %344 : vector<8x128xf32>
    %c2 = arith.constant 2 : index
    %c0_97 = arith.constant 0 : index
    %c0_98 = arith.constant 0 : index
    %346 = vector.load %arg8[%c2, %c0_97, %c0_98] : memref<4x16x128xf32, #tpu.memory_space<vmem>>, vector<1x16x128xf32>
    %347 = vector.shape_cast %346 : vector<1x16x128xf32> to vector<16x128xf32>
    %c2_99 = arith.constant 2 : index
    %c0_100 = arith.constant 0 : index
    %c0_101 = arith.constant 0 : index
    %348 = vector.load %arg5[%c2_99, %c0_100, %c0_101] : memref<4x256x128xbf16, #tpu.memory_space<vmem>>, vector<1x256x128xbf16>
    %349 = vector.shape_cast %348 : vector<1x256x128xbf16> to vector<256x128xbf16>
    %c2_102 = arith.constant 2 : index
    %c0_103 = arith.constant 0 : index
    %c0_104 = arith.constant 0 : index
    %350 = vector.load %arg4[%c2_102, %c0_103, %c0_104] : memref<4x128x768xbf16, #tpu.memory_space<vmem>>, vector<1x128x768xbf16>
    %351 = vector.shape_cast %350 : vector<1x128x768xbf16> to vector<128x768xbf16>
    %352 = arith.truncf %344 : vector<8x128xf32> to vector<8x128xbf16>
    %cst_105 = arith.constant dense<0.000000e+00> : vector<8x768xf32>
    %353 = tpu.matmul %352, %351, %cst_105 {dimension_numbers = #tpu.dot_dimension_numbers<[1], [0], [0], [1], [0, 0, 1, 1], [], []>} : vector<8x128xbf16>, vector<128x768xbf16>, vector<8x768xf32> -> vector<8x768xf32>
    %354 = vector.extract_strided_slice %353 {offsets = [0, 0], sizes = [8, 128], strides = [1, 1]} : vector<8x768xf32> to vector<8x128xf32>
    %355 = vector.extract_strided_slice %347 {offsets = [0, 0], sizes = [1, 128], strides = [1, 1]} : vector<16x128xf32> to vector<1x128xf32>
    %356 = vector.broadcast %355 : vector<1x128xf32> to vector<8x128xf32>
    %357 = arith.addf %354, %356 : vector<8x128xf32>
    %358 = vector.extract_strided_slice %353 {offsets = [0, 128], sizes = [8, 128], strides = [1, 1]} : vector<8x768xf32> to vector<8x128xf32>
    %359 = vector.extract_strided_slice %347 {offsets = [1, 0], sizes = [1, 128], strides = [1, 1]} : vector<16x128xf32> to vector<1x128xf32>
    %360 = vector.broadcast %359 : vector<1x128xf32> to vector<8x128xf32>
    %361 = arith.addf %358, %360 : vector<8x128xf32>
    %362 = vector.extract_strided_slice %353 {offsets = [0, 256], sizes = [8, 128], strides = [1, 1]} : vector<8x768xf32> to vector<8x128xf32>
    %363 = vector.extract_strided_slice %347 {offsets = [2, 0], sizes = [1, 128], strides = [1, 1]} : vector<16x128xf32> to vector<1x128xf32>
    %364 = vector.broadcast %363 : vector<1x128xf32> to vector<8x128xf32>
    %365 = arith.addf %362, %364 : vector<8x128xf32>
    %366 = arith.truncf %357 : vector<8x128xf32> to vector<8x128xbf16>
    %367 = arith.truncf %361 : vector<8x128xf32> to vector<8x128xbf16>
    %cst_106 = arith.constant dense<0.000000e+00> : vector<8x8xf32>
    %368 = tpu.matmul %366, %367, %cst_106 {dimension_numbers = #tpu.dot_dimension_numbers<[1], [1], [0], [0], [0, 0, 1, 0], [], []>} : vector<8x128xbf16>, vector<8x128xbf16>, vector<8x8xf32> -> vector<8x8xf32>
    %369 = vector.broadcast %8 : vector<1x8xf32> to vector<8x8xf32>
    %370 = arith.addf %368, %369 : vector<8x8xf32>
    %cst_107 = arith.constant dense<0xFF800000> : vector<8xf32>
    %371 = vector.multi_reduction <maximumf>, %370, %cst_107 [1] : vector<8x8xf32> to vector<8xf32>
    %372 = vector.shape_cast %371 : vector<8xf32> to vector<8x1xf32>
    %373 = vector.broadcast %372 : vector<8x1xf32> to vector<8x8xf32>
    %374 = arith.subf %370, %373 : vector<8x8xf32>
    %375 = math.exp %374 : vector<8x8xf32>
    %cst_108 = arith.constant dense<0.000000e+00> : vector<8xf32>
    %376 = vector.multi_reduction <add>, %375, %cst_108 [1] : vector<8x8xf32> to vector<8xf32>
    %377 = vector.shape_cast %376 : vector<8xf32> to vector<8x1xf32>
    %378 = tpu.reciprocal %377 {approx = true} : vector<8x1xf32> -> vector<8x1xf32>
    %379 = vector.broadcast %378 : vector<8x1xf32> to vector<8x8xf32>
    %380 = arith.mulf %375, %379 : vector<8x8xf32>
    %381 = arith.truncf %380 : vector<8x8xf32> to vector<8x8xbf16>
    %382 = arith.truncf %365 : vector<8x128xf32> to vector<8x128xbf16>
    %cst_109 = arith.constant dense<0.000000e+00> : vector<8x128xf32>
    %383 = tpu.matmul %381, %382, %cst_109 {dimension_numbers = #tpu.dot_dimension_numbers<[1], [0], [0], [1], [0, 0, 1, 1], [], []>} : vector<8x8xbf16>, vector<8x128xbf16>, vector<8x128xf32> -> vector<8x128xf32>
    %384 = vector.extract_strided_slice %349 {offsets = [0, 0], sizes = [128, 128], strides = [1, 1]} : vector<256x128xbf16> to vector<128x128xbf16>
    %385 = arith.truncf %383 : vector<8x128xf32> to vector<8x128xbf16>
    %cst_110 = arith.constant dense<0.000000e+00> : vector<8x128xf32>
    %386 = tpu.matmul %385, %384, %cst_110 {dimension_numbers = #tpu.dot_dimension_numbers<[1], [0], [0], [1], [0, 0, 1, 1], [], []>} : vector<8x128xbf16>, vector<128x128xbf16>, vector<8x128xf32> -> vector<8x128xf32>
    %387 = vector.extract_strided_slice %353 {offsets = [0, 384], sizes = [8, 128], strides = [1, 1]} : vector<8x768xf32> to vector<8x128xf32>
    %388 = vector.extract_strided_slice %347 {offsets = [3, 0], sizes = [1, 128], strides = [1, 1]} : vector<16x128xf32> to vector<1x128xf32>
    %389 = vector.broadcast %388 : vector<1x128xf32> to vector<8x128xf32>
    %390 = arith.addf %387, %389 : vector<8x128xf32>
    %391 = vector.extract_strided_slice %353 {offsets = [0, 512], sizes = [8, 128], strides = [1, 1]} : vector<8x768xf32> to vector<8x128xf32>
    %392 = vector.extract_strided_slice %347 {offsets = [4, 0], sizes = [1, 128], strides = [1, 1]} : vector<16x128xf32> to vector<1x128xf32>
    %393 = vector.broadcast %392 : vector<1x128xf32> to vector<8x128xf32>
    %394 = arith.addf %391, %393 : vector<8x128xf32>
    %395 = vector.extract_strided_slice %353 {offsets = [0, 640], sizes = [8, 128], strides = [1, 1]} : vector<8x768xf32> to vector<8x128xf32>
    %396 = vector.extract_strided_slice %347 {offsets = [5, 0], sizes = [1, 128], strides = [1, 1]} : vector<16x128xf32> to vector<1x128xf32>
    %397 = vector.broadcast %396 : vector<1x128xf32> to vector<8x128xf32>
    %398 = arith.addf %395, %397 : vector<8x128xf32>
    %399 = arith.truncf %390 : vector<8x128xf32> to vector<8x128xbf16>
    %400 = arith.truncf %394 : vector<8x128xf32> to vector<8x128xbf16>
    %cst_111 = arith.constant dense<0.000000e+00> : vector<8x8xf32>
    %401 = tpu.matmul %399, %400, %cst_111 {dimension_numbers = #tpu.dot_dimension_numbers<[1], [1], [0], [0], [0, 0, 1, 0], [], []>} : vector<8x128xbf16>, vector<8x128xbf16>, vector<8x8xf32> -> vector<8x8xf32>
    %402 = vector.broadcast %8 : vector<1x8xf32> to vector<8x8xf32>
    %403 = arith.addf %401, %402 : vector<8x8xf32>
    %cst_112 = arith.constant dense<0xFF800000> : vector<8xf32>
    %404 = vector.multi_reduction <maximumf>, %403, %cst_112 [1] : vector<8x8xf32> to vector<8xf32>
    %405 = vector.shape_cast %404 : vector<8xf32> to vector<8x1xf32>
    %406 = vector.broadcast %405 : vector<8x1xf32> to vector<8x8xf32>
    %407 = arith.subf %403, %406 : vector<8x8xf32>
    %408 = math.exp %407 : vector<8x8xf32>
    %cst_113 = arith.constant dense<0.000000e+00> : vector<8xf32>
    %409 = vector.multi_reduction <add>, %408, %cst_113 [1] : vector<8x8xf32> to vector<8xf32>
    %410 = vector.shape_cast %409 : vector<8xf32> to vector<8x1xf32>
    %411 = tpu.reciprocal %410 {approx = true} : vector<8x1xf32> -> vector<8x1xf32>
    %412 = vector.broadcast %411 : vector<8x1xf32> to vector<8x8xf32>
    %413 = arith.mulf %408, %412 : vector<8x8xf32>
    %414 = arith.truncf %413 : vector<8x8xf32> to vector<8x8xbf16>
    %415 = arith.truncf %398 : vector<8x128xf32> to vector<8x128xbf16>
    %cst_114 = arith.constant dense<0.000000e+00> : vector<8x128xf32>
    %416 = tpu.matmul %414, %415, %cst_114 {dimension_numbers = #tpu.dot_dimension_numbers<[1], [0], [0], [1], [0, 0, 1, 1], [], []>} : vector<8x8xbf16>, vector<8x128xbf16>, vector<8x128xf32> -> vector<8x128xf32>
    %417 = vector.extract_strided_slice %349 {offsets = [128, 0], sizes = [128, 128], strides = [1, 1]} : vector<256x128xbf16> to vector<128x128xbf16>
    %418 = arith.truncf %416 : vector<8x128xf32> to vector<8x128xbf16>
    %cst_115 = arith.constant dense<0.000000e+00> : vector<8x128xf32>
    %419 = tpu.matmul %418, %417, %cst_115 {dimension_numbers = #tpu.dot_dimension_numbers<[1], [0], [0], [1], [0, 0, 1, 1], [], []>} : vector<8x128xbf16>, vector<128x128xbf16>, vector<8x128xf32> -> vector<8x128xf32>
    %420 = arith.addf %386, %419 : vector<8x128xf32>
    %421 = vector.extract_strided_slice %347 {offsets = [6, 0], sizes = [1, 128], strides = [1, 1]} : vector<16x128xf32> to vector<1x128xf32>
    %422 = vector.broadcast %421 : vector<1x128xf32> to vector<8x128xf32>
    %423 = arith.addf %420, %422 : vector<8x128xf32>
    %424 = arith.addf %423, %344 : vector<8x128xf32>
    %425 = vector.extract_strided_slice %347 {offsets = [7, 0], sizes = [1, 128], strides = [1, 1]} : vector<16x128xf32> to vector<1x128xf32>
    %426 = vector.extract_strided_slice %347 {offsets = [8, 0], sizes = [1, 128], strides = [1, 1]} : vector<16x128xf32> to vector<1x128xf32>
    %cst_116 = arith.constant dense<0.000000e+00> : vector<8xf32>
    %427 = vector.multi_reduction <add>, %424, %cst_116 [1] : vector<8x128xf32> to vector<8xf32>
    %428 = vector.shape_cast %427 : vector<8xf32> to vector<8x1xf32>
    %cst_117 = arith.constant 3.125000e-02 : f32
    %429 = vector.broadcast %cst_117 : f32 to vector<8x1xf32>
    %430 = arith.mulf %428, %429 : vector<8x1xf32>
    %431 = vector.broadcast %430 : vector<8x1xf32> to vector<8x128xf32>
    %432 = arith.subf %424, %431 : vector<8x128xf32>
    %433 = vector.broadcast %4 : vector<1x128xf32> to vector<8x128xf32>
    %434 = arith.mulf %432, %433 : vector<8x128xf32>
    %435 = arith.mulf %434, %434 : vector<8x128xf32>
    %cst_118 = arith.constant dense<0.000000e+00> : vector<8xf32>
    %436 = vector.multi_reduction <add>, %435, %cst_118 [1] : vector<8x128xf32> to vector<8xf32>
    %437 = vector.shape_cast %436 : vector<8xf32> to vector<8x1xf32>
    %cst_119 = arith.constant 3.125000e-02 : f32
    %438 = vector.broadcast %cst_119 : f32 to vector<8x1xf32>
    %439 = arith.mulf %437, %438 : vector<8x1xf32>
    %cst_120 = arith.constant 9.99999996E-13 : f32
    %440 = vector.broadcast %cst_120 : f32 to vector<8x1xf32>
    %441 = arith.addf %439, %440 : vector<8x1xf32>
    %442 = math.rsqrt %441 : vector<8x1xf32>
    %443 = vector.broadcast %442 : vector<8x1xf32> to vector<8x128xf32>
    %444 = arith.mulf %434, %443 : vector<8x128xf32>
    %445 = vector.broadcast %425 : vector<1x128xf32> to vector<8x128xf32>
    %446 = arith.mulf %444, %445 : vector<8x128xf32>
    %447 = vector.broadcast %426 : vector<1x128xf32> to vector<8x128xf32>
    %448 = arith.addf %446, %447 : vector<8x128xf32>
    %c2_121 = arith.constant 2 : index
    %c0_122 = arith.constant 0 : index
    %c0_123 = arith.constant 0 : index
    %449 = vector.load %arg6[%c2_121, %c0_122, %c0_123] : memref<4x128x128xbf16, #tpu.memory_space<vmem>>, vector<1x128x128xbf16>
    %450 = vector.shape_cast %449 : vector<1x128x128xbf16> to vector<128x128xbf16>
    %451 = arith.truncf %448 : vector<8x128xf32> to vector<8x128xbf16>
    %cst_124 = arith.constant dense<0.000000e+00> : vector<8x128xf32>
    %452 = tpu.matmul %451, %450, %cst_124 {dimension_numbers = #tpu.dot_dimension_numbers<[1], [0], [0], [1], [0, 0, 1, 1], [], []>} : vector<8x128xbf16>, vector<128x128xbf16>, vector<8x128xf32> -> vector<8x128xf32>
    %453 = vector.extract_strided_slice %347 {offsets = [9, 0], sizes = [1, 128], strides = [1, 1]} : vector<16x128xf32> to vector<1x128xf32>
    %454 = vector.broadcast %453 : vector<1x128xf32> to vector<8x128xf32>
    %455 = arith.addf %452, %454 : vector<8x128xf32>
    %cst_125 = arith.constant 5.000000e-01 : f32
    %456 = vector.broadcast %cst_125 : f32 to vector<8x128xf32>
    %457 = arith.mulf %456, %455 : vector<8x128xf32>
    %cst_126 = arith.constant 4.471500e-02 : f32
    %458 = vector.broadcast %cst_126 : f32 to vector<8x128xf32>
    %459 = arith.mulf %458, %455 : vector<8x128xf32>
    %460 = arith.mulf %459, %455 : vector<8x128xf32>
    %461 = arith.mulf %460, %455 : vector<8x128xf32>
    %462 = arith.addf %455, %461 : vector<8x128xf32>
    %cst_127 = arith.constant 0.797884583 : f32
    %463 = vector.broadcast %cst_127 : f32 to vector<8x128xf32>
    %464 = arith.mulf %463, %462 : vector<8x128xf32>
    %465 = math.tanh %464 : vector<8x128xf32>
    %cst_128 = arith.constant 1.000000e+00 : f32
    %466 = vector.broadcast %cst_128 : f32 to vector<8x128xf32>
    %467 = arith.addf %466, %465 : vector<8x128xf32>
    %468 = arith.mulf %457, %467 : vector<8x128xf32>
    %c2_129 = arith.constant 2 : index
    %c0_130 = arith.constant 0 : index
    %c0_131 = arith.constant 0 : index
    %469 = vector.load %arg7[%c2_129, %c0_130, %c0_131] : memref<4x128x128xbf16, #tpu.memory_space<vmem>>, vector<1x128x128xbf16>
    %470 = vector.shape_cast %469 : vector<1x128x128xbf16> to vector<128x128xbf16>
    %471 = arith.truncf %468 : vector<8x128xf32> to vector<8x128xbf16>
    %cst_132 = arith.constant dense<0.000000e+00> : vector<8x128xf32>
    %472 = tpu.matmul %471, %470, %cst_132 {dimension_numbers = #tpu.dot_dimension_numbers<[1], [0], [0], [1], [0, 0, 1, 1], [], []>} : vector<8x128xbf16>, vector<128x128xbf16>, vector<8x128xf32> -> vector<8x128xf32>
    %473 = vector.extract_strided_slice %347 {offsets = [10, 0], sizes = [1, 128], strides = [1, 1]} : vector<16x128xf32> to vector<1x128xf32>
    %474 = vector.broadcast %473 : vector<1x128xf32> to vector<8x128xf32>
    %475 = arith.addf %472, %474 : vector<8x128xf32>
    %476 = arith.addf %475, %448 : vector<8x128xf32>
    %477 = vector.extract_strided_slice %347 {offsets = [11, 0], sizes = [1, 128], strides = [1, 1]} : vector<16x128xf32> to vector<1x128xf32>
    %478 = vector.extract_strided_slice %347 {offsets = [12, 0], sizes = [1, 128], strides = [1, 1]} : vector<16x128xf32> to vector<1x128xf32>
    %cst_133 = arith.constant dense<0.000000e+00> : vector<8xf32>
    %479 = vector.multi_reduction <add>, %476, %cst_133 [1] : vector<8x128xf32> to vector<8xf32>
    %480 = vector.shape_cast %479 : vector<8xf32> to vector<8x1xf32>
    %cst_134 = arith.constant 3.125000e-02 : f32
    %481 = vector.broadcast %cst_134 : f32 to vector<8x1xf32>
    %482 = arith.mulf %480, %481 : vector<8x1xf32>
    %483 = vector.broadcast %482 : vector<8x1xf32> to vector<8x128xf32>
    %484 = arith.subf %476, %483 : vector<8x128xf32>
    %485 = vector.broadcast %4 : vector<1x128xf32> to vector<8x128xf32>
    %486 = arith.mulf %484, %485 : vector<8x128xf32>
    %487 = arith.mulf %486, %486 : vector<8x128xf32>
    %cst_135 = arith.constant dense<0.000000e+00> : vector<8xf32>
    %488 = vector.multi_reduction <add>, %487, %cst_135 [1] : vector<8x128xf32> to vector<8xf32>
    %489 = vector.shape_cast %488 : vector<8xf32> to vector<8x1xf32>
    %cst_136 = arith.constant 3.125000e-02 : f32
    %490 = vector.broadcast %cst_136 : f32 to vector<8x1xf32>
    %491 = arith.mulf %489, %490 : vector<8x1xf32>
    %cst_137 = arith.constant 9.99999996E-13 : f32
    %492 = vector.broadcast %cst_137 : f32 to vector<8x1xf32>
    %493 = arith.addf %491, %492 : vector<8x1xf32>
    %494 = math.rsqrt %493 : vector<8x1xf32>
    %495 = vector.broadcast %494 : vector<8x1xf32> to vector<8x128xf32>
    %496 = arith.mulf %486, %495 : vector<8x128xf32>
    %497 = vector.broadcast %477 : vector<1x128xf32> to vector<8x128xf32>
    %498 = arith.mulf %496, %497 : vector<8x128xf32>
    %499 = vector.broadcast %478 : vector<1x128xf32> to vector<8x128xf32>
    %500 = arith.addf %498, %499 : vector<8x128xf32>
    %501 = arith.addf %345, %500 : vector<8x128xf32>
    %c3 = arith.constant 3 : index
    %c0_138 = arith.constant 0 : index
    %c0_139 = arith.constant 0 : index
    %502 = vector.load %arg8[%c3, %c0_138, %c0_139] : memref<4x16x128xf32, #tpu.memory_space<vmem>>, vector<1x16x128xf32>
    %503 = vector.shape_cast %502 : vector<1x16x128xf32> to vector<16x128xf32>
    %c3_140 = arith.constant 3 : index
    %c0_141 = arith.constant 0 : index
    %c0_142 = arith.constant 0 : index
    %504 = vector.load %arg5[%c3_140, %c0_141, %c0_142] : memref<4x256x128xbf16, #tpu.memory_space<vmem>>, vector<1x256x128xbf16>
    %505 = vector.shape_cast %504 : vector<1x256x128xbf16> to vector<256x128xbf16>
    %c3_143 = arith.constant 3 : index
    %c0_144 = arith.constant 0 : index
    %c0_145 = arith.constant 0 : index
    %506 = vector.load %arg4[%c3_143, %c0_144, %c0_145] : memref<4x128x768xbf16, #tpu.memory_space<vmem>>, vector<1x128x768xbf16>
    %507 = vector.shape_cast %506 : vector<1x128x768xbf16> to vector<128x768xbf16>
    %508 = arith.truncf %500 : vector<8x128xf32> to vector<8x128xbf16>
    %cst_146 = arith.constant dense<0.000000e+00> : vector<8x768xf32>
    %509 = tpu.matmul %508, %507, %cst_146 {dimension_numbers = #tpu.dot_dimension_numbers<[1], [0], [0], [1], [0, 0, 1, 1], [], []>} : vector<8x128xbf16>, vector<128x768xbf16>, vector<8x768xf32> -> vector<8x768xf32>
    %510 = vector.extract_strided_slice %509 {offsets = [0, 0], sizes = [8, 128], strides = [1, 1]} : vector<8x768xf32> to vector<8x128xf32>
    %511 = vector.extract_strided_slice %503 {offsets = [0, 0], sizes = [1, 128], strides = [1, 1]} : vector<16x128xf32> to vector<1x128xf32>
    %512 = vector.broadcast %511 : vector<1x128xf32> to vector<8x128xf32>
    %513 = arith.addf %510, %512 : vector<8x128xf32>
    %514 = vector.extract_strided_slice %509 {offsets = [0, 128], sizes = [8, 128], strides = [1, 1]} : vector<8x768xf32> to vector<8x128xf32>
    %515 = vector.extract_strided_slice %503 {offsets = [1, 0], sizes = [1, 128], strides = [1, 1]} : vector<16x128xf32> to vector<1x128xf32>
    %516 = vector.broadcast %515 : vector<1x128xf32> to vector<8x128xf32>
    %517 = arith.addf %514, %516 : vector<8x128xf32>
    %518 = vector.extract_strided_slice %509 {offsets = [0, 256], sizes = [8, 128], strides = [1, 1]} : vector<8x768xf32> to vector<8x128xf32>
    %519 = vector.extract_strided_slice %503 {offsets = [2, 0], sizes = [1, 128], strides = [1, 1]} : vector<16x128xf32> to vector<1x128xf32>
    %520 = vector.broadcast %519 : vector<1x128xf32> to vector<8x128xf32>
    %521 = arith.addf %518, %520 : vector<8x128xf32>
    %522 = arith.truncf %513 : vector<8x128xf32> to vector<8x128xbf16>
    %523 = arith.truncf %517 : vector<8x128xf32> to vector<8x128xbf16>
    %cst_147 = arith.constant dense<0.000000e+00> : vector<8x8xf32>
    %524 = tpu.matmul %522, %523, %cst_147 {dimension_numbers = #tpu.dot_dimension_numbers<[1], [1], [0], [0], [0, 0, 1, 0], [], []>} : vector<8x128xbf16>, vector<8x128xbf16>, vector<8x8xf32> -> vector<8x8xf32>
    %525 = vector.broadcast %8 : vector<1x8xf32> to vector<8x8xf32>
    %526 = arith.addf %524, %525 : vector<8x8xf32>
    %cst_148 = arith.constant dense<0xFF800000> : vector<8xf32>
    %527 = vector.multi_reduction <maximumf>, %526, %cst_148 [1] : vector<8x8xf32> to vector<8xf32>
    %528 = vector.shape_cast %527 : vector<8xf32> to vector<8x1xf32>
    %529 = vector.broadcast %528 : vector<8x1xf32> to vector<8x8xf32>
    %530 = arith.subf %526, %529 : vector<8x8xf32>
    %531 = math.exp %530 : vector<8x8xf32>
    %cst_149 = arith.constant dense<0.000000e+00> : vector<8xf32>
    %532 = vector.multi_reduction <add>, %531, %cst_149 [1] : vector<8x8xf32> to vector<8xf32>
    %533 = vector.shape_cast %532 : vector<8xf32> to vector<8x1xf32>
    %534 = tpu.reciprocal %533 {approx = true} : vector<8x1xf32> -> vector<8x1xf32>
    %535 = vector.broadcast %534 : vector<8x1xf32> to vector<8x8xf32>
    %536 = arith.mulf %531, %535 : vector<8x8xf32>
    %537 = arith.truncf %536 : vector<8x8xf32> to vector<8x8xbf16>
    %538 = arith.truncf %521 : vector<8x128xf32> to vector<8x128xbf16>
    %cst_150 = arith.constant dense<0.000000e+00> : vector<8x128xf32>
    %539 = tpu.matmul %537, %538, %cst_150 {dimension_numbers = #tpu.dot_dimension_numbers<[1], [0], [0], [1], [0, 0, 1, 1], [], []>} : vector<8x8xbf16>, vector<8x128xbf16>, vector<8x128xf32> -> vector<8x128xf32>
    %540 = vector.extract_strided_slice %505 {offsets = [0, 0], sizes = [128, 128], strides = [1, 1]} : vector<256x128xbf16> to vector<128x128xbf16>
    %541 = arith.truncf %539 : vector<8x128xf32> to vector<8x128xbf16>
    %cst_151 = arith.constant dense<0.000000e+00> : vector<8x128xf32>
    %542 = tpu.matmul %541, %540, %cst_151 {dimension_numbers = #tpu.dot_dimension_numbers<[1], [0], [0], [1], [0, 0, 1, 1], [], []>} : vector<8x128xbf16>, vector<128x128xbf16>, vector<8x128xf32> -> vector<8x128xf32>
    %543 = vector.extract_strided_slice %509 {offsets = [0, 384], sizes = [8, 128], strides = [1, 1]} : vector<8x768xf32> to vector<8x128xf32>
    %544 = vector.extract_strided_slice %503 {offsets = [3, 0], sizes = [1, 128], strides = [1, 1]} : vector<16x128xf32> to vector<1x128xf32>
    %545 = vector.broadcast %544 : vector<1x128xf32> to vector<8x128xf32>
    %546 = arith.addf %543, %545 : vector<8x128xf32>
    %547 = vector.extract_strided_slice %509 {offsets = [0, 512], sizes = [8, 128], strides = [1, 1]} : vector<8x768xf32> to vector<8x128xf32>
    %548 = vector.extract_strided_slice %503 {offsets = [4, 0], sizes = [1, 128], strides = [1, 1]} : vector<16x128xf32> to vector<1x128xf32>
    %549 = vector.broadcast %548 : vector<1x128xf32> to vector<8x128xf32>
    %550 = arith.addf %547, %549 : vector<8x128xf32>
    %551 = vector.extract_strided_slice %509 {offsets = [0, 640], sizes = [8, 128], strides = [1, 1]} : vector<8x768xf32> to vector<8x128xf32>
    %552 = vector.extract_strided_slice %503 {offsets = [5, 0], sizes = [1, 128], strides = [1, 1]} : vector<16x128xf32> to vector<1x128xf32>
    %553 = vector.broadcast %552 : vector<1x128xf32> to vector<8x128xf32>
    %554 = arith.addf %551, %553 : vector<8x128xf32>
    %555 = arith.truncf %546 : vector<8x128xf32> to vector<8x128xbf16>
    %556 = arith.truncf %550 : vector<8x128xf32> to vector<8x128xbf16>
    %cst_152 = arith.constant dense<0.000000e+00> : vector<8x8xf32>
    %557 = tpu.matmul %555, %556, %cst_152 {dimension_numbers = #tpu.dot_dimension_numbers<[1], [1], [0], [0], [0, 0, 1, 0], [], []>} : vector<8x128xbf16>, vector<8x128xbf16>, vector<8x8xf32> -> vector<8x8xf32>
    %558 = vector.broadcast %8 : vector<1x8xf32> to vector<8x8xf32>
    %559 = arith.addf %557, %558 : vector<8x8xf32>
    %cst_153 = arith.constant dense<0xFF800000> : vector<8xf32>
    %560 = vector.multi_reduction <maximumf>, %559, %cst_153 [1] : vector<8x8xf32> to vector<8xf32>
    %561 = vector.shape_cast %560 : vector<8xf32> to vector<8x1xf32>
    %562 = vector.broadcast %561 : vector<8x1xf32> to vector<8x8xf32>
    %563 = arith.subf %559, %562 : vector<8x8xf32>
    %564 = math.exp %563 : vector<8x8xf32>
    %cst_154 = arith.constant dense<0.000000e+00> : vector<8xf32>
    %565 = vector.multi_reduction <add>, %564, %cst_154 [1] : vector<8x8xf32> to vector<8xf32>
    %566 = vector.shape_cast %565 : vector<8xf32> to vector<8x1xf32>
    %567 = tpu.reciprocal %566 {approx = true} : vector<8x1xf32> -> vector<8x1xf32>
    %568 = vector.broadcast %567 : vector<8x1xf32> to vector<8x8xf32>
    %569 = arith.mulf %564, %568 : vector<8x8xf32>
    %570 = arith.truncf %569 : vector<8x8xf32> to vector<8x8xbf16>
    %571 = arith.truncf %554 : vector<8x128xf32> to vector<8x128xbf16>
    %cst_155 = arith.constant dense<0.000000e+00> : vector<8x128xf32>
    %572 = tpu.matmul %570, %571, %cst_155 {dimension_numbers = #tpu.dot_dimension_numbers<[1], [0], [0], [1], [0, 0, 1, 1], [], []>} : vector<8x8xbf16>, vector<8x128xbf16>, vector<8x128xf32> -> vector<8x128xf32>
    %573 = vector.extract_strided_slice %505 {offsets = [128, 0], sizes = [128, 128], strides = [1, 1]} : vector<256x128xbf16> to vector<128x128xbf16>
    %574 = arith.truncf %572 : vector<8x128xf32> to vector<8x128xbf16>
    %cst_156 = arith.constant dense<0.000000e+00> : vector<8x128xf32>
    %575 = tpu.matmul %574, %573, %cst_156 {dimension_numbers = #tpu.dot_dimension_numbers<[1], [0], [0], [1], [0, 0, 1, 1], [], []>} : vector<8x128xbf16>, vector<128x128xbf16>, vector<8x128xf32> -> vector<8x128xf32>
    %576 = arith.addf %542, %575 : vector<8x128xf32>
    %577 = vector.extract_strided_slice %503 {offsets = [6, 0], sizes = [1, 128], strides = [1, 1]} : vector<16x128xf32> to vector<1x128xf32>
    %578 = vector.broadcast %577 : vector<1x128xf32> to vector<8x128xf32>
    %579 = arith.addf %576, %578 : vector<8x128xf32>
    %580 = arith.addf %579, %500 : vector<8x128xf32>
    %581 = vector.extract_strided_slice %503 {offsets = [7, 0], sizes = [1, 128], strides = [1, 1]} : vector<16x128xf32> to vector<1x128xf32>
    %582 = vector.extract_strided_slice %503 {offsets = [8, 0], sizes = [1, 128], strides = [1, 1]} : vector<16x128xf32> to vector<1x128xf32>
    %cst_157 = arith.constant dense<0.000000e+00> : vector<8xf32>
    %583 = vector.multi_reduction <add>, %580, %cst_157 [1] : vector<8x128xf32> to vector<8xf32>
    %584 = vector.shape_cast %583 : vector<8xf32> to vector<8x1xf32>
    %cst_158 = arith.constant 3.125000e-02 : f32
    %585 = vector.broadcast %cst_158 : f32 to vector<8x1xf32>
    %586 = arith.mulf %584, %585 : vector<8x1xf32>
    %587 = vector.broadcast %586 : vector<8x1xf32> to vector<8x128xf32>
    %588 = arith.subf %580, %587 : vector<8x128xf32>
    %589 = vector.broadcast %4 : vector<1x128xf32> to vector<8x128xf32>
    %590 = arith.mulf %588, %589 : vector<8x128xf32>
    %591 = arith.mulf %590, %590 : vector<8x128xf32>
    %cst_159 = arith.constant dense<0.000000e+00> : vector<8xf32>
    %592 = vector.multi_reduction <add>, %591, %cst_159 [1] : vector<8x128xf32> to vector<8xf32>
    %593 = vector.shape_cast %592 : vector<8xf32> to vector<8x1xf32>
    %cst_160 = arith.constant 3.125000e-02 : f32
    %594 = vector.broadcast %cst_160 : f32 to vector<8x1xf32>
    %595 = arith.mulf %593, %594 : vector<8x1xf32>
    %cst_161 = arith.constant 9.99999996E-13 : f32
    %596 = vector.broadcast %cst_161 : f32 to vector<8x1xf32>
    %597 = arith.addf %595, %596 : vector<8x1xf32>
    %598 = math.rsqrt %597 : vector<8x1xf32>
    %599 = vector.broadcast %598 : vector<8x1xf32> to vector<8x128xf32>
    %600 = arith.mulf %590, %599 : vector<8x128xf32>
    %601 = vector.broadcast %581 : vector<1x128xf32> to vector<8x128xf32>
    %602 = arith.mulf %600, %601 : vector<8x128xf32>
    %603 = vector.broadcast %582 : vector<1x128xf32> to vector<8x128xf32>
    %604 = arith.addf %602, %603 : vector<8x128xf32>
    %c3_162 = arith.constant 3 : index
    %c0_163 = arith.constant 0 : index
    %c0_164 = arith.constant 0 : index
    %605 = vector.load %arg6[%c3_162, %c0_163, %c0_164] : memref<4x128x128xbf16, #tpu.memory_space<vmem>>, vector<1x128x128xbf16>
    %606 = vector.shape_cast %605 : vector<1x128x128xbf16> to vector<128x128xbf16>
    %607 = arith.truncf %604 : vector<8x128xf32> to vector<8x128xbf16>
    %cst_165 = arith.constant dense<0.000000e+00> : vector<8x128xf32>
    %608 = tpu.matmul %607, %606, %cst_165 {dimension_numbers = #tpu.dot_dimension_numbers<[1], [0], [0], [1], [0, 0, 1, 1], [], []>} : vector<8x128xbf16>, vector<128x128xbf16>, vector<8x128xf32> -> vector<8x128xf32>
    %609 = vector.extract_strided_slice %503 {offsets = [9, 0], sizes = [1, 128], strides = [1, 1]} : vector<16x128xf32> to vector<1x128xf32>
    %610 = vector.broadcast %609 : vector<1x128xf32> to vector<8x128xf32>
    %611 = arith.addf %608, %610 : vector<8x128xf32>
    %cst_166 = arith.constant 5.000000e-01 : f32
    %612 = vector.broadcast %cst_166 : f32 to vector<8x128xf32>
    %613 = arith.mulf %612, %611 : vector<8x128xf32>
    %cst_167 = arith.constant 4.471500e-02 : f32
    %614 = vector.broadcast %cst_167 : f32 to vector<8x128xf32>
    %615 = arith.mulf %614, %611 : vector<8x128xf32>
    %616 = arith.mulf %615, %611 : vector<8x128xf32>
    %617 = arith.mulf %616, %611 : vector<8x128xf32>
    %618 = arith.addf %611, %617 : vector<8x128xf32>
    %cst_168 = arith.constant 0.797884583 : f32
    %619 = vector.broadcast %cst_168 : f32 to vector<8x128xf32>
    %620 = arith.mulf %619, %618 : vector<8x128xf32>
    %621 = math.tanh %620 : vector<8x128xf32>
    %cst_169 = arith.constant 1.000000e+00 : f32
    %622 = vector.broadcast %cst_169 : f32 to vector<8x128xf32>
    %623 = arith.addf %622, %621 : vector<8x128xf32>
    %624 = arith.mulf %613, %623 : vector<8x128xf32>
    %c3_170 = arith.constant 3 : index
    %c0_171 = arith.constant 0 : index
    %c0_172 = arith.constant 0 : index
    %625 = vector.load %arg7[%c3_170, %c0_171, %c0_172] : memref<4x128x128xbf16, #tpu.memory_space<vmem>>, vector<1x128x128xbf16>
    %626 = vector.shape_cast %625 : vector<1x128x128xbf16> to vector<128x128xbf16>
    %627 = arith.truncf %624 : vector<8x128xf32> to vector<8x128xbf16>
    %cst_173 = arith.constant dense<0.000000e+00> : vector<8x128xf32>
    %628 = tpu.matmul %627, %626, %cst_173 {dimension_numbers = #tpu.dot_dimension_numbers<[1], [0], [0], [1], [0, 0, 1, 1], [], []>} : vector<8x128xbf16>, vector<128x128xbf16>, vector<8x128xf32> -> vector<8x128xf32>
    %629 = vector.extract_strided_slice %503 {offsets = [10, 0], sizes = [1, 128], strides = [1, 1]} : vector<16x128xf32> to vector<1x128xf32>
    %630 = vector.broadcast %629 : vector<1x128xf32> to vector<8x128xf32>
    %631 = arith.addf %628, %630 : vector<8x128xf32>
    %632 = arith.addf %631, %604 : vector<8x128xf32>
    %633 = vector.extract_strided_slice %503 {offsets = [11, 0], sizes = [1, 128], strides = [1, 1]} : vector<16x128xf32> to vector<1x128xf32>
    %634 = vector.extract_strided_slice %503 {offsets = [12, 0], sizes = [1, 128], strides = [1, 1]} : vector<16x128xf32> to vector<1x128xf32>
    %cst_174 = arith.constant dense<0.000000e+00> : vector<8xf32>
    %635 = vector.multi_reduction <add>, %632, %cst_174 [1] : vector<8x128xf32> to vector<8xf32>
    %636 = vector.shape_cast %635 : vector<8xf32> to vector<8x1xf32>
    %cst_175 = arith.constant 3.125000e-02 : f32
    %637 = vector.broadcast %cst_175 : f32 to vector<8x1xf32>
    %638 = arith.mulf %636, %637 : vector<8x1xf32>
    %639 = vector.broadcast %638 : vector<8x1xf32> to vector<8x128xf32>
    %640 = arith.subf %632, %639 : vector<8x128xf32>
    %641 = vector.broadcast %4 : vector<1x128xf32> to vector<8x128xf32>
    %642 = arith.mulf %640, %641 : vector<8x128xf32>
    %643 = arith.mulf %642, %642 : vector<8x128xf32>
    %cst_176 = arith.constant dense<0.000000e+00> : vector<8xf32>
    %644 = vector.multi_reduction <add>, %643, %cst_176 [1] : vector<8x128xf32> to vector<8xf32>
    %645 = vector.shape_cast %644 : vector<8xf32> to vector<8x1xf32>
    %cst_177 = arith.constant 3.125000e-02 : f32
    %646 = vector.broadcast %cst_177 : f32 to vector<8x1xf32>
    %647 = arith.mulf %645, %646 : vector<8x1xf32>
    %cst_178 = arith.constant 9.99999996E-13 : f32
    %648 = vector.broadcast %cst_178 : f32 to vector<8x1xf32>
    %649 = arith.addf %647, %648 : vector<8x1xf32>
    %650 = math.rsqrt %649 : vector<8x1xf32>
    %651 = vector.broadcast %650 : vector<8x1xf32> to vector<8x128xf32>
    %652 = arith.mulf %642, %651 : vector<8x128xf32>
    %653 = vector.broadcast %633 : vector<1x128xf32> to vector<8x128xf32>
    %654 = arith.mulf %652, %653 : vector<8x128xf32>
    %655 = vector.broadcast %634 : vector<1x128xf32> to vector<8x128xf32>
    %656 = arith.addf %654, %655 : vector<8x128xf32>
    %657 = arith.addf %501, %656 : vector<8x128xf32>
    %cst_179 = arith.constant 2.500000e-01 : f32
    %658 = vector.broadcast %cst_179 : f32 to vector<8x128xf32>
    %659 = arith.mulf %658, %657 : vector<8x128xf32>
    %c0_180 = arith.constant 0 : index
    %c0_181 = arith.constant 0 : index
    %c0_182 = arith.constant 0 : index
    %660 = vector.load %arg9[%c0_180, %c0_181, %c0_182] : memref<1x8x128xf32, #tpu.memory_space<vmem>>, vector<1x8x128xf32>
    %661 = vector.shape_cast %660 : vector<1x8x128xf32> to vector<8x128xf32>
    %662 = vector.shape_cast %659 : vector<8x128xf32> to vector<1x8x128xf32>
    tpu.vector_store %arg9[%c0_180, %c0_181, %c0_182], %662 {strides = array<i32>} : memref<1x8x128xf32, #tpu.memory_space<vmem>>, vector<1x8x128xf32>,
    return
  }
  func.func @transform_0(%arg0: i32) -> (i32, i32, i32) {
    %c0_i32 = arith.constant 0 : i32
    %c0_i32_0 = arith.constant 0 : i32
    %c0_i32_1 = arith.constant 0 : i32
    return %arg0, %c0_i32, %c0_i32_0 : i32, i32, i32
  }
  func.func @transform_1(%arg0: i32) -> (i32, i32, i32) {
    %c0_i32 = arith.constant 0 : i32
    %c0_i32_0 = arith.constant 0 : i32
    %c0_i32_1 = arith.constant 0 : i32
    return %arg0, %c0_i32, %c0_i32_0 : i32, i32, i32
  }
  func.func @transform_2(%arg0: i32) -> (i32, i32) {
    %c0_i32 = arith.constant 0 : i32
    %c0_i32_0 = arith.constant 0 : i32
    %c0_i32_1 = arith.constant 0 : i32
    return %c0_i32, %c0_i32_0 : i32, i32
  }
  func.func @transform_3(%arg0: i32) -> (i32, i32, i32) {
    %c0_i32 = arith.constant 0 : i32
    %c0_i32_0 = arith.constant 0 : i32
    %c0_i32_1 = arith.constant 0 : i32
    %c0_i32_2 = arith.constant 0 : i32
    return %c0_i32, %c0_i32_0, %c0_i32_1 : i32, i32, i32
  }
  func.func @transform_4(%arg0: i32) -> (i32, i32, i32) {
    %c0_i32 = arith.constant 0 : i32
    %c0_i32_0 = arith.constant 0 : i32
    %c0_i32_1 = arith.constant 0 : i32
    %c0_i32_2 = arith.constant 0 : i32
    return %c0_i32, %c0_i32_0, %c0_i32_1 : i32, i32, i32
  }
  func.func @transform_5(%arg0: i32) -> (i32, i32, i32) {
    %c0_i32 = arith.constant 0 : i32
    %c0_i32_0 = arith.constant 0 : i32
    %c0_i32_1 = arith.constant 0 : i32
    %c0_i32_2 = arith.constant 0 : i32
    return %c0_i32, %c0_i32_0, %c0_i32_1 : i32, i32, i32
  }
  func.func @transform_6(%arg0: i32) -> (i32, i32, i32) {
    %c0_i32 = arith.constant 0 : i32
    %c0_i32_0 = arith.constant 0 : i32
    %c0_i32_1 = arith.constant 0 : i32
    %c0_i32_2 = arith.constant 0 : i32
    return %c0_i32, %c0_i32_0, %c0_i32_1 : i32, i32, i32
  }
  func.func @transform_7(%arg0: i32) -> (i32, i32, i32) {
    %c0_i32 = arith.constant 0 : i32
    %c0_i32_0 = arith.constant 0 : i32
    %c0_i32_1 = arith.constant 0 : i32
    %c0_i32_2 = arith.constant 0 : i32
    return %c0_i32, %c0_i32_0, %c0_i32_1 : i32, i32, i32
  }
  func.func @transform_8(%arg0: i32) -> (i32, i32, i32) {
    %c0_i32 = arith.constant 0 : i32
    %c0_i32_0 = arith.constant 0 : i32
    %c0_i32_1 = arith.constant 0 : i32
    return %arg0, %c0_i32, %c0_i32_0 : i32, i32, i32
  }
}

</mosaic_0001>

<bundles_post_ra>
// kernel: bert_embedding_forward.1
= control target key start
LH: loop header
LB: loop body
LE: loop exit
PB: predicated region body
PF: predicated region fallthrough
CT: control target
= control target key end

     0   :  { %13 = vsyncpa [#allocation3], 0  ;;  %s7566_s0 = inlined_call_operand.vmem [shape: f32[2,8,128], index: 0, kind: input, shape index: {}]   ;;  %s7567_s1 = inlined_call_operand.vmem [shape: f32[2,1,8], index: 1, kind: input, shape index: {}]   ;;  %s7568_s2 = inlined_call_operand.vmem [shape: f32[2,128], index: 2, kind: input, shape index: {}]   ;;  %s7569_s3 = inlined_call_operand.hbm [shape: bf16[4,128,768], index: 3, kind: input, shape index: {}]   ;;  %s7570_s4 = inlined_call_operand.hbm [shape: bf16[4,256,128], index: 4, kind: input, shape index: {}]   ;;  %s7571_s5 = inlined_call_operand.vmem [shape: bf16[4,128,128], index: 5, kind: input, shape index: {}]   ;;  %s7572_s6 = inlined_call_operand.hbm [shape: bf16[4,128,128], index: 6, kind: input, shape index: {}]   ;;  %s7573_s7 = inlined_call_operand.vmem [shape: f32[4,16,128], index: 7, kind: input, shape index: {}]   ;;  %s7574_s8 = inlined_call_operand.hbm [shape: f32[2,8,128], index: 8, kind: output, shape index: {}]  }
   0x1   :  { %14 = vsyncpa [#allocation6], 0 }
   0x2   :  { %15 = vsyncpa [#allocation4], 0 }
   0x3   :  { %17 = vsyncpa [#allocation4 + $0x1], 0  ;;  %s6819_s27 = smov 0   ;;  %s6821_s28 = smov 0  }
   0x4   :  { %s6823_s29 = smov 0   ;;  %s6825_s30 = smov 0  }
   0x5 LB: > { %s6840_s9 = sadd.s32 4294967295, %s6761_s30   ;;  %s5069_s10 = sadd.s32 4294967294, %s6761_s30   ;;  %s6761_s30 = sphi %s6825_s30, %s7582_s30   ;;  %s6757_s29 = sphi %s6823_s29, %s7581_s29   ;;  %s6753_s28 = sphi %s6821_s28, %s7580_s28   ;;  %s6749_s27 = sphi %s6819_s27, %s7579_s27  }
   0x6   : > { %s6844_s11 = sadd.s32 1, %s6761_s30   ;;  %s208_s12 = sadd.s32 1, %s6757_s29 }
   0x7   : > { %s205_s13 = ssub.s32 %s6761_s30, %s6844_s11  ;;  %p218_p0 = scmp.ne.s32.totalorder %s6757_s29, %s6753_s28 }
   0x8   : > { %p206_p1 = scmp.eq.s32.totalorder %s205_s13, 0  ;;  %p219_p2 = scmp.eq.s32.totalorder %s6840_s9, 1 }
   0x9   : > { %p224_p3 = scmp.ne.s32.totalorder %s6753_s28, %s6749_s27  ;;  %p225_p4 = scmp.eq.s32.totalorder %s5069_s10, 1 }
   0xa   : > { %s6855_s14 = scalar_select %p206_p1, %s6757_s29, %s208_s12  }
   0xb   : > { %p6857_p5 = por %p219_p2, %p218_p0  ;;  %p6861_p6 = por %p225_p4, %p224_p3 }
   0xc   : > { %p5070_p7 = scmp.ge.s32.totalorder %s6761_s30, 1  ;;  %p232_p8 = scmp.lt.s32.totalorder %s6761_s30, 3 }
   0xd   : > { %p6091_p9 = scmp.eq.s32.totalorder %s6840_s9, 0  ;;  %s6763_s18 = smov [#allocation5]  }
   0xe   : > { %p6868_p10 = pnand %p5070_p7, %p232_p8  ;;  %s260_s19 = sshll.u32 %s6763_s18, 4  ;;  %s261_s19 = int_to_ptr.vmem [resolvable:$true] %s260_s19 }
   0xf   : > { %s6764_s21 = smov [#allocation2]   ;;  %s6626_s23 = scalar_lea.vmem %s261_s19, 8192 }
  0x10   : > { %p6077_p11 = pneg %p6868_p10  ;;  %s247_s22 = sshll.u32 %s6764_s21, 4  ;;  %s248_s22 = int_to_ptr.vmem [resolvable:$true] %s247_s22 }
  0x11   : > { %p6627_p0 = scmp.ne.s32.totalorder %s261_s19, %s6626_s23  ;;  %p6634_p3 = scmp.lt.s32.totalorder %s261_s19, %s261_s19 }
  0x12   : > { %p6876_p12 = pnand %p6091_p9, %p6077_p11  ;;  %p6635_p4 = scmp.lt.s32.totalorder %s6626_s23, %s6626_s23 }
  0x14   : > { %p6617_p13 = pneg %p6876_p12  ;;  %p6636_p7 = por %p6635_p4, %p6634_p3 }
  0x16   : > { %p6629_p1 = pnand %p6627_p0, %p6617_p13 }
  0x18   : > { %p6630_p2 = pneg %p6629_p1 }
  0x1a   : > { %p6637_p8 = pnand %p6636_p7, %p6630_p2 }
  0x1c   : > { %6640 = shalt.err (!%p6637_p8)
}
  0x1d   : > { %s6765_s24 = smov 64   ;;  %s6766_s25 = smov 4  }
  0x1e   : > { %6083 = dma.hbm_to_vmem [thread:$0]  (!%p6876_p12), %s7570_s4, 8192, %s261_s19, [#allocation6], %s6765_s24, %s6765_s24, %s6766_s25  }
  0x1f   : > { %s6652_s12 = scalar_lea.vmem %s248_s22, 24576  ;;  %p6660_p2 = scmp.lt.s32.totalorder %s248_s22, %s248_s22 }
  0x20   : > { %p6653_p11 = scmp.ne.s32.totalorder %s248_s22, %s6652_s12  ;;  %p6661_p3 = scmp.lt.s32.totalorder %s6652_s12, %s6652_s12 }
  0x22   : > { %p6655_p0 = pnand %p6653_p11, %p6617_p13  ;;  %p6662_p4 = por %p6661_p3, %p6660_p2 }
  0x24   : > { %p6656_p1 = pneg %p6655_p0 }
  0x26   : > { %p6663_p7 = pnand %p6662_p4, %p6656_p1 }
  0x28   : > { %6666 = shalt.err (!%p6663_p7)
}
  0x29   : > { %s6767_s13 = smov 384   ;;  %s6768_s18 = smov 24  }
  0x2a   : > { %6080 = dma.hbm_to_vmem [thread:$0]  (!%p6876_p12), %s7569_s3, 24576, %s248_s22, [#allocation3], %s6767_s13, %s6767_s13, %s6768_s18  }
  0x2b   : > { %s6769_s19 = smov [#allocation7]  }
  0x2c   : > { %s276_s26 = sshll.u32 %s6769_s19, 4  ;;  %s277_s26 = int_to_ptr.vmem [resolvable:$true] %s276_s26 }
  0x2d   : > { %s6678_s10 = scalar_lea.vmem %s277_s26, 4096  ;;  %p6686_p1 = scmp.lt.s32.totalorder %s277_s26, %s277_s26 }
  0x2e   : > { %p6679_p8 = scmp.ne.s32.totalorder %s277_s26, %s6678_s10  ;;  %p6687_p2 = scmp.lt.s32.totalorder %s6678_s10, %s6678_s10 }
  0x30   : > { %p6681_p11 = pnand %p6679_p8, %p6617_p13  ;;  %p6688_p3 = por %p6687_p2, %p6686_p1 }
  0x32   : > { %p6682_p0 = pneg %p6681_p11 }
  0x34   : > { %p6689_p4 = pnand %p6688_p3, %p6682_p0 }
  0x36   : > { %6692 = shalt.err (!%p6689_p4)
}
  0x37   : > { %6086 = dma.hbm_to_vmem [thread:$0]  (!%p6876_p12), %s7572_s6, 4096, %s277_s26, [#allocation6], %s6765_s24, %s6765_s24, %s6766_s25  }
  0x38   : > { %308 = sbr.rel (%p6868_p10) target bundleno = 11068 (0x2b3c), region = 52 }
  0x3d   : > { %6736 = dma.done.wait (%p6091_p9), [#allocation3], 24576  }
  0x3e   : > { %6738 = vsyncadd (%p6091_p9), [#allocation3], 4294942720 }
  0x3f   : > { %6740 = dma.done.wait (%p6091_p9), [#allocation6], 12288  }
  0x40   : > { %6742 = vsyncadd (%p6091_p9), [#allocation6], 4294955008  ;;  %p352_p13 = scmp.lt.s32.totalorder %s6840_s9, 1  ;;  %v6140_v1 = vld [vmem:[#allocation2 + $0x154] ss:$24 sps:$4 sm:$0xff]   ;;  %v360_v9 = vlaneseq  ;;  %v6770_v13 = vmov 0.0  }
  0x41   : > { %v6142_v2 = vld [vmem:[#allocation2 + $0x150] ss:$24 sps:$4 sm:$0xff]   ;;  %v6143_v3 = vld [vmem:[#allocation2 + $0x15c] ss:$24 sps:$4 sm:$0xff]   ;;  %v6148_v6 = vld [vmem:[#allocation2 + $0x120] ss:$24 sps:$4 sm:$0xff]   ;;  %714 = vmatprep.subr.bf16.mxu0 %v6140_v1 }
  0x42   : > { %s6924_s20 = scalar_select %p352_p13, %s6840_s9, 1  ;;  %v6145_v4 = vld [vmem:[#allocation2 + $0x158] ss:$24 sps:$4 sm:$0xff]   ;;  %v6146_v5 = vld [vmem:[#allocation2 + $0x124] ss:$24 sps:$4 sm:$0xff]   ;;  %755 = vmatprep.subr.bf16.mxu1 %v6143_v3  ;;  %715 = vmatpush1.bf16.msra.mxu0 %v6142_v2  ;;  %v361_v10 = vand.u32 127, %v360_v9 }
  0x43   : > { %v6149_v7 = vld [vmem:[#allocation2 + $0x12c] ss:$24 sps:$4 sm:$0xff]   ;;  %v6151_v8 = vld [vmem:[#allocation2 + $0x128] ss:$24 sps:$4 sm:$0xff]   ;;  %756 = vmatpush1.bf16.msra.mxu1 %v6145_v4  ;;  %716 = vmatprep.subr.bf16.mxu0 %v6146_v5  ;;  %v6155_v20 = vld [vmem:[#allocation2 + $0xfc] ss:$24 sps:$4 sm:$0xff]  }
  0x44   : > { %s5080_s17 = sshll.u32 %s6924_s20, 3  ;;  %757 = vmatprep.subr.bf16.mxu1 %v6149_v7  ;;  %vm362_vm0 = vcmp.lt.s32.totalorder %v361_v10, 32  ;;  %v6152_v18 = vld [vmem:[#allocation2 + $0xf4] ss:$24 sps:$4 sm:$0xff]   ;;  %v6154_v19 = vld [vmem:[#allocation2 + $0xf0] ss:$24 sps:$4 sm:$0xff]  }
  0x45   : > { %s355_s13 = scalar_lea.vmem %s7566_s0, %s5080_s17  ;;  %v6932_v14 = vsel %vm362_vm0, 1.0, %v6770_v13  ;;  %v6157_v21 = vld [vmem:[#allocation2 + $0xf8] ss:$24 sps:$4 sm:$0xff]   ;;  %v6158_v22 = vld [vmem:[#allocation2 + $0xc4] ss:$24 sps:$4 sm:$0xff]   ;;  %v6771_v36 = vmov 0   ;;  %s6991_s17 = scalar_lea.vmem %s7567_s1, %s6924_s20 }
  0x46   : > { %v365_v0 = vld [vmem:[%s355_s13] sm:$0xff]  ;;  %717 = vmatpush1.bf16.msra.mxu0 %v6148_v6  ;;  %v6164_v26 = vld [vmem:[#allocation2 + $0x94] ss:$24 sps:$4 sm:$0xff]   ;;  %v6166_v28 = vld [vmem:[#allocation2 + $0x90] ss:$24 sps:$4 sm:$0xff]   ;;  %746 = vmatprep.mubr.bf16.mxu0 %v6771_v36  ;;  %vm6772_vm1 = vmmov 0  }
  0x47   : > { %369 = vadd.xlane.f32.xlu0 %v365_v0  ;;  %758 = vmatpush1.bf16.msra.mxu1 %v6151_v8  ;;  %v6160_v23 = vld [vmem:[#allocation2 + $0xc0] ss:$24 sps:$4 sm:$0xff]   ;;  %v6161_v24 = vld [vmem:[#allocation2 + $0xcc] ss:$24 sps:$4 sm:$0xff]   ;;  %v6167_v27 = vld [vmem:[#allocation2 + $0x9c] ss:$24 sps:$4 sm:$0xff]  }
  0x48   : > { %718 = vmatprep.subr.bf16.mxu0 %v6152_v18  ;;  %759 = vmatprep.subr.bf16.mxu1 %v6155_v20  ;;  %v6163_v25 = vld [vmem:[#allocation2 + $0xc8] ss:$24 sps:$4 sm:$0xff]   ;;  %v6169_v29 = vld [vmem:[#allocation2 + $0x98] ss:$24 sps:$4 sm:$0xff]   ;;  %v6170_v30 = vld [vmem:[#allocation2 + $0x64] ss:$24 sps:$4 sm:$0xff]  }
  0x49   : > { %v6173_v31 = vld [vmem:[#allocation2 + $0x6c] ss:$24 sps:$4 sm:$0xff]   ;;  %v6172_v32 = vld [vmem:[#allocation2 + $0x60] ss:$24 sps:$4 sm:$0xff]   ;;  %v6179_v35 = vld [vmem:[#allocation2 + $0x3c] ss:$24 sps:$4 sm:$0xff]   ;;  %787 = vmatprep.mubr.bf16.mxu1 %v6771_v36 }
  0x4a   : > { %719 = vmatpush1.bf16.msra.mxu0 %v6154_v19  ;;  %v6175_v33 = vld [vmem:[#allocation2 + $0x68] ss:$24 sps:$4 sm:$0xff]   ;;  %v6176_v34 = vld [vmem:[#allocation2 + $0x34] ss:$24 sps:$4 sm:$0xff]   ;;  %v6181_v38 = vld [vmem:[#allocation2 + $0x38] ss:$24 sps:$4 sm:$0xff]  }
  0x4b   : > { %760 = vmatpush1.bf16.msra.mxu1 %v6157_v21  ;;  %720 = vmatprep.subr.bf16.mxu0 %v6158_v22  ;;  %v6178_v37 = vld [vmem:[#allocation2 + $0x30] ss:$24 sps:$4 sm:$0xff]   ;;  %v6182_v39 = vld [vmem:[#allocation2 + $0x4] ss:$24 sps:$4 sm:$0xff]   ;;  %v6184_v41 = vld [vmem:[#allocation2] ss:$24 sps:$4 sm:$0xff]  }
  0x4c   : > { %761 = vmatprep.subr.bf16.mxu1 %v6161_v24  ;;  %v6185_v40 = vld [vmem:[#allocation2 + $0xc] ss:$24 sps:$4 sm:$0xff]   ;;  %v6187_v42 = vld [vmem:[#allocation2 + $0x8] ss:$24 sps:$4 sm:$0xff]   ;;  %v6960_v5 = vshrl.u32 %v360_v9, 7  ;;  %vm917_vm2 = vcmask 1043456  }
  0x4d   : > { %v6190_v43 = vld [vmem:[#allocation2 + $0x164] ss:$24 sps:$4 sm:$0xff]   ;;  %v5082_v48 = vld [vmem:[%s7568_s2] ss:$0 sm:$0xff]  ;;  %v5083_v50 = vld [vmem:[%s7568_s2 + $0x1] ss:$0 sm:$0xff] }
  0x4e   : > { %721 = vmatpush1.bf16.msra.mxu0 %v6160_v23  ;;  %v6188_v53 = vld [vmem:[#allocation2 + $0x160] ss:$24 sps:$4 sm:$0xff]   ;;  %v6193_v55 = vld [vmem:[#allocation2 + $0x134] ss:$24 sps:$4 sm:$0xff]   ;;  %v6191_v56 = vld [vmem:[#allocation2 + $0x130] ss:$24 sps:$4 sm:$0xff]  }
  0x4f   : > { %762 = vmatpush1.bf16.msra.mxu1 %v6163_v25  ;;  %722 = vmatprep.subr.bf16.mxu0 %v6164_v26  ;;  %v6196_v57 = vld [vmem:[#allocation2 + $0x104] ss:$24 sps:$4 sm:$0xff]   ;;  %v6194_v58 = vld [vmem:[#allocation2 + $0x100] ss:$24 sps:$4 sm:$0xff]   ;;  %v6199_v59 = vld [vmem:[#allocation2 + $0xd4] ss:$24 sps:$4 sm:$0xff]  }
  0x50   : > { %763 = vmatprep.subr.bf16.mxu1 %v6167_v27  ;;  %v6197_v60 = vld [vmem:[#allocation2 + $0xd0] ss:$24 sps:$4 sm:$0xff]   ;;  %v6202_v61 = vld [vmem:[#allocation2 + $0xa4] ss:$24 sps:$4 sm:$0xff]   ;;  %v6200_v62 = vld [vmem:[#allocation2 + $0xa0] ss:$24 sps:$4 sm:$0xff]  }
  0x51   : > { %v6205_v63 = vld [vmem:[#allocation2 + $0x74] ss:$24 sps:$4 sm:$0xff]   ;;  %v6208_v1 = vld [vmem:[#allocation2 + $0x44] ss:$24 sps:$4 sm:$0xff]   ;;  %v6206_v2 = vld [vmem:[#allocation2 + $0x40] ss:$24 sps:$4 sm:$0xff]  }
  0x52   : > { %723 = vmatpush1.bf16.msra.mxu0 %v6166_v28  ;;  %v6211_v3 = vld [vmem:[#allocation2 + $0x14] ss:$24 sps:$4 sm:$0xff]   ;;  %v6209_v4 = vld [vmem:[#allocation2 + $0x10] ss:$24 sps:$4 sm:$0xff]   ;;  %v6963_v6 = vsub.s32 1, %v6960_v5  ;;  %v6968_v7 = vld [vmem:[%s7573_s7] sm:$0xff] }
  0x53   : > { %764 = vmatpush1.bf16.msra.mxu1 %v6169_v29  ;;  %724 = vmatprep.subr.bf16.mxu0 %v6170_v30  ;;  %v6971_v8 = vsub.s32 2, %v6960_v5  ;;  %vm900_vm3 = vcmask 64512   ;;  %s349_s13 = sand.u32 1, %s6753_s28   ;;  %s5468_s18 = sshll.u32 %s6840_s9, 7 }
  0x54   : > { %765 = vmatprep.subr.bf16.mxu1 %v6173_v31  ;;  %v845_v10 = vrot.slane %v6968_v7, %v6963_v6  ;;  %s4968_s10 = scalar_lea.hbm %s7574_s8, %s5468_s18  ;;  %s4957_s22 = scalar_lea.sflag [#allocation4], %s349_s13 }
  0x55   : > { %s6773_s20 = smov [#allocation8]  }
  0x56   : > { %725 = vmatpush1.bf16.msra.mxu0 %v6172_v32  ;;  %s6697_s24 = sshll.u32 %s6773_s20, 4  ;;  %s6698_s24 = int_to_ptr.vmem [resolvable:$false] %s6697_s24 }
  0x57   : > { %766 = vmatpush1.bf16.msra.mxu1 %v6175_v33  ;;  %726 = vmatprep.subr.bf16.mxu0 %v6176_v34  ;;  %v6994_v34 = vld [vmem:[%s6991_s17] ss:$0 sm:$0xff]  ;;  %s6699_s9 = scalar_lea.vmem %s6698_s24, 256 }
  0x58   : > { %767 = vmatprep.subr.bf16.mxu1 %v6179_v35 }
  0x5a   : > { %727 = vmatpush1.bf16.msra.mxu0 %v6178_v37 }
  0x5b   : > { %768 = vmatpush1.bf16.msra.mxu1 %v6181_v38  ;;  %728 = vmatprep.subr.bf16.mxu0 %v6182_v39 }
  0x5c   : > { %769 = vmatprep.subr.bf16.mxu1 %v6185_v40 }
  0x5e   : > { %729 = vmatpush1.bf16.msra.mxu0 %v6184_v41 }
  0x5f   : > { %770 = vmatpush1.bf16.msra.mxu1 %v6187_v42  ;;  %796 = vmatprep.subr.bf16.mxu0 %v6190_v43 }
  0x60   : > { %5647 = vmatprep.subr.bf16.mxu1 %v6770_v13 }
  0xd0   : > { %v370_v11 = vpop.xlane.xlu0 %369 }
  0xd1   : > { %v371_v12 = vmul.f32 0.03125, %v370_v11 }
  0xd3   : > { %v372_v15 = vsub.f32 %v365_v0, %v371_v12  ;;  %v6203_v0 = vld [vmem:[#allocation2 + $0x70] ss:$24 sps:$4 sm:$0xff]   ;;  %v6976_v12 = vsub.s32 0, %v6960_v5 }
  0xd5   : > { %v6935_v16 = vmul.f32 %v6932_v14, %v372_v15  ;;  %v850_v15 = vrot.slane %v6968_v7, %v6971_v8  ;;  %v840_v19 = vrot.slane %v6968_v7, %v6976_v12 }
  0xd7   : > { %v374_v17 = vmul.f32 %v6935_v16, %v6935_v16 }
  0xd9   : > { %375 = vadd.xlane.f32.xlu0 %v374_v17 }
 0x162   : > { %v376_v44 = vpop.xlane.xlu0 %375 }
 0x163   : > { %v377_v45 = vmul.f32 0.03125, %v376_v44 }
 0x165   : > { %v378_v46 = vadd.f32 1e-12, %v377_v45 }
 0x167   : > { %6556 = vrsqrt.f32 %v378_v46 }
 0x174   : > { %v6557_v47 = vpop.eup %6556 }
 0x175   : > { %v380_v49 = vmul.f32 %v6557_v47, %v6935_v16 }
 0x177   : > { %v385_v51 = vmul.f32 %v5082_v48, %v380_v49  ;;  %v7000_v48 = vsub.s32 4, %v6960_v5 }
 0x179   : > { %v6949_v52 = vadd.f32 %v5083_v50, %v385_v51  ;;  %v970_v49 = vrot.slane %v6968_v7, %v7000_v48  ;;  %v7005_v50 = vsub.s32 5, %v6960_v5  ;;  %v7008_v51 = vsub.s32 3, %v6960_v5 }
 0x17b   : > { %v473_v54 = vpack.c.bf16 %v6949_v52, %v6949_v52 }
 0x17d   : > { %747 = vmatmul.mubr.bf16.vlgmr.msra.gmra.mxu0 %v473_v54  ;;  %788 = vmatmul.mubr.bf16.vlgmr.msra.gmra.mxu1 %v473_v54 }
 0x17e   : > { %797 = vmatpush1.bf16.msra.mxu0 %v6188_v53  ;;  %828 = vmatprep.mubr.bf16.mxu0 %v6771_v36 }
 0x17f   : > { %798 = vmatprep.subr.bf16.mxu0 %v6193_v55  ;;  %5649 = vmatprep.mubr.msk.bf16.mxu1 %vm6772_vm1, %v6770_v13  ;;  %v975_v55 = vrot.slane %v6968_v7, %v7005_v50 }
 0x182   : > { %799 = vmatpush1.bf16.msra.mxu0 %v6191_v56 }
 0x183   : > { %800 = vmatprep.subr.bf16.mxu0 %v6196_v57  ;;  %v965_v57 = vrot.slane %v6968_v7, %v7008_v51 }
 0x186   : > { %801 = vmatpush1.bf16.msra.mxu0 %v6194_v58 }
 0x187   : > { %802 = vmatprep.subr.bf16.mxu0 %v6199_v59 }
 0x18a   : > { %803 = vmatpush1.bf16.msra.mxu0 %v6197_v60 }
 0x18b   : > { %804 = vmatprep.subr.bf16.mxu0 %v6202_v61 }
 0x18e   : > { %805 = vmatpush1.bf16.msra.mxu0 %v6200_v62 }
 0x18f   : > { %806 = vmatprep.subr.bf16.mxu0 %v6205_v63 }
 0x192   : > { %807 = vmatpush1.bf16.msra.mxu0 %v6203_v0 }
 0x193   : > { %808 = vmatprep.subr.bf16.mxu0 %v6208_v1 }
 0x196   : > { %809 = vmatpush1.bf16.msra.mxu0 %v6206_v2 }
 0x197   : > { %810 = vmatprep.subr.bf16.mxu0 %v6211_v3 }
 0x19a   : > { %811 = vmatpush1.bf16.msra.mxu0 %v6209_v4 }
 0x19b   : > { %5671 = vmatprep.subr.bf16.mxu0 %v6770_v13 }
 0x19d   : > { %829 = vmatmul.mubr.bf16.vlgmr.msra.gmra.mxu0 %v473_v54 }
 0x19e   : > { %5687 = vmatprep.mubr.msk.bf16.mxu0 %vm6772_vm1, %v6770_v13 }
 0x23d   : > { %v748_v11 = vpop.f32.mrf.mxu0  ;;  %v789_v9 = vpop.f32.mrf.mxu1 }
 0x23e   : > { %v851_v23 = vadd.f32 %v850_v15, %v789_v9  ;;  %v841_v26 = vadd.f32 %v840_v19, %v748_v11 }
 0x23f   : > { %v750_v16 = vpop.f32.mrf.mxu0  ;;  %v791_v17 = vpop.f32.mrf.mxu1 }
 0x240   : > { %v846_v18 = vadd.f32 %v845_v10, %v750_v16  ;;  %v913_v27 = vpack.c.bf16 %v851_v23, %v851_v23  ;;  %v852_v28 = vpack.c.bf16 %v841_v26, %v841_v26  ;;  %v966_v61 = vadd.f32 %v965_v57, %v791_v17  ;;  %v6220_v23 = vld [vmem:[#allocation5 + $0x78] sm:$0xff]   ;;  %v6223_v26 = vld [vmem:[#allocation5 + $0x60] sm:$0xff]  }
 0x241   : > { %v752_v20 = vpop.f32.mrf.mxu0  ;;  %v793_v21 = vpop.f32.mrf.mxu1  ;;  %5672 = vmatpush3.bf16.msra.mxu0 %v6220_v23 }
 0x242   : > { %v853_v22 = vpack.c.bf16 %v846_v18, %v846_v18  ;;  %v919_v29 = vsel %vm917_vm2, %v913_v27, 0  ;;  %v977_v63 = vpack.c.bf16 %v966_v61, %v966_v61  ;;  %5673 = vmatprep.subr.bf16.mxu0 %v6770_v13  ;;  %v6224_v27 = vld [vmem:[#allocation5 + $0x58] sm:$0xff]  }
 0x243   : > { %v753_v24 = vpop.f32.mrf.mxu0  ;;  %v794_v25 = vpop.f32.mrf.mxu1 }
 0x244   : > { %5648 = vmatpush3.bf16.xpose.msra.mxu1 %v853_v22  ;;  %v6221_v24 = vld [vmem:[#allocation5 + $0x70] sm:$0xff]   ;;  %v6222_v25 = vld [vmem:[#allocation5 + $0x68] sm:$0xff]  }
 0x245   : > { %5653 = vmatprep.subr.bf16.mxu1 %v6770_v13  ;;  %5674 = vmatpush3.bf16.msra.mxu0 %v6221_v24 }
 0x246   : > { %5675 = vmatprep.subr.bf16.mxu0 %v6770_v13 }
 0x249   : > { %5676 = vmatpush3.bf16.msra.mxu0 %v6222_v25 }
 0x24a   : > { %5677 = vmatprep.subr.bf16.mxu0 %v6770_v13 }
 0x24b   : > { %5650 = vmatmul.mubr.bf16.vlgmr.msra.gmra.mxu1 %v852_v28  ;;  %v6225_v28 = vld [vmem:[#allocation5 + $0x50] sm:$0xff]  }
 0x24c   : > { %5654 = vmatpush3.bf16.msra.mxu1 %v919_v29  ;;  %5655 = vmatprep.mubr.msk.bf16.mxu1 %vm6772_vm1, %v6770_v13  ;;  %v6226_v29 = vld [vmem:[#allocation5 + $0x48] sm:$0xff]  }
 0x24d   : > { %5659 = vmatprep.subr.bf16.mxu1 %v6770_v13  ;;  %5678 = vmatpush3.bf16.msra.mxu0 %v6223_v26  ;;  %v7091_v26 = vsub.s32 7, %v6960_v5 }
 0x24e   : > { %5679 = vmatprep.subr.bf16.mxu0 %v6770_v13 }
 0x251   : > { %5680 = vmatpush3.bf16.msra.mxu0 %v6224_v27  ;;  %v7096_v27 = vld [vmem:[%s7573_s7 + $0x8] sm:$0xff] }
 0x252   : > { %5681 = vmatprep.subr.bf16.mxu0 %v6770_v13 }
 0x255   : > { %5682 = vmatpush3.bf16.msra.mxu0 %v6225_v28  ;;  %v1276_v28 = vrot.slane %v6968_v7, %v7091_v26 }
 0x256   : > { %5683 = vmatprep.subr.bf16.mxu0 %v6770_v13 }
 0x259   : > { %5684 = vmatpush3.bf16.msra.mxu0 %v6226_v29 }
 0x25a   : > { %5685 = vmatprep.subr.bf16.mxu0 %v6770_v13 }
 0x25d   : > { %v830_v30 = vpop.f32.mrf.mxu0 }
 0x25e   : > { %v971_v54 = vadd.f32 %v970_v49, %v830_v30 }
 0x25f   : > { %v832_v31 = vpop.f32.mrf.mxu0 }
 0x260   : > { %v978_v59 = vpack.c.bf16 %v971_v54, %v971_v54  ;;  %v976_v60 = vadd.f32 %v975_v55, %v832_v31 }
 0x261   : > { %v834_v32 = vpop.f32.mrf.mxu0 }
 0x262   : > { %v1031_v62 = vpack.c.bf16 %v976_v60, %v976_v60 }
 0x263   : > { %v835_v33 = vpop.f32.mrf.mxu0 }
 0x264   : > { %v1036_v0 = vsel %vm917_vm2, %v1031_v62, 0  ;;  %v6212_v33 = vld [vmem:[#allocation5 + $0x38] sm:$0xff]  }
 0x30b   : > { %v894_v35 = vpop.f32.mrf.mxu1 }
 0x30c   : > { %v895_v37 = vadd.f32 %v6994_v34, %v894_v35 }
 0x30d   : > { %v5651_v38 = vpop.f32.mrf.mxu1 }
 0x30e   : > { %v901_v39 = vsel %vm900_vm3, %v895_v37, -inf  ;;  %v6214_v38 = vld [vmem:[#allocation5 + $0x28] sm:$0xff]  }
 0x30f   : > { %902 = vmax.xlane.f32.xlu1 %v901_v39  ;;  %v897_v40 = vpop.f32.mrf.mxu1  ;;  %v6215_v39 = vld [vmem:[#allocation5 + $0x20] sm:$0xff]  }
 0x310   : > { %v6216_v40 = vld [vmem:[#allocation5 + $0x18] sm:$0xff]  }
 0x311   : > { %v5652_v41 = vpop.f32.mrf.mxu1 }
 0x312   : > { %v6217_v41 = vld [vmem:[#allocation5 + $0x10] sm:$0xff]  }
 0x398   : > { %v903_v42 = vpop.xlane.xlu1 %902 }
 0x399   : > { %v904_v43 = vsub.f32 %v895_v37, %v903_v42  ;;  %v6213_v37 = vld [vmem:[#allocation5 + $0x30] sm:$0xff]   ;;  %v6218_v42 = vld [vmem:[#allocation5 + $0x8] sm:$0xff]  }
 0x39b   : > { %v905_v44 = vmul.f32 1.442695, %v904_v43  ;;  %v6219_v43 = vld [vmem:[#allocation5] sm:$0xff]  }
 0x39d   : > { %6558 = vpow2.f32 %v905_v44 }
 0x3aa   : > { %v6559_v45 = vpop.eup %6558 }
 0x3ab   : > { %v907_v46 = vsel %vm900_vm3, %v6559_v45, 0.0 }
 0x3ac   : > { %908 = vadd.xlane.f32.xlu1 %v907_v46 }
 0x435   : > { %v909_v47 = vpop.xlane.xlu1 %908 }
 0x436   : > { %6560 = vrcp.f32 %v909_v47 }
 0x443   : > { %v6561_v53 = vpop.eup %6560 }
 0x444   : > { %v911_v56 = vmul.f32 %v6561_v53, %v6559_v45  ;;  %v6227_v45 = vld [vmem:[#allocation5 + $0x40] sm:$0xff]  }
 0x445   : > { %5686 = vmatpush3.bf16.msra.mxu0 %v6227_v45 }
 0x446   : > { %v912_v58 = vpack.c.bf16 %v911_v56, %v911_v56  ;;  %5711 = vmatprep.subr.bf16.mxu0 %v6770_v13 }
 0x448   : > { %5656 = vmatmul.mubr.msk.bf16.vlgmr.msra.gmra.mxu1 %vm900_vm3, %v912_v58 }
 0x449   : > { %5660 = vmatpush3.bf16.xpose.msra.mxu1 %v978_v59  ;;  %5661 = vmatprep.mubr.msk.bf16.mxu1 %vm6772_vm1, %v6770_v13  ;;  %v7053_v59 = vsub.s32 6, %v6960_v5  ;;  %v6236_v5 = vld [vmem:[#allocation7 + $0x38] sm:$0xff]  }
 0x44a   : > { %5665 = vmatprep.subr.bf16.mxu1 %v6770_v13 }
 0x44b   : > { %v1258_v60 = vrot.slane %v6968_v7, %v7053_v59  ;;  %v6238_v7 = vld [vmem:[#allocation7 + $0x28] sm:$0xff]  }
 0x450   : > { %5662 = vmatmul.mubr.bf16.vlgmr.msra.gmra.mxu1 %v977_v63 }
 0x451   : > { %5666 = vmatpush3.bf16.msra.mxu1 %v1036_v0  ;;  %5667 = vmatprep.mubr.msk.bf16.mxu1 %vm6772_vm1, %v6770_v13 }
 0x452   : > { %5691 = vmatprep.subr.bf16.mxu1 %v6770_v13 }
 0x508   : > { %v7022_v1 = vpop.f32.mrf.mxu1 }
 0x509   : > { %v961_v44 = vpack.c.bf16 %v7022_v1, %v7022_v1 }
 0x50a   : > { %v5657_v2 = vpop.f32.mrf.mxu1 }
 0x50c   : > { %v958_v3 = vpop.f32.mrf.mxu1 }
 0x50e   : > { %v5658_v4 = vpop.f32.mrf.mxu1 }
 0x50f   : > { %v6228_v4 = vld [vmem:[%s7571_s5 + $0x38] sm:$0xff]  }
 0x510   : > { %v1013_v10 = vpop.f32.mrf.mxu1 }
 0x511   : > { %v1014_v11 = vadd.f32 %v6994_v34, %v1013_v10  ;;  %v6229_v10 = vld [vmem:[%s7571_s5 + $0x30] sm:$0xff]  }
 0x512   : > { %v5663_v9 = vpop.f32.mrf.mxu1 }
 0x513   : > { %v1019_v15 = vsel %vm900_vm3, %v1014_v11, -inf }
 0x514   : > { %1020 = vmax.xlane.f32.xlu0 %v1019_v15  ;;  %v1016_v16 = vpop.f32.mrf.mxu1 }
 0x516   : > { %v5664_v17 = vpop.f32.mrf.mxu1 }
 0x517   : > { %v6230_v17 = vld [vmem:[%s7571_s5 + $0x28] sm:$0xff]  }
 0x59d   : > { %v1021_v18 = vpop.xlane.xlu0 %1020 }
 0x59e   : > { %v1022_v19 = vsub.f32 %v1014_v11, %v1021_v18  ;;  %v6231_v18 = vld [vmem:[%s7571_s5 + $0x20] sm:$0xff]  }
 0x5a0   : > { %v1023_v20 = vmul.f32 1.442695, %v1022_v19  ;;  %v6232_v19 = vld [vmem:[%s7571_s5 + $0x18] sm:$0xff]  }
 0x5a2   : > { %6562 = vpow2.f32 %v1023_v20  ;;  %v6233_v20 = vld [vmem:[%s7571_s5 + $0x10] sm:$0xff]  }
 0x5af   : > { %v6563_v21 = vpop.eup %6562 }
 0x5b0   : > { %v1025_v22 = vsel %vm900_vm3, %v6563_v21, 0.0 }
 0x5b1   : > { %1026 = vadd.xlane.f32.xlu1 %v1025_v22  ;;  %v6235_v22 = vld [vmem:[%s7571_s5] sm:$0xff]  }
 0x63a   : > { %v1027_v30 = vpop.xlane.xlu1 %1026 }
 0x63b   : > { %6564 = vrcp.f32 %v1027_v30 }
 0x648   : > { %v6565_v31 = vpop.eup %6564 }
 0x649   : > { %v1029_v32 = vmul.f32 %v6565_v31, %v6563_v21  ;;  %v6234_v21 = vld [vmem:[%s7571_s5 + $0x8] sm:$0xff]   ;;  %v1281_v31 = vrot.slane %v7096_v27, %v6976_v12 }
 0x64b   : > { %v1030_v35 = vpack.c.bf16 %v1029_v32, %v1029_v32 }
 0x64d   : > { %5668 = vmatmul.mubr.msk.bf16.vlgmr.msra.gmra.mxu1 %vm900_vm3, %v1030_v35 }
 0x64e   : > { %5692 = vmatpush3.bf16.msra.mxu1 %v6212_v33  ;;  %5707 = vmatprep.mubr.msk.bf16.mxu1 %vm6772_vm1, %v6770_v13 }
 0x64f   : > { %5693 = vmatprep.subr.bf16.mxu1 %v6770_v13 }
 0x652   : > { %5694 = vmatpush3.bf16.msra.mxu1 %v6213_v37  ;;  %v6237_v37 = vld [vmem:[#allocation7 + $0x30] sm:$0xff]  }
 0x653   : > { %5695 = vmatprep.subr.bf16.mxu1 %v6770_v13 }
 0x656   : > { %5696 = vmatpush3.bf16.msra.mxu1 %v6214_v38  ;;  %v6239_v38 = vld [vmem:[#allocation7 + $0x20] sm:$0xff]  }
 0x657   : > { %5697 = vmatprep.subr.bf16.mxu1 %v6770_v13 }
 0x65a   : > { %5698 = vmatpush3.bf16.msra.mxu1 %v6215_v39  ;;  %v6240_v39 = vld [vmem:[#allocation7 + $0x18] sm:$0xff]  }
 0x65b   : > { %5699 = vmatprep.subr.bf16.mxu1 %v6770_v13 }
 0x65e   : > { %5700 = vmatpush3.bf16.msra.mxu1 %v6216_v40  ;;  %v6241_v40 = vld [vmem:[#allocation7 + $0x10] sm:$0xff]  }
 0x65f   : > { %5701 = vmatprep.subr.bf16.mxu1 %v6770_v13 }
 0x662   : > { %5702 = vmatpush3.bf16.msra.mxu1 %v6217_v41  ;;  %v6242_v41 = vld [vmem:[#allocation7 + $0x8] sm:$0xff]  }
 0x663   : > { %5703 = vmatprep.subr.bf16.mxu1 %v6770_v13 }
 0x666   : > { %5704 = vmatpush3.bf16.msra.mxu1 %v6218_v42  ;;  %v6243_v42 = vld [vmem:[#allocation7] sm:$0xff]  }
 0x667   : > { %5705 = vmatprep.subr.bf16.mxu1 %v6770_v13 }
 0x66a   : > { %5706 = vmatpush3.bf16.msra.mxu1 %v6219_v43  ;;  %v1303_v43 = vrot.slane %v7096_v27, %v6963_v6 }
 0x66b   : > { %5731 = vmatprep.subr.bf16.mxu1 %v6770_v13 }
 0x66d   : > { %5708 = vmatmul.mubr.bf16.vlgmr.msra.gmra.mxu1 %v961_v44 }
 0x66e   : > { %5747 = vmatprep.mubr.msk.bf16.mxu1 %vm6772_vm1, %v6770_v13  ;;  %5732 = vmatpush3.bf16.msra.mxu1 %v6236_v5  ;;  %v6265_v5 = vld [vmem:[#allocation2 + $0x248] ss:$24 sps:$4 sm:$0xff]  }
 0x66f   : > { %5733 = vmatprep.subr.bf16.mxu1 %v6770_v13 }
 0x672   : > { %5734 = vmatpush3.bf16.msra.mxu1 %v6237_v37  ;;  %v6270_v37 = vld [vmem:[#allocation2 + $0x214] ss:$24 sps:$4 sm:$0xff]  }
 0x673   : > { %5735 = vmatprep.subr.bf16.mxu1 %v6770_v13 }
 0x676   : > { %5736 = vmatpush3.bf16.msra.mxu1 %v6238_v7  ;;  %v6268_v7 = vld [vmem:[#allocation2 + $0x210] ss:$24 sps:$4 sm:$0xff]  }
 0x677   : > { %5737 = vmatprep.subr.bf16.mxu1 %v6770_v13 }
 0x67a   : > { %5738 = vmatpush3.bf16.msra.mxu1 %v6239_v38  ;;  %v6273_v38 = vld [vmem:[#allocation2 + $0x21c] ss:$24 sps:$4 sm:$0xff]  }
 0x67b   : > { %5739 = vmatprep.subr.bf16.mxu1 %v6770_v13 }
 0x67e   : > { %5740 = vmatpush3.bf16.msra.mxu1 %v6240_v39  ;;  %v6271_v39 = vld [vmem:[#allocation2 + $0x218] ss:$24 sps:$4 sm:$0xff]  }
 0x67f   : > { %5741 = vmatprep.subr.bf16.mxu1 %v6770_v13 }
 0x682   : > { %5742 = vmatpush3.bf16.msra.mxu1 %v6241_v40  ;;  %v6276_v40 = vld [vmem:[#allocation2 + $0x1e4] ss:$24 sps:$4 sm:$0xff]  }
 0x683   : > { %5743 = vmatprep.subr.bf16.mxu1 %v6770_v13 }
 0x686   : > { %5744 = vmatpush3.bf16.msra.mxu1 %v6242_v41  ;;  %v6274_v41 = vld [vmem:[#allocation2 + $0x1e0] ss:$24 sps:$4 sm:$0xff]  }
 0x687   : > { %5745 = vmatprep.subr.bf16.mxu1 %v6770_v13 }
 0x68a   : > { %5746 = vmatpush3.bf16.msra.mxu1 %v6243_v42  ;;  %v6279_v42 = vld [vmem:[#allocation2 + $0x1ec] ss:$24 sps:$4 sm:$0xff]  }
 0x70d   : > { %v1072_v46 = vpop.f32.mrf.mxu1 }
 0x70e   : > { %v1078_v47 = vpack.c.bf16 %v1072_v46, %v1072_v46 }
 0x70f   : > { %v5669_v49 = vpop.f32.mrf.mxu1 }
 0x710   : > { %5688 = vmatmul.mubr.bf16.vlgmr.msra.gmra.mxu0 %v1078_v47 }
 0x711   : > { %v1075_v53 = vpop.f32.mrf.mxu1  ;;  %5727 = vmatprep.mubr.msk.bf16.mxu0 %vm6772_vm1, %v6770_v13  ;;  %5712 = vmatpush3.bf16.msra.mxu0 %v6228_v4 }
 0x712   : > { %5713 = vmatprep.subr.bf16.mxu0 %v6770_v13 }
 0x713   : > { %v5670_v54 = vpop.f32.mrf.mxu1 }
 0x715   : > { %5714 = vmatpush3.bf16.msra.mxu0 %v6229_v10 }
 0x716   : > { %5715 = vmatprep.subr.bf16.mxu0 %v6770_v13 }
 0x719   : > { %5716 = vmatpush3.bf16.msra.mxu0 %v6230_v17  ;;  %v6252_v17 = vld [vmem:[#allocation2 + $0x2a4] ss:$24 sps:$4 sm:$0xff]  }
 0x71a   : > { %5717 = vmatprep.subr.bf16.mxu0 %v6770_v13 }
 0x71d   : > { %5718 = vmatpush3.bf16.msra.mxu0 %v6231_v18  ;;  %v6255_v18 = vld [vmem:[#allocation2 + $0x2ac] ss:$24 sps:$4 sm:$0xff]  }
 0x71e   : > { %5719 = vmatprep.subr.bf16.mxu0 %v6770_v13 }
 0x721   : > { %5720 = vmatpush3.bf16.msra.mxu0 %v6232_v19  ;;  %v6250_v19 = vld [vmem:[#allocation2 + $0x2a0] ss:$24 sps:$4 sm:$0xff]  }
 0x722   : > { %5721 = vmatprep.subr.bf16.mxu0 %v6770_v13 }
 0x725   : > { %5722 = vmatpush3.bf16.msra.mxu0 %v6233_v20  ;;  %v6253_v20 = vld [vmem:[#allocation2 + $0x2a8] ss:$24 sps:$4 sm:$0xff]  }
 0x726   : > { %5723 = vmatprep.subr.bf16.mxu0 %v6770_v13 }
 0x729   : > { %5724 = vmatpush3.bf16.msra.mxu0 %v6234_v21 }
 0x72a   : > { %5725 = vmatprep.subr.bf16.mxu0 %v6770_v13 }
 0x72d   : > { %v1249_v55 = vpop.f32.mrf.mxu1  ;;  %5726 = vmatpush3.bf16.msra.mxu0 %v6235_v22 }
 0x72f   : > { %v5709_v56 = vpop.f32.mrf.mxu1 }
 0x731   : > { %v1252_v57 = vpop.f32.mrf.mxu1 }
 0x733   : > { %v5710_v58 = vpop.f32.mrf.mxu1 }
 0x7d0   : > { %v1161_v61 = vpop.f32.mrf.mxu0 }
 0x7d1   : > { %v1250_v62 = vadd.f32 %v1249_v55, %v1161_v61 }
 0x7d2   : > { %v5689_v63 = vpop.f32.mrf.mxu0 }
 0x7d3   : > { %v1259_v0 = vadd.f32 %v1258_v60, %v1250_v62 }
 0x7d4   : > { %v1164_v1 = vpop.f32.mrf.mxu0 }
 0x7d5   : > { %v1260_v2 = vadd.f32 %v1259_v0, %v6949_v52  ;;  %v1421_v0 = vrot.slane %v7096_v27, %v6971_v8 }
 0x7d6   : > { %v5690_v3 = vpop.f32.mrf.mxu0 }
 0x7d7   : > { %1261 = vadd.xlane.f32.xlu0 %v1260_v2 }
 0x860   : > { %v1262_v11 = vpop.xlane.xlu0 %1261 }
 0x861   : > { %v1263_v9 = vmul.f32 0.03125, %v1262_v11 }
 0x863   : > { %v1264_v15 = vsub.f32 %v1260_v2, %v1263_v9  ;;  %v6244_v9 = vld [vmem:[#allocation2 + $0x2d0] ss:$24 sps:$4 sm:$0xff]  }
 0x865   : > { %v1265_v52 = vmul.f32 %v6932_v14, %v1264_v15  ;;  %v6246_v15 = vld [vmem:[#allocation2 + $0x2d4] ss:$24 sps:$4 sm:$0xff]  }
 0x866   : > { %1860 = vmatprep.subr.bf16.mxu0 %v6246_v15  ;;  %v6303_v15 = vld [vmem:[#allocation2 + $0x254] ss:$24 sps:$4 sm:$0xff]  }
 0x867   : > { %v1266_v16 = vmul.f32 %v1265_v52, %v1265_v52 }
 0x869   : > { %1267 = vadd.xlane.f32.xlu1 %v1266_v16  ;;  %v6249_v16 = vld [vmem:[#allocation2 + $0x2dc] ss:$24 sps:$4 sm:$0xff]  }
 0x86a   : > { %1901 = vmatprep.subr.bf16.mxu1 %v6249_v16  ;;  %v6306_v16 = vld [vmem:[#allocation2 + $0x224] ss:$24 sps:$4 sm:$0xff]  }
 0x8f2   : > { %v1268_v23 = vpop.xlane.xlu1 %1267 }
 0x8f3   : > { %v1269_v24 = vmul.f32 0.03125, %v1268_v23 }
 0x8f5   : > { %v1270_v25 = vadd.f32 1e-12, %v1269_v24 }
 0x8f7   : > { %6566 = vrsqrt.f32 %v1270_v25 }
 0x904   : > { %v6567_v29 = vpop.eup %6566 }
 0x905   : > { %v1272_v30 = vmul.f32 %v6567_v29, %v1265_v52  ;;  %v6247_v52 = vld [vmem:[#allocation2 + $0x2d8] ss:$24 sps:$4 sm:$0xff]  }
 0x906   : > { %v6256_v29 = vld [vmem:[#allocation2 + $0x270] ss:$24 sps:$4 sm:$0xff]  }
 0x907   : > { %v1277_v32 = vmul.f32 %v1276_v28, %v1272_v30  ;;  %v6258_v28 = vld [vmem:[#allocation2 + $0x274] ss:$24 sps:$4 sm:$0xff]  }
 0x908   : > { %v6261_v30 = vld [vmem:[#allocation2 + $0x27c] ss:$24 sps:$4 sm:$0xff]  }
 0x909   : > { %v1282_v33 = vadd.f32 %v1281_v31, %v1277_v32  ;;  %v6259_v31 = vld [vmem:[#allocation2 + $0x278] ss:$24 sps:$4 sm:$0xff]   ;;  %v6264_v32 = vld [vmem:[#allocation2 + $0x244] ss:$24 sps:$4 sm:$0xff]  }
 0x90b   : > { %v1299_v35 = vpack.c.bf16 %v1282_v33, %v1282_v33 }
 0x90d   : > { %5728 = vmatmul.mubr.bf16.vlgmr.msra.gmra.mxu0 %v1299_v35  ;;  %v6267_v35 = vld [vmem:[#allocation2 + $0x24c] ss:$24 sps:$4 sm:$0xff]  }
 0x90e   : > { %1892 = vmatprep.mubr.bf16.mxu0 %v6771_v36  ;;  %1861 = vmatpush1.bf16.msra.mxu0 %v6244_v9  ;;  %v6300_v9 = vld [vmem:[#allocation2 + $0x284] ss:$24 sps:$4 sm:$0xff]  }
 0x90f   : > { %1862 = vmatprep.subr.bf16.mxu0 %v6252_v17  ;;  %v6304_v17 = vld [vmem:[#allocation2 + $0x220] ss:$24 sps:$4 sm:$0xff]  }
 0x912   : > { %1863 = vmatpush1.bf16.msra.mxu0 %v6250_v19  ;;  %v6307_v19 = vld [vmem:[#allocation2 + $0x1f0] ss:$24 sps:$4 sm:$0xff]  }
 0x913   : > { %1864 = vmatprep.subr.bf16.mxu0 %v6258_v28 }
 0x916   : > { %1865 = vmatpush1.bf16.msra.mxu0 %v6256_v29 }
 0x917   : > { %1866 = vmatprep.subr.bf16.mxu0 %v6264_v32 }
 0x9cd   : > { %v1386_v44 = vpop.f32.mrf.mxu0 }
 0x9ce   : > { %v1387_v45 = vadd.f32 %v1386_v44, %v1303_v43  ;;  %v6277_v43 = vld [vmem:[#allocation2 + $0x1e8] ss:$24 sps:$4 sm:$0xff]   ;;  %v6282_v44 = vld [vmem:[#allocation2 + $0x1b4] ss:$24 sps:$4 sm:$0xff]  }
 0x9cf   : > { %v5729_v46 = vpop.f32.mrf.mxu0 }
 0x9d0   : > { %v1393_v47 = vmul.f32 0.044715, %v1387_v45  ;;  %v1392_v60 = vmul.f32 0.5, %v1387_v45  ;;  %v6285_v46 = vld [vmem:[#allocation2 + $0x1bc] ss:$24 sps:$4 sm:$0xff]  }
 0x9d1   : > { %v1389_v49 = vpop.f32.mrf.mxu0 }
 0x9d2   : > { %v1394_v53 = vmul.f32 %v1393_v47, %v1387_v45  ;;  %v6283_v47 = vld [vmem:[#allocation2 + $0x1b8] ss:$24 sps:$4 sm:$0xff]   ;;  %v6288_v49 = vld [vmem:[#allocation2 + $0x184] ss:$24 sps:$4 sm:$0xff]  }
 0x9d3   : > { %v5730_v54 = vpop.f32.mrf.mxu0 }
 0x9d4   : > { %v1395_v55 = vmul.f32 %v1394_v53, %v1387_v45  ;;  %v6286_v53 = vld [vmem:[#allocation2 + $0x180] ss:$24 sps:$4 sm:$0xff]   ;;  %v6291_v54 = vld [vmem:[#allocation2 + $0x18c] ss:$24 sps:$4 sm:$0xff]  }
 0x9d6   : > { %v1396_v56 = vadd.f32 %v1395_v55, %v1387_v45  ;;  %v6280_v45 = vld [vmem:[#allocation2 + $0x1b0] ss:$24 sps:$4 sm:$0xff]  }
 0x9d7   : > { %v6289_v55 = vld [vmem:[#allocation2 + $0x188] ss:$24 sps:$4 sm:$0xff]  }
 0x9d8   : > { %v1397_v57 = vmul.f32 0.7978846, %v1396_v56  ;;  %v6294_v56 = vld [vmem:[#allocation2 + $0x2e4] ss:$24 sps:$4 sm:$0xff]  }
 0x9da   : > { %6568 = vtanh.f32 %v1397_v57 }
 0x9e7   : > { %v6569_v58 = vpop.eup %6568 }
 0x9e8   : > { %v1399_v61 = vadd.f32 1.0, %v6569_v58 }
 0x9ea   : > { %v1400_v62 = vmul.f32 %v1399_v61, %v1392_v60  ;;  %v1526_v61 = vrot.slane %v7096_v27, %v7008_v51 }
 0x9ec   : > { %v1417_v63 = vpack.c.bf16 %v1400_v62, %v1400_v62 }
 0x9ee   : > { %5748 = vmatmul.mubr.bf16.vlgmr.msra.gmra.mxu1 %v1417_v63 }
 0x9ef   : > { %1933 = vmatprep.mubr.bf16.mxu1 %v6771_v36  ;;  %1902 = vmatpush1.bf16.msra.mxu1 %v6247_v52  ;;  %v6301_v52 = vld [vmem:[#allocation2 + $0x250] ss:$24 sps:$4 sm:$0xff]  }
 0x9f0   : > { %1903 = vmatprep.subr.bf16.mxu1 %v6255_v18  ;;  %v6309_v18 = vld [vmem:[#allocation2 + $0x1f4] ss:$24 sps:$4 sm:$0xff]  }
 0x9f3   : > { %1904 = vmatpush1.bf16.msra.mxu1 %v6253_v20  ;;  %v6312_v20 = vld [vmem:[#allocation2 + $0x1c4] ss:$24 sps:$4 sm:$0xff]  }
 0x9f4   : > { %1905 = vmatprep.subr.bf16.mxu1 %v6261_v30 }
 0x9f7   : > { %1906 = vmatpush1.bf16.msra.mxu1 %v6259_v31 }
 0x9f8   : > { %1907 = vmatprep.subr.bf16.mxu1 %v6267_v35 }
 0x9fb   : > { %1908 = vmatpush1.bf16.msra.mxu1 %v6265_v5 }
 0x9fc   : > { %1909 = vmatprep.subr.bf16.mxu1 %v6273_v38 }
 0x9ff   : > { %1910 = vmatpush1.bf16.msra.mxu1 %v6271_v39 }
 0xa00   : > { %1911 = vmatprep.subr.bf16.mxu1 %v6279_v42 }
 0xa03   : > { %1912 = vmatpush1.bf16.msra.mxu1 %v6277_v43 }
 0xa04   : > { %1913 = vmatprep.subr.bf16.mxu1 %v6285_v46 }
 0xa07   : > { %1914 = vmatpush1.bf16.msra.mxu1 %v6283_v47 }
 0xa08   : > { %1915 = vmatprep.subr.bf16.mxu1 %v6291_v54 }
 0xa0b   : > { %1916 = vmatpush1.bf16.msra.mxu1 %v6289_v55 }
 0xa0c   : > { %5751 = vmatprep.subr.bf16.mxu1 %v6770_v13 }
 0xaae   : > { %v1504_v1 = vpop.f32.mrf.mxu1 }
 0xaaf   : > { %v1505_v2 = vadd.f32 %v1504_v1, %v1421_v0  ;;  %v1531_v0 = vrot.slane %v7096_v27, %v7000_v48  ;;  %v6298_v27 = vld [vmem:[#allocation2 + $0x280] ss:$24 sps:$4 sm:$0xff]  }
 0xab0   : > { %v5749_v3 = vpop.f32.mrf.mxu1 }
 0xab1   : > { %v1510_v4 = vadd.f32 %v1505_v2, %v1282_v33  ;;  %v6262_v33 = vld [vmem:[#allocation2 + $0x240] ss:$24 sps:$4 sm:$0xff]  }
 0xab2   : > { %v1507_v10 = vpop.f32.mrf.mxu1  ;;  %1867 = vmatpush1.bf16.msra.mxu0 %v6262_v33  ;;  %v6292_v3 = vld [vmem:[#allocation2 + $0x2e0] ss:$24 sps:$4 sm:$0xff]  }
 0xab3   : > { %1511 = vadd.xlane.f32.xlu0 %v1510_v4  ;;  %1868 = vmatprep.subr.bf16.mxu0 %v6270_v37  ;;  %v6297_v10 = vld [vmem:[#allocation2 + $0x2b4] ss:$24 sps:$4 sm:$0xff]  }
 0xab4   : > { %v5750_v11 = vpop.f32.mrf.mxu1 }
 0xab5   : > { %v6295_v11 = vld [vmem:[#allocation2 + $0x2b0] ss:$24 sps:$4 sm:$0xff]  }
 0xab6   : > { %1869 = vmatpush1.bf16.msra.mxu0 %v6268_v7 }
 0xab7   : > { %1870 = vmatprep.subr.bf16.mxu0 %v6276_v40 }
 0xaba   : > { %1871 = vmatpush1.bf16.msra.mxu0 %v6274_v41 }
 0xabb   : > { %1872 = vmatprep.subr.bf16.mxu0 %v6282_v44 }
 0xabe   : > { %1873 = vmatpush1.bf16.msra.mxu0 %v6280_v45 }
 0xabf   : > { %1874 = vmatprep.subr.bf16.mxu0 %v6288_v49 }
 0xac2   : > { %1875 = vmatpush1.bf16.msra.mxu0 %v6286_v53 }
 0xac3   : > { %1942 = vmatprep.subr.bf16.mxu0 %v6294_v56 }
 0xb3c   : > { %v1512_v21 = vpop.xlane.xlu0 %1511 }
 0xb3d   : > { %v1513_v22 = vmul.f32 0.03125, %v1512_v21  ;;  %v6310_v21 = vld [vmem:[#allocation2 + $0x1c0] ss:$24 sps:$4 sm:$0xff]  }
 0xb3f   : > { %v1514_v23 = vsub.f32 %v1510_v4, %v1513_v22  ;;  %v6315_v22 = vld [vmem:[#allocation2 + $0x194] ss:$24 sps:$4 sm:$0xff]  }
 0xb41   : > { %v1515_v24 = vmul.f32 %v6932_v14, %v1514_v23  ;;  %v6313_v23 = vld [vmem:[#allocation2 + $0x190] ss:$24 sps:$4 sm:$0xff]  }
 0xb43   : > { %v1516_v25 = vmul.f32 %v1515_v24, %v1515_v24 }
 0xb45   : > { %1517 = vadd.xlane.f32.xlu1 %v1516_v25 }
 0xbce   : > { %v1518_v57 = vpop.xlane.xlu1 %1517 }
 0xbcf   : > { %v1519_v58 = vmul.f32 0.03125, %v1518_v57 }
 0xbd1   : > { %v1520_v60 = vadd.f32 1e-12, %v1519_v58 }
 0xbd3   : > { %6570 = vrsqrt.f32 %v1520_v60 }
 0xbe0   : > { %v6571_v62 = vpop.eup %6570 }
 0xbe1   : > { %v1522_v63 = vmul.f32 %v6571_v62, %v1515_v24  ;;  %v7134_v24 = vld [vmem:[%s7573_s7 + $0x10] sm:$0xff] }
 0xbe2   : > { %v1991_v25 = vrot.slane %v7134_v24, %v6963_v6  ;;  %v1996_v30 = vrot.slane %v7134_v24, %v6971_v8  ;;  %v1986_v35 = vrot.slane %v7134_v24, %v6976_v12 }
 0xbe3   : > { %v1527_v1 = vmul.f32 %v1526_v61, %v1522_v63 }
 0xbe5   : > { %v7121_v2 = vadd.f32 %v1531_v0, %v1527_v1 }
 0xbe7   : > { %v1619_v4 = vpack.c.bf16 %v7121_v2, %v7121_v2 }
 0xbe9   : > { %1893 = vmatmul.mubr.bf16.vlgmr.msra.gmra.mxu0 %v1619_v4  ;;  %1934 = vmatmul.mubr.bf16.vlgmr.msra.gmra.mxu1 %v1619_v4 }
 0xbea   : > { %1943 = vmatpush1.bf16.msra.mxu0 %v6292_v3  ;;  %1974 = vmatprep.mubr.bf16.mxu0 %v6771_v36  ;;  %v2108_v3 = vrot.slane %v7134_v24, %v7000_v48 }
 0xbeb   : > { %1944 = vmatprep.subr.bf16.mxu0 %v6297_v10  ;;  %5753 = vmatprep.mubr.msk.bf16.mxu1 %vm6772_vm1, %v6770_v13 }
 0xbee   : > { %1945 = vmatpush1.bf16.msra.mxu0 %v6295_v11  ;;  %v2113_v11 = vrot.slane %v7134_v24, %v7005_v50 }
 0xbef   : > { %1946 = vmatprep.subr.bf16.mxu0 %v6300_v9 }
 0xbf2   : > { %1947 = vmatpush1.bf16.msra.mxu0 %v6298_v27  ;;  %v2103_v27 = vrot.slane %v7134_v24, %v7008_v51 }
 0xbf3   : > { %1948 = vmatprep.subr.bf16.mxu0 %v6303_v15 }
 0xbf6   : > { %1949 = vmatpush1.bf16.msra.mxu0 %v6301_v52 }
 0xbf7   : > { %1950 = vmatprep.subr.bf16.mxu0 %v6306_v16 }
 0xbfa   : > { %1951 = vmatpush1.bf16.msra.mxu0 %v6304_v17 }
 0xbfb   : > { %1952 = vmatprep.subr.bf16.mxu0 %v6309_v18 }
 0xbfe   : > { %1953 = vmatpush1.bf16.msra.mxu0 %v6307_v19 }
 0xbff   : > { %1954 = vmatprep.subr.bf16.mxu0 %v6312_v20 }
 0xc02   : > { %1955 = vmatpush1.bf16.msra.mxu0 %v6310_v21 }
 0xc03   : > { %1956 = vmatprep.subr.bf16.mxu0 %v6315_v22 }
 0xc06   : > { %1957 = vmatpush1.bf16.msra.mxu0 %v6313_v23 }
 0xc07   : > { %5775 = vmatprep.subr.bf16.mxu0 %v6770_v13 }
 0xc09   : > { %1975 = vmatmul.mubr.bf16.vlgmr.msra.gmra.mxu0 %v1619_v4 }
 0xc0a   : > { %5791 = vmatprep.mubr.msk.bf16.mxu0 %vm6772_vm1, %v6770_v13 }
 0xca9   : > { %v1894_v28 = vpop.f32.mrf.mxu0  ;;  %v1935_v29 = vpop.f32.mrf.mxu1 }
 0xcaa   : > { %v1997_v38 = vadd.f32 %v1996_v30, %v1935_v29  ;;  %v1987_v41 = vadd.f32 %v1986_v35, %v1894_v28 }
 0xcab   : > { %v1896_v31 = vpop.f32.mrf.mxu0  ;;  %v1937_v32 = vpop.f32.mrf.mxu1 }
 0xcac   : > { %v1992_v33 = vadd.f32 %v1991_v25, %v1896_v31  ;;  %v2052_v42 = vpack.c.bf16 %v1997_v38, %v1997_v38  ;;  %v1998_v43 = vpack.c.bf16 %v1987_v41, %v1987_v41  ;;  %v2104_v17 = vadd.f32 %v2103_v27, %v1937_v32  ;;  %v6327_v41 = vld [vmem:[#allocation5 + $0xe0] sm:$0xff]  }
 0xcad   : > { %v1898_v5 = vpop.f32.mrf.mxu0  ;;  %v1939_v37 = vpop.f32.mrf.mxu1 }
 0xcae   : > { %v1999_v7 = vpack.c.bf16 %v1992_v33, %v1992_v33  ;;  %v2057_v44 = vsel %vm917_vm2, %v2052_v42, 0  ;;  %v2115_v19 = vpack.c.bf16 %v2104_v17, %v2104_v17  ;;  %v6328_v42 = vld [vmem:[#allocation5 + $0xd8] sm:$0xff]  }
 0xcaf   : > { %v1899_v39 = vpop.f32.mrf.mxu0  ;;  %v1940_v40 = vpop.f32.mrf.mxu1 }
 0xcb0   : > { %5752 = vmatpush3.bf16.xpose.msra.mxu1 %v1999_v7  ;;  %v6324_v39 = vld [vmem:[#allocation5 + $0xf8] sm:$0xff]   ;;  %v6325_v40 = vld [vmem:[#allocation5 + $0xf0] sm:$0xff]  }
 0xcb1   : > { %5757 = vmatprep.subr.bf16.mxu1 %v6770_v13  ;;  %5776 = vmatpush3.bf16.msra.mxu0 %v6324_v39 }
 0xcb2   : > { %5777 = vmatprep.subr.bf16.mxu0 %v6770_v13 }
 0xcb5   : > { %5778 = vmatpush3.bf16.msra.mxu0 %v6325_v40 }
 0xcb6   : > { %5779 = vmatprep.subr.bf16.mxu0 %v6770_v13 }
 0xcb7   : > { %5754 = vmatmul.mubr.bf16.vlgmr.msra.gmra.mxu1 %v1998_v43  ;;  %v6329_v43 = vld [vmem:[#allocation5 + $0xd0] sm:$0xff]  }
 0xcb8   : > { %5758 = vmatpush3.bf16.msra.mxu1 %v2057_v44  ;;  %5759 = vmatprep.mubr.msk.bf16.mxu1 %vm6772_vm1, %v6770_v13  ;;  %v6330_v44 = vld [vmem:[#allocation5 + $0xc8] sm:$0xff]  }
 0xcb9   : > { %5763 = vmatprep.subr.bf16.mxu1 %v6770_v13 }
 0xcc9   : > { %v1976_v45 = vpop.f32.mrf.mxu0 }
 0xcca   : > { %v2109_v10 = vadd.f32 %v2108_v3, %v1976_v45 }
 0xccb   : > { %v1978_v46 = vpop.f32.mrf.mxu0 }
 0xccc   : > { %v2116_v52 = vpack.c.bf16 %v2109_v10, %v2109_v10  ;;  %v2114_v16 = vadd.f32 %v2113_v11, %v1978_v46 }
 0xccd   : > { %v1980_v47 = vpop.f32.mrf.mxu0 }
 0xcce   : > { %v2169_v18 = vpack.c.bf16 %v2114_v16, %v2114_v16 }
 0xccf   : > { %v1981_v49 = vpop.f32.mrf.mxu0 }
 0xcd0   : > { %v2174_v20 = vsel %vm917_vm2, %v2169_v18, 0  ;;  %v6316_v49 = vld [vmem:[#allocation5 + $0xb8] sm:$0xff]  }
 0xd77   : > { %v2034_v53 = vpop.f32.mrf.mxu1 }
 0xd78   : > { %v2035_v54 = vadd.f32 %v6994_v34, %v2034_v53 }
 0xd79   : > { %v5755_v55 = vpop.f32.mrf.mxu1 }
 0xd7a   : > { %v2040_v56 = vsel %vm900_vm3, %v2035_v54, -inf  ;;  %v6318_v55 = vld [vmem:[#allocation5 + $0xa8] sm:$0xff]  }
 0xd7b   : > { %2041 = vmax.xlane.f32.xlu0 %v2040_v56  ;;  %v2037_v57 = vpop.f32.mrf.mxu1  ;;  %v6319_v56 = vld [vmem:[#allocation5 + $0xa0] sm:$0xff]  }
 0xd7c   : > { %v6320_v57 = vld [vmem:[#allocation5 + $0x98] sm:$0xff]  }
 0xd7d   : > { %v5756_v58 = vpop.f32.mrf.mxu1 }
 0xd7e   : > { %v6321_v58 = vld [vmem:[#allocation5 + $0x90] sm:$0xff]  }
 0xe04   : > { %v2042_v60 = vpop.xlane.xlu0 %2041 }
 0xe05   : > { %v2043_v61 = vsub.f32 %v2035_v54, %v2042_v60  ;;  %v6317_v54 = vld [vmem:[#allocation5 + $0xb0] sm:$0xff]   ;;  %v6322_v60 = vld [vmem:[#allocation5 + $0x88] sm:$0xff]  }
 0xe07   : > { %v2044_v62 = vmul.f32 1.442695, %v2043_v61  ;;  %v6323_v61 = vld [vmem:[#allocation5 + $0x80] sm:$0xff]  }
 0xe09   : > { %6572 = vpow2.f32 %v2044_v62 }
 0xe16   : > { %v6573_v63 = vpop.eup %6572 }
 0xe17   : > { %v2046_v0 = vsel %vm900_vm3, %v6573_v63, 0.0 }
 0xe18   : > { %2047 = vadd.xlane.f32.xlu1 %v2046_v0 }
 0xea1   : > { %v2048_v1 = vpop.xlane.xlu1 %2047 }
 0xea2   : > { %6574 = vrcp.f32 %v2048_v1 }
 0xeaf   : > { %v6575_v4 = vpop.eup %6574 }
 0xeb0   : > { %v2050_v9 = vmul.f32 %v6575_v4, %v6573_v63  ;;  %v6331_v63 = vld [vmem:[#allocation5 + $0xc0] sm:$0xff]  }
 0xeb2   : > { %v2051_v15 = vpack.c.bf16 %v2050_v9, %v2050_v9 }
 0xeb4   : > { %5760 = vmatmul.mubr.msk.bf16.vlgmr.msra.gmra.mxu1 %vm900_vm3, %v2051_v15 }
 0xeb5   : > { %5764 = vmatpush3.bf16.xpose.msra.mxu1 %v2116_v52  ;;  %5765 = vmatprep.mubr.msk.bf16.mxu1 %vm6772_vm1, %v6770_v13  ;;  %v2396_v52 = vrot.slane %v7134_v24, %v7053_v59 }
 0xeb6   : > { %5769 = vmatprep.subr.bf16.mxu1 %v6770_v13 }
 0xebc   : > { %5766 = vmatmul.mubr.bf16.vlgmr.msra.gmra.mxu1 %v2115_v19 }
 0xebd   : > { %5770 = vmatpush3.bf16.msra.mxu1 %v2174_v20  ;;  %5771 = vmatprep.mubr.msk.bf16.mxu1 %vm6772_vm1, %v6770_v13 }
 0xebe   : > { %5795 = vmatprep.subr.bf16.mxu1 %v6770_v13 }
 0xf74   : > { %v7164_v21 = vpop.f32.mrf.mxu1 }
 0xf75   : > { %v2099_v62 = vpack.c.bf16 %v7164_v21, %v7164_v21 }
 0xf76   : > { %v5761_v22 = vpop.f32.mrf.mxu1 }
 0xf78   : > { %v2096_v23 = vpop.f32.mrf.mxu1 }
 0xf79   : > { %v6332_v23 = vld [vmem:[%s7571_s5 + $0x78] sm:$0xff]  }
 0xf7a   : > { %v5762_v25 = vpop.f32.mrf.mxu1 }
 0xf7b   : > { %v6333_v25 = vld [vmem:[%s7571_s5 + $0x70] sm:$0xff]  }
 0xf7c   : > { %v2151_v28 = vpop.f32.mrf.mxu1 }
 0xf7d   : > { %v2152_v29 = vadd.f32 %v6994_v34, %v2151_v28  ;;  %v6326_v34 = vld [vmem:[#allocation5 + $0xe8] sm:$0xff]  }
 0xf7e   : > { %v5767_v30 = vpop.f32.mrf.mxu1  ;;  %5780 = vmatpush3.bf16.msra.mxu0 %v6326_v34 }
 0xf7f   : > { %v2157_v31 = vsel %vm900_vm3, %v2152_v29, -inf  ;;  %5781 = vmatprep.subr.bf16.mxu0 %v6770_v13 }
 0xf80   : > { %2158 = vmax.xlane.f32.xlu0 %v2157_v31  ;;  %v2154_v32 = vpop.f32.mrf.mxu1 }
 0xf82   : > { %v5768_v33 = vpop.f32.mrf.mxu1  ;;  %5782 = vmatpush3.bf16.msra.mxu0 %v6327_v41  ;;  %v7232_v41 = vld [vmem:[%s7573_s7 + $0x18] sm:$0xff] }
 0xf83   : > { %5783 = vmatprep.subr.bf16.mxu0 %v6770_v13  ;;  %v6334_v33 = vld [vmem:[%s7571_s5 + $0x68] sm:$0xff]  }
 0xf86   : > { %5784 = vmatpush3.bf16.msra.mxu0 %v6328_v42  ;;  %v2414_v42 = vrot.slane %v7134_v24, %v7091_v26  ;;  %v6342_v24 = vld [vmem:[#allocation7 + $0x68] sm:$0xff]  }
 0xf87   : > { %5785 = vmatprep.subr.bf16.mxu0 %v6770_v13 }
 0xf8a   : > { %5786 = vmatpush3.bf16.msra.mxu0 %v6329_v43 }
 0xf8b   : > { %5787 = vmatprep.subr.bf16.mxu0 %v6770_v13 }
 0xf8e   : > { %5788 = vmatpush3.bf16.msra.mxu0 %v6330_v44 }
 0xf8f   : > { %5789 = vmatprep.subr.bf16.mxu0 %v6770_v13 }
 0xf92   : > { %5790 = vmatpush3.bf16.msra.mxu0 %v6331_v63 }
 0xf93   : > { %5815 = vmatprep.subr.bf16.mxu0 %v6770_v13 }
0x1009   : > { %v2159_v35 = vpop.xlane.xlu0 %2158 }
0x100a   : > { %v2160_v5 = vsub.f32 %v2152_v29, %v2159_v35  ;;  %v6335_v35 = vld [vmem:[%s7571_s5 + $0x60] sm:$0xff]  }
0x100c   : > { %v2161_v37 = vmul.f32 1.442695, %v2160_v5  ;;  %v6336_v5 = vld [vmem:[%s7571_s5 + $0x58] sm:$0xff]  }
0x100e   : > { %6576 = vpow2.f32 %v2161_v37  ;;  %v6337_v37 = vld [vmem:[%s7571_s5 + $0x50] sm:$0xff]  }
0x101b   : > { %v6577_v7 = vpop.eup %6576 }
0x101c   : > { %v2163_v38 = vsel %vm900_vm3, %v6577_v7, 0.0 }
0x101d   : > { %2164 = vadd.xlane.f32.xlu1 %v2163_v38  ;;  %v6339_v38 = vld [vmem:[%s7571_s5 + $0x40] sm:$0xff]  }
0x10a6   : > { %v2165_v45 = vpop.xlane.xlu1 %2164 }
0x10a7   : > { %6578 = vrcp.f32 %v2165_v45  ;;  %v2419_v45 = vrot.slane %v7232_v41, %v6976_v12 }
0x10b4   : > { %v6579_v46 = vpop.eup %6578 }
0x10b5   : > { %v2167_v47 = vmul.f32 %v6579_v46, %v6577_v7  ;;  %v6338_v7 = vld [vmem:[%s7571_s5 + $0x48] sm:$0xff]  }
0x10b7   : > { %v2168_v53 = vpack.c.bf16 %v2167_v47, %v2167_v47 }
0x10b9   : > { %5772 = vmatmul.mubr.msk.bf16.vlgmr.msra.gmra.mxu1 %vm900_vm3, %v2168_v53  ;;  %v6340_v53 = vld [vmem:[#allocation7 + $0x78] sm:$0xff]  }
0x10ba   : > { %5796 = vmatpush3.bf16.msra.mxu1 %v6316_v49  ;;  %5811 = vmatprep.mubr.msk.bf16.mxu1 %vm6772_vm1, %v6770_v13 }
0x10bb   : > { %5797 = vmatprep.subr.bf16.mxu1 %v6770_v13 }
0x10be   : > { %5798 = vmatpush3.bf16.msra.mxu1 %v6317_v54  ;;  %v6341_v54 = vld [vmem:[#allocation7 + $0x70] sm:$0xff]  }
0x10bf   : > { %5799 = vmatprep.subr.bf16.mxu1 %v6770_v13 }
0x10c2   : > { %5800 = vmatpush3.bf16.msra.mxu1 %v6318_v55  ;;  %v6343_v55 = vld [vmem:[#allocation7 + $0x60] sm:$0xff]  }
0x10c3   : > { %5801 = vmatprep.subr.bf16.mxu1 %v6770_v13 }
0x10c6   : > { %5802 = vmatpush3.bf16.msra.mxu1 %v6319_v56  ;;  %v6344_v56 = vld [vmem:[#allocation7 + $0x58] sm:$0xff]  }
0x10c7   : > { %5803 = vmatprep.subr.bf16.mxu1 %v6770_v13 }
0x10ca   : > { %5804 = vmatpush3.bf16.msra.mxu1 %v6320_v57  ;;  %v6345_v57 = vld [vmem:[#allocation7 + $0x50] sm:$0xff]  }
0x10cb   : > { %5805 = vmatprep.subr.bf16.mxu1 %v6770_v13 }
0x10ce   : > { %5806 = vmatpush3.bf16.msra.mxu1 %v6321_v58  ;;  %v6346_v58 = vld [vmem:[#allocation7 + $0x48] sm:$0xff]  }
0x10cf   : > { %5807 = vmatprep.subr.bf16.mxu1 %v6770_v13 }
0x10d2   : > { %5808 = vmatpush3.bf16.msra.mxu1 %v6322_v60  ;;  %v6347_v60 = vld [vmem:[#allocation7 + $0x40] sm:$0xff]  }
0x10d3   : > { %5809 = vmatprep.subr.bf16.mxu1 %v6770_v13 }
0x10d6   : > { %5810 = vmatpush3.bf16.msra.mxu1 %v6323_v61  ;;  %v2442_v61 = vrot.slane %v7232_v41, %v6963_v6 }
0x10d7   : > { %5835 = vmatprep.subr.bf16.mxu1 %v6770_v13 }
0x10d9   : > { %5812 = vmatmul.mubr.bf16.vlgmr.msra.gmra.mxu1 %v2099_v62 }
0x10da   : > { %5851 = vmatprep.mubr.msk.bf16.mxu1 %vm6772_vm1, %v6770_v13  ;;  %5836 = vmatpush3.bf16.msra.mxu1 %v6340_v53  ;;  %v6369_v53 = vld [vmem:[#allocation2 + $0x3c8] ss:$24 sps:$4 sm:$0xff]  }
0x10db   : > { %5837 = vmatprep.subr.bf16.mxu1 %v6770_v13 }
0x10de   : > { %5838 = vmatpush3.bf16.msra.mxu1 %v6341_v54  ;;  %v6374_v54 = vld [vmem:[#allocation2 + $0x394] ss:$24 sps:$4 sm:$0xff]  }
0x10df   : > { %5839 = vmatprep.subr.bf16.mxu1 %v6770_v13 }
0x10e2   : > { %5840 = vmatpush3.bf16.msra.mxu1 %v6342_v24  ;;  %v6372_v24 = vld [vmem:[#allocation2 + $0x390] ss:$24 sps:$4 sm:$0xff]  }
0x10e3   : > { %5841 = vmatprep.subr.bf16.mxu1 %v6770_v13 }
0x10e6   : > { %5842 = vmatpush3.bf16.msra.mxu1 %v6343_v55  ;;  %v6377_v55 = vld [vmem:[#allocation2 + $0x39c] ss:$24 sps:$4 sm:$0xff]  }
0x10e7   : > { %5843 = vmatprep.subr.bf16.mxu1 %v6770_v13 }
0x10ea   : > { %5844 = vmatpush3.bf16.msra.mxu1 %v6344_v56  ;;  %v6375_v56 = vld [vmem:[#allocation2 + $0x398] ss:$24 sps:$4 sm:$0xff]  }
0x10eb   : > { %5845 = vmatprep.subr.bf16.mxu1 %v6770_v13 }
0x10ee   : > { %5846 = vmatpush3.bf16.msra.mxu1 %v6345_v57  ;;  %v6380_v57 = vld [vmem:[#allocation2 + $0x364] ss:$24 sps:$4 sm:$0xff]  }
0x10ef   : > { %5847 = vmatprep.subr.bf16.mxu1 %v6770_v13 }
0x10f2   : > { %5848 = vmatpush3.bf16.msra.mxu1 %v6346_v58  ;;  %v6378_v58 = vld [vmem:[#allocation2 + $0x360] ss:$24 sps:$4 sm:$0xff]  }
0x10f3   : > { %5849 = vmatprep.subr.bf16.mxu1 %v6770_v13 }
0x10f6   : > { %5850 = vmatpush3.bf16.msra.mxu1 %v6347_v60  ;;  %v6383_v60 = vld [vmem:[#allocation2 + $0x36c] ss:$24 sps:$4 sm:$0xff]  }
0x1179   : > { %v2210_v0 = vpop.f32.mrf.mxu1 }
0x117a   : > { %v2216_v1 = vpack.c.bf16 %v2210_v0, %v2210_v0 }
0x117b   : > { %v5773_v3 = vpop.f32.mrf.mxu1 }
0x117c   : > { %5792 = vmatmul.mubr.bf16.vlgmr.msra.gmra.mxu0 %v2216_v1 }
0x117d   : > { %v2213_v4 = vpop.f32.mrf.mxu1  ;;  %5831 = vmatprep.mubr.msk.bf16.mxu0 %vm6772_vm1, %v6770_v13  ;;  %5816 = vmatpush3.bf16.msra.mxu0 %v6332_v23 }
0x117e   : > { %5817 = vmatprep.subr.bf16.mxu0 %v6770_v13 }
0x117f   : > { %v5774_v10 = vpop.f32.mrf.mxu1 }
0x1181   : > { %5818 = vmatpush3.bf16.msra.mxu0 %v6333_v25 }
0x1182   : > { %5819 = vmatprep.subr.bf16.mxu0 %v6770_v13 }
0x1185   : > { %5820 = vmatpush3.bf16.msra.mxu0 %v6334_v33  ;;  %v6356_v33 = vld [vmem:[#allocation2 + $0x424] ss:$24 sps:$4 sm:$0xff]  }
0x1186   : > { %5821 = vmatprep.subr.bf16.mxu0 %v6770_v13 }
0x1189   : > { %5822 = vmatpush3.bf16.msra.mxu0 %v6335_v35  ;;  %v6359_v35 = vld [vmem:[#allocation2 + $0x42c] ss:$24 sps:$4 sm:$0xff]  }
0x118a   : > { %5823 = vmatprep.subr.bf16.mxu0 %v6770_v13 }
0x118d   : > { %5824 = vmatpush3.bf16.msra.mxu0 %v6336_v5  ;;  %v6354_v5 = vld [vmem:[#allocation2 + $0x420] ss:$24 sps:$4 sm:$0xff]  }
0x118e   : > { %5825 = vmatprep.subr.bf16.mxu0 %v6770_v13 }
0x1191   : > { %5826 = vmatpush3.bf16.msra.mxu0 %v6337_v37  ;;  %v6357_v37 = vld [vmem:[#allocation2 + $0x428] ss:$24 sps:$4 sm:$0xff]  }
0x1192   : > { %5827 = vmatprep.subr.bf16.mxu0 %v6770_v13 }
0x1195   : > { %5828 = vmatpush3.bf16.msra.mxu0 %v6338_v7 }
0x1196   : > { %5829 = vmatprep.subr.bf16.mxu0 %v6770_v13 }
0x1199   : > { %v2387_v11 = vpop.f32.mrf.mxu1  ;;  %5830 = vmatpush3.bf16.msra.mxu0 %v6339_v38 }
0x119b   : > { %v5813_v9 = vpop.f32.mrf.mxu1 }
0x119d   : > { %v2390_v27 = vpop.f32.mrf.mxu1 }
0x119f   : > { %v5814_v15 = vpop.f32.mrf.mxu1 }
0x123c   : > { %v2299_v16 = vpop.f32.mrf.mxu0 }
0x123d   : > { %v2388_v17 = vadd.f32 %v2387_v11, %v2299_v16 }
0x123e   : > { %v5793_v18 = vpop.f32.mrf.mxu0 }
0x123f   : > { %v2397_v19 = vadd.f32 %v2396_v52, %v2388_v17 }
0x1240   : > { %v2302_v20 = vpop.f32.mrf.mxu0 }
0x1241   : > { %v2398_v21 = vadd.f32 %v2397_v19, %v7121_v2  ;;  %v2561_v19 = vrot.slane %v7232_v41, %v6971_v8 }
0x1242   : > { %v5794_v22 = vpop.f32.mrf.mxu0 }
0x1243   : > { %2399 = vadd.xlane.f32.xlu0 %v2398_v21 }
0x12cc   : > { %v2400_v28 = vpop.xlane.xlu0 %2399 }
0x12cd   : > { %v2401_v29 = vmul.f32 0.03125, %v2400_v28 }
0x12cf   : > { %v2402_v30 = vsub.f32 %v2398_v21, %v2401_v29  ;;  %v6348_v29 = vld [vmem:[#allocation2 + $0x450] ss:$24 sps:$4 sm:$0xff]  }
0x12d1   : > { %v2403_v31 = vmul.f32 %v6932_v14, %v2402_v30  ;;  %v6350_v30 = vld [vmem:[#allocation2 + $0x454] ss:$24 sps:$4 sm:$0xff]  }
0x12d2   : > { %3000 = vmatprep.subr.bf16.mxu0 %v6350_v30  ;;  %v6407_v30 = vld [vmem:[#allocation2 + $0x3d4] ss:$24 sps:$4 sm:$0xff]  }
0x12d3   : > { %v2404_v32 = vmul.f32 %v2403_v31, %v2403_v31 }
0x12d5   : > { %2405 = vadd.xlane.f32.xlu1 %v2404_v32  ;;  %v6353_v32 = vld [vmem:[#allocation2 + $0x45c] ss:$24 sps:$4 sm:$0xff]  }
0x12d6   : > { %3041 = vmatprep.subr.bf16.mxu1 %v6353_v32  ;;  %v6410_v32 = vld [vmem:[#allocation2 + $0x3a4] ss:$24 sps:$4 sm:$0xff]  }
0x135e   : > { %v2406_v39 = vpop.xlane.xlu1 %2405 }
0x135f   : > { %v2407_v40 = vmul.f32 0.03125, %v2406_v39 }
0x1361   : > { %v2408_v34 = vadd.f32 1e-12, %v2407_v40 }
0x1363   : > { %6580 = vrsqrt.f32 %v2408_v34 }
0x1370   : > { %v6581_v43 = vpop.eup %6580 }
0x1371   : > { %v2410_v44 = vmul.f32 %v6581_v43, %v2403_v31  ;;  %v6351_v31 = vld [vmem:[#allocation2 + $0x458] ss:$24 sps:$4 sm:$0xff]  }
0x1372   : > { %v6360_v43 = vld [vmem:[#allocation2 + $0x3f0] ss:$24 sps:$4 sm:$0xff]  }
0x1373   : > { %v2415_v46 = vmul.f32 %v2414_v42, %v2410_v44  ;;  %v6362_v42 = vld [vmem:[#allocation2 + $0x3f4] ss:$24 sps:$4 sm:$0xff]  }
0x1374   : > { %v6365_v44 = vld [vmem:[#allocation2 + $0x3fc] ss:$24 sps:$4 sm:$0xff]  }
0x1375   : > { %v2420_v47 = vadd.f32 %v2419_v45, %v2415_v46  ;;  %v6363_v45 = vld [vmem:[#allocation2 + $0x3f8] ss:$24 sps:$4 sm:$0xff]   ;;  %v6368_v46 = vld [vmem:[#allocation2 + $0x3c4] ss:$24 sps:$4 sm:$0xff]  }
0x1377   : > { %v2438_v49 = vpack.c.bf16 %v2420_v47, %v2420_v47 }
0x1379   : > { %5832 = vmatmul.mubr.bf16.vlgmr.msra.gmra.mxu0 %v2438_v49  ;;  %v6371_v49 = vld [vmem:[#allocation2 + $0x3cc] ss:$24 sps:$4 sm:$0xff]  }
0x137a   : > { %3032 = vmatprep.mubr.bf16.mxu0 %v6771_v36  ;;  %3001 = vmatpush1.bf16.msra.mxu0 %v6348_v29  ;;  %v6404_v29 = vld [vmem:[#allocation2 + $0x404] ss:$24 sps:$4 sm:$0xff]  }
0x137b   : > { %3002 = vmatprep.subr.bf16.mxu0 %v6356_v33  ;;  %v6408_v33 = vld [vmem:[#allocation2 + $0x3a0] ss:$24 sps:$4 sm:$0xff]  }
0x137e   : > { %3003 = vmatpush1.bf16.msra.mxu0 %v6354_v5  ;;  %v6411_v5 = vld [vmem:[#allocation2 + $0x370] ss:$24 sps:$4 sm:$0xff]  }
0x137f   : > { %3004 = vmatprep.subr.bf16.mxu0 %v6362_v42 }
0x1382   : > { %3005 = vmatpush1.bf16.msra.mxu0 %v6360_v43 }
0x1383   : > { %3006 = vmatprep.subr.bf16.mxu0 %v6368_v46 }
0x1439   : > { %v2525_v62 = vpop.f32.mrf.mxu0 }
0x143a   : > { %v2526_v63 = vadd.f32 %v2525_v62, %v2442_v61  ;;  %v6381_v61 = vld [vmem:[#allocation2 + $0x368] ss:$24 sps:$4 sm:$0xff]   ;;  %v6386_v62 = vld [vmem:[#allocation2 + $0x334] ss:$24 sps:$4 sm:$0xff]  }
0x143b   : > { %v5833_v0 = vpop.f32.mrf.mxu0 }
0x143c   : > { %v2532_v1 = vmul.f32 0.044715, %v2526_v63  ;;  %v2531_v52 = vmul.f32 0.5, %v2526_v63  ;;  %v6389_v0 = vld [vmem:[#allocation2 + $0x33c] ss:$24 sps:$4 sm:$0xff]  }
0x143d   : > { %v2528_v3 = vpop.f32.mrf.mxu0 }
0x143e   : > { %v2533_v4 = vmul.f32 %v2532_v1, %v2526_v63  ;;  %v6387_v1 = vld [vmem:[#allocation2 + $0x338] ss:$24 sps:$4 sm:$0xff]   ;;  %v6392_v3 = vld [vmem:[#allocation2 + $0x304] ss:$24 sps:$4 sm:$0xff]  }
0x143f   : > { %v5834_v10 = vpop.f32.mrf.mxu0 }
0x1440   : > { %v2534_v11 = vmul.f32 %v2533_v4, %v2526_v63  ;;  %v6390_v4 = vld [vmem:[#allocation2 + $0x300] ss:$24 sps:$4 sm:$0xff]   ;;  %v6395_v10 = vld [vmem:[#allocation2 + $0x30c] ss:$24 sps:$4 sm:$0xff]  }
0x1442   : > { %v2535_v9 = vadd.f32 %v2534_v11, %v2526_v63  ;;  %v6384_v63 = vld [vmem:[#allocation2 + $0x330] ss:$24 sps:$4 sm:$0xff]  }
0x1443   : > { %v6393_v11 = vld [vmem:[#allocation2 + $0x308] ss:$24 sps:$4 sm:$0xff]  }
0x1444   : > { %v2536_v27 = vmul.f32 0.7978846, %v2535_v9  ;;  %v6398_v9 = vld [vmem:[#allocation2 + $0x464] ss:$24 sps:$4 sm:$0xff]  }
0x1446   : > { %6582 = vtanh.f32 %v2536_v27 }
0x1453   : > { %v6583_v15 = vpop.eup %6582 }
0x1454   : > { %v2538_v16 = vadd.f32 1.0, %v6583_v15 }
0x1456   : > { %v2539_v17 = vmul.f32 %v2538_v16, %v2531_v52  ;;  %v2666_v16 = vrot.slane %v7232_v41, %v7008_v51 }
0x1458   : > { %v2557_v18 = vpack.c.bf16 %v2539_v17, %v2539_v17 }
0x145a   : > { %5852 = vmatmul.mubr.bf16.vlgmr.msra.gmra.mxu1 %v2557_v18 }
0x145b   : > { %3073 = vmatprep.mubr.bf16.mxu1 %v6771_v36  ;;  %3042 = vmatpush1.bf16.msra.mxu1 %v6351_v31  ;;  %v6405_v31 = vld [vmem:[#allocation2 + $0x3d0] ss:$24 sps:$4 sm:$0xff]  }
0x145c   : > { %3043 = vmatprep.subr.bf16.mxu1 %v6359_v35  ;;  %v6413_v35 = vld [vmem:[#allocation2 + $0x374] ss:$24 sps:$4 sm:$0xff]  }
0x145f   : > { %3044 = vmatpush1.bf16.msra.mxu1 %v6357_v37  ;;  %v6416_v37 = vld [vmem:[#allocation2 + $0x344] ss:$24 sps:$4 sm:$0xff]  }
0x1460   : > { %3045 = vmatprep.subr.bf16.mxu1 %v6365_v44 }
0x1463   : > { %3046 = vmatpush1.bf16.msra.mxu1 %v6363_v45 }
0x1464   : > { %3047 = vmatprep.subr.bf16.mxu1 %v6371_v49 }
0x1467   : > { %3048 = vmatpush1.bf16.msra.mxu1 %v6369_v53 }
0x1468   : > { %3049 = vmatprep.subr.bf16.mxu1 %v6377_v55 }
0x146b   : > { %3050 = vmatpush1.bf16.msra.mxu1 %v6375_v56 }
0x146c   : > { %3051 = vmatprep.subr.bf16.mxu1 %v6383_v60 }
0x146f   : > { %3052 = vmatpush1.bf16.msra.mxu1 %v6381_v61 }
0x1470   : > { %3053 = vmatprep.subr.bf16.mxu1 %v6389_v0 }
0x1473   : > { %3054 = vmatpush1.bf16.msra.mxu1 %v6387_v1 }
0x1474   : > { %3055 = vmatprep.subr.bf16.mxu1 %v6395_v10  ;;  %v7284_v10 = vld [vmem:[%s6991_s17] ss:$0 sm:$0xff]  ;;  %s5079_s17 = sshll.u32 %s349_s13, 3 }
0x1475   : > { %s351_s21 = scalar_lea.vmem [#allocation8], %s5079_s17 }
0x1476   : > { %s4970_s23 = sshll.u32 %s351_s21, 4  ;;  %s4971_s23 = int_to_ptr.vmem [resolvable:$true] %s4970_s23 }
0x1477   : > { %3056 = vmatpush1.bf16.msra.mxu1 %v6393_v11  ;;  %s6693_s12 = scalar_lea.vmem %s4971_s23, 128  ;;  %p6700_p7 = scmp.lt.s32.totalorder %s4971_s23, %s6698_s24 }
0x1478   : > { %5855 = vmatprep.subr.bf16.mxu1 %v6770_v13  ;;  %p6694_p9 = scmp.ne.s32.totalorder %s4971_s23, %s6693_s12  ;;  %p6701_p8 = scmp.lt.s32.totalorder %s6699_s9, %s6693_s12 }
0x147a   : > { %p6695_p10 = pnand %p6694_p9, %p6857_p5  ;;  %p6702_p11 = por %p6701_p8, %p6700_p7 }
0x147c   : > { %p6696_p12 = pneg %p6695_p10 }
0x147e   : > { %p6703_p0 = pnand %p6702_p11, %p6696_p12 }
0x151a   : > { %v2644_v20 = vpop.f32.mrf.mxu1 }
0x151b   : > { %v2645_v21 = vadd.f32 %v2644_v20, %v2561_v19  ;;  %v2671_v19 = vrot.slane %v7232_v41, %v7000_v48  ;;  %v6402_v41 = vld [vmem:[#allocation2 + $0x400] ss:$24 sps:$4 sm:$0xff]  }
0x151c   : > { %v5853_v22 = vpop.f32.mrf.mxu1 }
0x151d   : > { %v2650_v23 = vadd.f32 %v2645_v21, %v2420_v47  ;;  %v6366_v47 = vld [vmem:[#allocation2 + $0x3c0] ss:$24 sps:$4 sm:$0xff]  }
0x151e   : > { %v2647_v25 = vpop.f32.mrf.mxu1  ;;  %3007 = vmatpush1.bf16.msra.mxu0 %v6366_v47  ;;  %v6396_v22 = vld [vmem:[#allocation2 + $0x460] ss:$24 sps:$4 sm:$0xff]  }
0x151f   : > { %2651 = vadd.xlane.f32.xlu0 %v2650_v23  ;;  %3008 = vmatprep.subr.bf16.mxu0 %v6374_v54  ;;  %v6401_v25 = vld [vmem:[#allocation2 + $0x434] ss:$24 sps:$4 sm:$0xff]  }
0x1520   : > { %v5854_v28 = vpop.f32.mrf.mxu1 }
0x1521   : > { %v6399_v28 = vld [vmem:[#allocation2 + $0x430] ss:$24 sps:$4 sm:$0xff]  }
0x1522   : > { %3009 = vmatpush1.bf16.msra.mxu0 %v6372_v24 }
0x1523   : > { %3010 = vmatprep.subr.bf16.mxu0 %v6380_v57 }
0x1526   : > { %3011 = vmatpush1.bf16.msra.mxu0 %v6378_v58 }
0x1527   : > { %3012 = vmatprep.subr.bf16.mxu0 %v6386_v62 }
0x152a   : > { %3013 = vmatpush1.bf16.msra.mxu0 %v6384_v63 }
0x152b   : > { %3014 = vmatprep.subr.bf16.mxu0 %v6392_v3 }
0x152e   : > { %3015 = vmatpush1.bf16.msra.mxu0 %v6390_v4 }
0x152f   : > { %3082 = vmatprep.subr.bf16.mxu0 %v6398_v9 }
0x15a8   : > { %v2652_v7 = vpop.xlane.xlu0 %2651 }
0x15a9   : > { %v2653_v38 = vmul.f32 0.03125, %v2652_v7  ;;  %v6414_v7 = vld [vmem:[#allocation2 + $0x340] ss:$24 sps:$4 sm:$0xff]  }
0x15ab   : > { %v2654_v39 = vsub.f32 %v2650_v23, %v2653_v38  ;;  %v6419_v38 = vld [vmem:[#allocation2 + $0x314] ss:$24 sps:$4 sm:$0xff]  }
0x15ad   : > { %v2655_v40 = vmul.f32 %v6932_v14, %v2654_v39  ;;  %v6417_v39 = vld [vmem:[#allocation2 + $0x310] ss:$24 sps:$4 sm:$0xff]  }
0x15af   : > { %v2656_v34 = vmul.f32 %v2655_v40, %v2655_v40 }
0x15b1   : > { %2657 = vadd.xlane.f32.xlu1 %v2656_v34 }
0x163a   : > { %v2658_v27 = vpop.xlane.xlu1 %2657 }
0x163b   : > { %v2659_v15 = vmul.f32 0.03125, %v2658_v27 }
0x163d   : > { %v2660_v52 = vadd.f32 1e-12, %v2659_v15 }
0x163f   : > { %6584 = vrsqrt.f32 %v2660_v52 }
0x164c   : > { %v6585_v17 = vpop.eup %6584 }
0x164d   : > { %v2662_v18 = vmul.f32 %v6585_v17, %v2655_v40  ;;  %v7270_v40 = vld [vmem:[%s7573_s7 + $0x20] sm:$0xff] }
0x164e   : > { %v3131_v34 = vrot.slane %v7270_v40, %v6963_v6  ;;  %v3136_v44 = vrot.slane %v7270_v40, %v6971_v8  ;;  %v3126_v49 = vrot.slane %v7270_v40, %v6976_v12 }
0x164f   : > { %v2667_v20 = vmul.f32 %v2666_v16, %v2662_v18 }
0x1651   : > { %v7257_v21 = vadd.f32 %v2671_v19, %v2667_v20 }
0x1653   : > { %v2759_v23 = vpack.c.bf16 %v7257_v21, %v7257_v21 }
0x1655   : > { %3033 = vmatmul.mubr.bf16.vlgmr.msra.gmra.mxu0 %v2759_v23  ;;  %3074 = vmatmul.mubr.bf16.vlgmr.msra.gmra.mxu1 %v2759_v23 }
0x1656   : > { %3083 = vmatpush1.bf16.msra.mxu0 %v6396_v22  ;;  %3114 = vmatprep.mubr.bf16.mxu0 %v6771_v36 }
0x1657   : > { %3084 = vmatprep.subr.bf16.mxu0 %v6401_v25  ;;  %5857 = vmatprep.mubr.msk.bf16.mxu1 %vm6772_vm1, %v6770_v13 }
0x165a   : > { %3085 = vmatpush1.bf16.msra.mxu0 %v6399_v28 }
0x165b   : > { %3086 = vmatprep.subr.bf16.mxu0 %v6404_v29  ;;  %v3253_v29 = vrot.slane %v7270_v40, %v7005_v50 }
0x165e   : > { %3087 = vmatpush1.bf16.msra.mxu0 %v6402_v41 }
0x165f   : > { %3088 = vmatprep.subr.bf16.mxu0 %v6407_v30  ;;  %v3243_v30 = vrot.slane %v7270_v40, %v7008_v51 }
0x1662   : > { %3089 = vmatpush1.bf16.msra.mxu0 %v6405_v31 }
0x1663   : > { %3090 = vmatprep.subr.bf16.mxu0 %v6410_v32 }
0x1666   : > { %3091 = vmatpush1.bf16.msra.mxu0 %v6408_v33 }
0x1667   : > { %3092 = vmatprep.subr.bf16.mxu0 %v6413_v35 }
0x166a   : > { %3093 = vmatpush1.bf16.msra.mxu0 %v6411_v5 }
0x166b   : > { %3094 = vmatprep.subr.bf16.mxu0 %v6416_v37 }
0x166e   : > { %3095 = vmatpush1.bf16.msra.mxu0 %v6414_v7 }
0x166f   : > { %3096 = vmatprep.subr.bf16.mxu0 %v6419_v38 }
0x1672   : > { %3097 = vmatpush1.bf16.msra.mxu0 %v6417_v39 }
0x1673   : > { %5879 = vmatprep.subr.bf16.mxu0 %v6770_v13 }
0x1675   : > { %3115 = vmatmul.mubr.bf16.vlgmr.msra.gmra.mxu0 %v2759_v23  ;;  %v3248_v23 = vrot.slane %v7270_v40, %v7000_v48 }
0x1676   : > { %5895 = vmatprep.mubr.msk.bf16.mxu0 %vm6772_vm1, %v6770_v13 }
0x1715   : > { %v3034_v42 = vpop.f32.mrf.mxu0  ;;  %v3075_v43 = vpop.f32.mrf.mxu1 }
0x1716   : > { %v3137_v55 = vadd.f32 %v3136_v44, %v3075_v43  ;;  %v3127_v58 = vadd.f32 %v3126_v49, %v3034_v42 }
0x1717   : > { %v3036_v45 = vpop.f32.mrf.mxu0  ;;  %v3077_v46 = vpop.f32.mrf.mxu1 }
0x1718   : > { %v3132_v47 = vadd.f32 %v3131_v34, %v3036_v45  ;;  %v3192_v60 = vpack.c.bf16 %v3137_v55, %v3137_v55  ;;  %v3138_v61 = vpack.c.bf16 %v3127_v58, %v3127_v58  ;;  %v3244_v35 = vadd.f32 %v3243_v30, %v3077_v46  ;;  %v6429_v58 = vld [vmem:[#allocation5 + $0x170] sm:$0xff]  }
0x1719   : > { %v3038_v53 = vpop.f32.mrf.mxu0  ;;  %v3079_v54 = vpop.f32.mrf.mxu1 }
0x171a   : > { %v3139_v24 = vpack.c.bf16 %v3132_v47, %v3132_v47  ;;  %v3197_v62 = vsel %vm917_vm2, %v3192_v60, 0  ;;  %v3255_v37 = vpack.c.bf16 %v3244_v35, %v3244_v35  ;;  %v6430_v60 = vld [vmem:[#allocation5 + $0x168] sm:$0xff]   ;;  %v3536_v35 = vrot.slane %v7270_v40, %v7053_v59 }
0x171b   : > { %v3039_v56 = vpop.f32.mrf.mxu0  ;;  %v3080_v57 = vpop.f32.mrf.mxu1 }
0x171c   : > { %5856 = vmatpush3.bf16.xpose.msra.mxu1 %v3139_v24  ;;  %v6428_v57 = vld [vmem:[#allocation5 + $0x178] sm:$0xff]  }
0x171d   : > { %5861 = vmatprep.subr.bf16.mxu1 %v6770_v13  ;;  %5880 = vmatpush3.bf16.msra.mxu0 %v6428_v57  ;;  %v6442_v57 = vld [vmem:[%s7571_s5 + $0x88] sm:$0xff]  }
0x171e   : > { %5881 = vmatprep.subr.bf16.mxu0 %v6770_v13 }
0x1721   : > { %5882 = vmatpush3.bf16.msra.mxu0 %v6429_v58  ;;  %v6443_v58 = vld [vmem:[%s7571_s5 + $0x80] sm:$0xff]  }
0x1722   : > { %5883 = vmatprep.subr.bf16.mxu0 %v6770_v13 }
0x1723   : > { %5858 = vmatmul.mubr.bf16.vlgmr.msra.gmra.mxu1 %v3138_v61  ;;  %v6431_v61 = vld [vmem:[#allocation5 + $0x160] sm:$0xff]  }
0x1724   : > { %5862 = vmatpush3.bf16.msra.mxu1 %v3197_v62  ;;  %5863 = vmatprep.mubr.msk.bf16.mxu1 %vm6772_vm1, %v6770_v13  ;;  %v6432_v62 = vld [vmem:[#allocation5 + $0x158] sm:$0xff]  }
0x1725   : > { %5867 = vmatprep.subr.bf16.mxu1 %v6770_v13  ;;  %5884 = vmatpush3.bf16.msra.mxu0 %v6430_v60 }
0x1726   : > { %5885 = vmatprep.subr.bf16.mxu0 %v6770_v13 }
0x1729   : > { %5886 = vmatpush3.bf16.msra.mxu0 %v6431_v61 }
0x172a   : > { %5887 = vmatprep.subr.bf16.mxu0 %v6770_v13 }
0x172d   : > { %5888 = vmatpush3.bf16.msra.mxu0 %v6432_v62 }
0x172e   : > { %5889 = vmatprep.subr.bf16.mxu0 %v6770_v13 }
0x1735   : > { %v3116_v63 = vpop.f32.mrf.mxu0 }
0x1736   : > { %v3249_v28 = vadd.f32 %v3248_v23, %v3116_v63  ;;  %v6433_v63 = vld [vmem:[#allocation5 + $0x150] sm:$0xff]  }
0x1737   : > { %v3118_v0 = vpop.f32.mrf.mxu0  ;;  %5890 = vmatpush3.bf16.msra.mxu0 %v6433_v63  ;;  %v7371_v63 = vld [vmem:[%s7573_s7 + $0x28] sm:$0xff] }
0x1738   : > { %v3256_v32 = vpack.c.bf16 %v3249_v28, %v3249_v28  ;;  %v3254_v33 = vadd.f32 %v3253_v29, %v3118_v0  ;;  %v6434_v0 = vld [vmem:[#allocation5 + $0x148] sm:$0xff]   ;;  %5891 = vmatprep.subr.bf16.mxu0 %v6770_v13 }
0x1739   : > { %v3120_v1 = vpop.f32.mrf.mxu0 }
0x173a   : > { %v3309_v5 = vpack.c.bf16 %v3254_v33, %v3254_v33 }
0x173b   : > { %v3121_v3 = vpop.f32.mrf.mxu0  ;;  %5892 = vmatpush3.bf16.msra.mxu0 %v6434_v0  ;;  %v3554_v0 = vrot.slane %v7270_v40, %v7091_v26  ;;  %v6446_v40 = vld [vmem:[#allocation7 + $0xa8] sm:$0xff]  }
0x173c   : > { %v3314_v7 = vsel %vm917_vm2, %v3309_v5, 0  ;;  %5893 = vmatprep.subr.bf16.mxu0 %v6770_v13 }
0x17e3   : > { %v3174_v4 = vpop.f32.mrf.mxu1 }
0x17e4   : > { %v3175_v11 = vadd.f32 %v7284_v10, %v3174_v4 }
0x17e5   : > { %v5859_v9 = vpop.f32.mrf.mxu1 }
0x17e6   : > { %v3180_v27 = vsel %vm900_vm3, %v3175_v11, -inf }
0x17e7   : > { %3181 = vmax.xlane.f32.xlu0 %v3180_v27  ;;  %v3177_v15 = vpop.f32.mrf.mxu1  ;;  %v6421_v27 = vld [vmem:[#allocation5 + $0x130] sm:$0xff]  }
0x17e8   : > { %v6422_v15 = vld [vmem:[#allocation5 + $0x128] sm:$0xff]  }
0x17e9   : > { %v5860_v52 = vpop.f32.mrf.mxu1 }
0x17ea   : > { %v6423_v52 = vld [vmem:[#allocation5 + $0x120] sm:$0xff]  }
0x1870   : > { %v3182_v16 = vpop.xlane.xlu0 %3181 }
0x1871   : > { %v3183_v17 = vsub.f32 %v3175_v11, %v3182_v16  ;;  %v6420_v11 = vld [vmem:[#allocation5 + $0x138] sm:$0xff]  }
0x1872   : > { %v6424_v16 = vld [vmem:[#allocation5 + $0x118] sm:$0xff]  }
0x1873   : > { %v3184_v18 = vmul.f32 1.442695, %v3183_v17  ;;  %v6425_v17 = vld [vmem:[#allocation5 + $0x110] sm:$0xff]  }
0x1875   : > { %6586 = vpow2.f32 %v3184_v18  ;;  %v6426_v18 = vld [vmem:[#allocation5 + $0x108] sm:$0xff]  }
0x1882   : > { %v6587_v19 = vpop.eup %6586 }
0x1883   : > { %v3186_v20 = vsel %vm900_vm3, %v6587_v19, 0.0 }
0x1884   : > { %3187 = vadd.xlane.f32.xlu1 %v3186_v20 }
0x190d   : > { %v3188_v22 = vpop.xlane.xlu1 %3187 }
0x190e   : > { %6588 = vrcp.f32 %v3188_v22  ;;  %v6435_v22 = vld [vmem:[#allocation5 + $0x140] sm:$0xff]  }
0x190f   : > { %5894 = vmatpush3.bf16.msra.mxu0 %v6435_v22  ;;  %v3582_v22 = vrot.slane %v7371_v63, %v6963_v6 }
0x1910   : > { %5919 = vmatprep.subr.bf16.mxu0 %v6770_v13 }
0x191b   : > { %v6589_v25 = vpop.eup %6588 }
0x191c   : > { %v3190_v41 = vmul.f32 %v6589_v25, %v6587_v19  ;;  %v6427_v19 = vld [vmem:[#allocation5 + $0x100] sm:$0xff]  }
0x191e   : > { %v3191_v31 = vpack.c.bf16 %v3190_v41, %v3190_v41 }
0x1920   : > { %5864 = vmatmul.mubr.msk.bf16.vlgmr.msra.gmra.mxu1 %vm900_vm3, %v3191_v31 }
0x1921   : > { %5868 = vmatpush3.bf16.xpose.msra.mxu1 %v3256_v32  ;;  %5869 = vmatprep.mubr.msk.bf16.mxu1 %vm6772_vm1, %v6770_v13 }
0x1922   : > { %5873 = vmatprep.subr.bf16.mxu1 %v6770_v13 }
0x1928   : > { %5870 = vmatmul.mubr.bf16.vlgmr.msra.gmra.mxu1 %v3255_v37 }
0x1929   : > { %5874 = vmatpush3.bf16.msra.mxu1 %v3314_v7  ;;  %5875 = vmatprep.mubr.msk.bf16.mxu1 %vm6772_vm1, %v6770_v13 }
0x192a   : > { %5899 = vmatprep.subr.bf16.mxu1 %v6770_v13 }
0x19e0   : > { %v7303_v38 = vpop.f32.mrf.mxu1 }
0x19e1   : > { %v3239_v20 = vpack.c.bf16 %v7303_v38, %v7303_v38 }
0x19e2   : > { %v5865_v39 = vpop.f32.mrf.mxu1 }
0x19e4   : > { %v3236_v34 = vpop.f32.mrf.mxu1 }
0x19e6   : > { %v5866_v42 = vpop.f32.mrf.mxu1 }
0x19e8   : > { %v3291_v43 = vpop.f32.mrf.mxu1 }
0x19e9   : > { %v3292_v44 = vadd.f32 %v7284_v10, %v3291_v43  ;;  %v6436_v43 = vld [vmem:[%s7571_s5 + $0xb8] sm:$0xff]  }
0x19ea   : > { %v5871_v45 = vpop.f32.mrf.mxu1 }
0x19eb   : > { %v3297_v46 = vsel %vm900_vm3, %v3292_v44, -inf }
0x19ec   : > { %3298 = vmax.xlane.f32.xlu0 %v3297_v46  ;;  %v3294_v47 = vpop.f32.mrf.mxu1 }
0x19ee   : > { %v5872_v49 = vpop.f32.mrf.mxu1 }
0x1a75   : > { %v3299_v53 = vpop.xlane.xlu0 %3298 }
0x1a76   : > { %v3300_v54 = vsub.f32 %v3292_v44, %v3299_v53  ;;  %v6437_v44 = vld [vmem:[%s7571_s5 + $0xb0] sm:$0xff]  }
0x1a78   : > { %v3301_v24 = vmul.f32 1.442695, %v3300_v54  ;;  %v6438_v54 = vld [vmem:[%s7571_s5 + $0xa8] sm:$0xff]  }
0x1a7a   : > { %6590 = vpow2.f32 %v3301_v24  ;;  %v6439_v24 = vld [vmem:[%s7571_s5 + $0xa0] sm:$0xff]  }
0x1a87   : > { %v6591_v55 = vpop.eup %6590 }
0x1a88   : > { %v3303_v56 = vsel %vm900_vm3, %v6591_v55, 0.0 }
0x1a89   : > { %3304 = vadd.xlane.f32.xlu1 %v3303_v56  ;;  %v6441_v56 = vld [vmem:[%s7571_s5 + $0x90] sm:$0xff]  }
0x1b12   : > { %v3305_v1 = vpop.xlane.xlu1 %3304 }
0x1b13   : > { %6592 = vrcp.f32 %v3305_v1 }
0x1b20   : > { %v6593_v3 = vpop.eup %6592 }
0x1b21   : > { %v3307_v4 = vmul.f32 %v6593_v3, %v6591_v55  ;;  %v6440_v55 = vld [vmem:[%s7571_s5 + $0x98] sm:$0xff]  }
0x1b23   : > { %v3308_v9 = vpack.c.bf16 %v3307_v4, %v3307_v4  ;;  %v3559_v4 = vrot.slane %v7371_v63, %v6976_v12 }
0x1b25   : > { %5876 = vmatmul.mubr.msk.bf16.vlgmr.msra.gmra.mxu1 %vm900_vm3, %v3308_v9 }
0x1b26   : > { %5900 = vmatpush3.bf16.msra.mxu1 %v6420_v11  ;;  %5915 = vmatprep.mubr.msk.bf16.mxu1 %vm6772_vm1, %v6770_v13 }
0x1b27   : > { %5901 = vmatprep.subr.bf16.mxu1 %v6770_v13 }
0x1b2a   : > { %5902 = vmatpush3.bf16.msra.mxu1 %v6421_v27 }
0x1b2b   : > { %5903 = vmatprep.subr.bf16.mxu1 %v6770_v13 }
0x1b2e   : > { %5904 = vmatpush3.bf16.msra.mxu1 %v6422_v15  ;;  %v6444_v15 = vld [vmem:[#allocation7 + $0xb8] sm:$0xff]  }
0x1b2f   : > { %5905 = vmatprep.subr.bf16.mxu1 %v6770_v13 }
0x1b32   : > { %5906 = vmatpush3.bf16.msra.mxu1 %v6423_v52  ;;  %v6445_v52 = vld [vmem:[#allocation7 + $0xb0] sm:$0xff]  }
0x1b33   : > { %5907 = vmatprep.subr.bf16.mxu1 %v6770_v13 }
0x1b36   : > { %5908 = vmatpush3.bf16.msra.mxu1 %v6424_v16  ;;  %v6447_v16 = vld [vmem:[#allocation7 + $0xa0] sm:$0xff]  }
0x1b37   : > { %5909 = vmatprep.subr.bf16.mxu1 %v6770_v13 }
0x1b3a   : > { %5910 = vmatpush3.bf16.msra.mxu1 %v6425_v17  ;;  %v6448_v17 = vld [vmem:[#allocation7 + $0x98] sm:$0xff]  }
0x1b3b   : > { %5911 = vmatprep.subr.bf16.mxu1 %v6770_v13 }
0x1b3e   : > { %5912 = vmatpush3.bf16.msra.mxu1 %v6426_v18  ;;  %v6449_v18 = vld [vmem:[#allocation7 + $0x90] sm:$0xff]  }
0x1b3f   : > { %5913 = vmatprep.subr.bf16.mxu1 %v6770_v13 }
0x1b42   : > { %5914 = vmatpush3.bf16.msra.mxu1 %v6427_v19  ;;  %v6450_v19 = vld [vmem:[#allocation7 + $0x88] sm:$0xff]  }
0x1b43   : > { %5939 = vmatprep.subr.bf16.mxu1 %v6770_v13 }
0x1b45   : > { %5916 = vmatmul.mubr.bf16.vlgmr.msra.gmra.mxu1 %v3239_v20  ;;  %v6451_v20 = vld [vmem:[#allocation7 + $0x80] sm:$0xff]  }
0x1b46   : > { %5955 = vmatprep.mubr.msk.bf16.mxu1 %vm6772_vm1, %v6770_v13  ;;  %5940 = vmatpush3.bf16.msra.mxu1 %v6444_v15  ;;  %v6470_v15 = vld [vmem:[#allocation2 + $0x540] ss:$24 sps:$4 sm:$0xff]  }
0x1b47   : > { %5941 = vmatprep.subr.bf16.mxu1 %v6770_v13 }
0x1b4a   : > { %5942 = vmatpush3.bf16.msra.mxu1 %v6445_v52  ;;  %v6475_v52 = vld [vmem:[#allocation2 + $0x54c] ss:$24 sps:$4 sm:$0xff]  }
0x1b4b   : > { %5943 = vmatprep.subr.bf16.mxu1 %v6770_v13 }
0x1b4e   : > { %5944 = vmatpush3.bf16.msra.mxu1 %v6446_v40  ;;  %v6473_v40 = vld [vmem:[#allocation2 + $0x548] ss:$24 sps:$4 sm:$0xff]  }
0x1b4f   : > { %5945 = vmatprep.subr.bf16.mxu1 %v6770_v13 }
0x1b52   : > { %5946 = vmatpush3.bf16.msra.mxu1 %v6447_v16  ;;  %v6478_v16 = vld [vmem:[#allocation2 + $0x514] ss:$24 sps:$4 sm:$0xff]  }
0x1b53   : > { %5947 = vmatprep.subr.bf16.mxu1 %v6770_v13 }
0x1b56   : > { %5948 = vmatpush3.bf16.msra.mxu1 %v6448_v17  ;;  %v6476_v17 = vld [vmem:[#allocation2 + $0x510] ss:$24 sps:$4 sm:$0xff]  }
0x1b57   : > { %5949 = vmatprep.subr.bf16.mxu1 %v6770_v13 }
0x1b5a   : > { %5950 = vmatpush3.bf16.msra.mxu1 %v6449_v18  ;;  %v6481_v18 = vld [vmem:[#allocation2 + $0x51c] ss:$24 sps:$4 sm:$0xff]  }
0x1b5b   : > { %5951 = vmatprep.subr.bf16.mxu1 %v6770_v13 }
0x1b5e   : > { %5952 = vmatpush3.bf16.msra.mxu1 %v6450_v19  ;;  %v6479_v19 = vld [vmem:[#allocation2 + $0x518] ss:$24 sps:$4 sm:$0xff]  }
0x1b5f   : > { %5953 = vmatprep.subr.bf16.mxu1 %v6770_v13 }
0x1b62   : > { %5954 = vmatpush3.bf16.msra.mxu1 %v6451_v20  ;;  %v6484_v20 = vld [vmem:[#allocation2 + $0x4e4] ss:$24 sps:$4 sm:$0xff]  }
0x1be5   : > { %v3350_v23 = vpop.f32.mrf.mxu1 }
0x1be6   : > { %v3356_v25 = vpack.c.bf16 %v3350_v23, %v3350_v23 }
0x1be7   : > { %v5877_v28 = vpop.f32.mrf.mxu1 }
0x1be8   : > { %5896 = vmatmul.mubr.bf16.vlgmr.msra.gmra.mxu0 %v3356_v25 }
0x1be9   : > { %v3353_v29 = vpop.f32.mrf.mxu1  ;;  %5935 = vmatprep.mubr.msk.bf16.mxu0 %vm6772_vm1, %v6770_v13  ;;  %5920 = vmatpush3.bf16.msra.mxu0 %v6436_v43 }
0x1bea   : > { %5921 = vmatprep.subr.bf16.mxu0 %v6770_v13 }
0x1beb   : > { %v5878_v41 = vpop.f32.mrf.mxu1 }
0x1bed   : > { %5922 = vmatpush3.bf16.msra.mxu0 %v6437_v44 }
0x1bee   : > { %5923 = vmatprep.subr.bf16.mxu0 %v6770_v13 }
0x1bf1   : > { %5924 = vmatpush3.bf16.msra.mxu0 %v6438_v54  ;;  %v6455_v54 = vld [vmem:[#allocation2 + $0x5d8] ss:$24 sps:$4 sm:$0xff]  }
0x1bf2   : > { %5925 = vmatprep.subr.bf16.mxu0 %v6770_v13 }
0x1bf5   : > { %5926 = vmatpush3.bf16.msra.mxu0 %v6439_v24  ;;  %v6457_v24 = vld [vmem:[#allocation2 + $0x5dc] ss:$24 sps:$4 sm:$0xff]  }
0x1bf6   : > { %5927 = vmatprep.subr.bf16.mxu0 %v6770_v13  ;;  %4181 = vmatprep.subr.bf16.mxu1 %v6457_v24  ;;  %v6511_v24 = vld [vmem:[#allocation2 + $0x554] ss:$24 sps:$4 sm:$0xff]  }
0x1bf9   : > { %5928 = vmatpush3.bf16.msra.mxu0 %v6440_v55  ;;  %v6460_v55 = vld [vmem:[#allocation2 + $0x5a4] ss:$24 sps:$4 sm:$0xff]  }
0x1bfa   : > { %5929 = vmatprep.subr.bf16.mxu0 %v6770_v13 }
0x1bfd   : > { %5930 = vmatpush3.bf16.msra.mxu0 %v6441_v56  ;;  %v6463_v56 = vld [vmem:[#allocation2 + $0x5ac] ss:$24 sps:$4 sm:$0xff]  }
0x1bfe   : > { %5931 = vmatprep.subr.bf16.mxu0 %v6770_v13 }
0x1c01   : > { %5932 = vmatpush3.bf16.msra.mxu0 %v6442_v57  ;;  %v6458_v57 = vld [vmem:[#allocation2 + $0x5a0] ss:$24 sps:$4 sm:$0xff]  }
0x1c02   : > { %5933 = vmatprep.subr.bf16.mxu0 %v6770_v13 }
0x1c05   : > { %v3527_v30 = vpop.f32.mrf.mxu1  ;;  %5934 = vmatpush3.bf16.msra.mxu0 %v6443_v58  ;;  %v6461_v58 = vld [vmem:[#allocation2 + $0x5a8] ss:$24 sps:$4 sm:$0xff]  }
0x1c07   : > { %v5917_v31 = vpop.f32.mrf.mxu1 }
0x1c09   : > { %v3530_v32 = vpop.f32.mrf.mxu1 }
0x1c0b   : > { %v5918_v33 = vpop.f32.mrf.mxu1 }
0x1ca8   : > { %v3439_v5 = vpop.f32.mrf.mxu0 }
0x1ca9   : > { %v3528_v37 = vadd.f32 %v3527_v30, %v3439_v5 }
0x1caa   : > { %v5897_v7 = vpop.f32.mrf.mxu0 }
0x1cab   : > { %v3537_v38 = vadd.f32 %v3536_v35, %v3528_v37 }
0x1cac   : > { %v3442_v39 = vpop.f32.mrf.mxu0 }
0x1cad   : > { %v3538_v34 = vadd.f32 %v3537_v38, %v7257_v21 }
0x1cae   : > { %v5898_v42 = vpop.f32.mrf.mxu0 }
0x1caf   : > { %3539 = vadd.xlane.f32.xlu0 %v3538_v34 }
0x1d38   : > { %v3540_v45 = vpop.xlane.xlu0 %3539 }
0x1d39   : > { %v3541_v46 = vmul.f32 0.03125, %v3540_v45 }
0x1d3b   : > { %v3542_v47 = vsub.f32 %v3538_v34, %v3541_v46  ;;  %v3701_v34 = vrot.slane %v7371_v63, %v6971_v8 }
0x1d3d   : > { %v3543_v49 = vmul.f32 %v6932_v14, %v3542_v47 }
0x1d3f   : > { %v3544_v53 = vmul.f32 %v3543_v49, %v3543_v49 }
0x1d41   : > { %3545 = vadd.xlane.f32.xlu1 %v3544_v53  ;;  %v6454_v53 = vld [vmem:[#allocation2 + $0x5d4] ss:$24 sps:$4 sm:$0xff]  }
0x1d42   : > { %4140 = vmatprep.subr.bf16.mxu0 %v6454_v53  ;;  %v6503_v53 = vld [vmem:[#allocation2 + $0x5b0] ss:$24 sps:$4 sm:$0xff]  }
0x1dca   : > { %v3546_v60 = vpop.xlane.xlu1 %3545 }
0x1dcb   : > { %v3547_v61 = vmul.f32 0.03125, %v3546_v60 }
0x1dcd   : > { %v3548_v62 = vadd.f32 1e-12, %v3547_v61 }
0x1dcf   : > { %6594 = vrsqrt.f32 %v3548_v62 }
0x1ddc   : > { %v6595_v1 = vpop.eup %6594 }
0x1ddd   : > { %v3550_v3 = vmul.f32 %v6595_v1, %v3543_v49  ;;  %v6452_v49 = vld [vmem:[#allocation2 + $0x5d0] ss:$24 sps:$4 sm:$0xff]  }
0x1ddf   : > { %v3555_v11 = vmul.f32 %v3554_v0, %v3550_v3  ;;  %v6466_v3 = vld [vmem:[#allocation2 + $0x574] ss:$24 sps:$4 sm:$0xff]  }
0x1de1   : > { %v3560_v9 = vadd.f32 %v3559_v4, %v3555_v11  ;;  %v6464_v4 = vld [vmem:[#allocation2 + $0x570] ss:$24 sps:$4 sm:$0xff]   ;;  %v6469_v11 = vld [vmem:[#allocation2 + $0x57c] ss:$24 sps:$4 sm:$0xff]  }
0x1de3   : > { %v3578_v27 = vpack.c.bf16 %v3560_v9, %v3560_v9 }
0x1de5   : > { %5936 = vmatmul.mubr.bf16.vlgmr.msra.gmra.mxu0 %v3578_v27  ;;  %v6472_v27 = vld [vmem:[#allocation2 + $0x544] ss:$24 sps:$4 sm:$0xff]  }
0x1de6   : > { %4172 = vmatprep.mubr.bf16.mxu0 %v6771_v36  ;;  %4141 = vmatpush1.bf16.msra.mxu0 %v6452_v49  ;;  %v6505_v49 = vld [vmem:[#allocation2 + $0x5b4] ss:$24 sps:$4 sm:$0xff]  }
0x1de7   : > { %4142 = vmatprep.subr.bf16.mxu0 %v6460_v55  ;;  %v6509_v55 = vld [vmem:[#allocation2 + $0x550] ss:$24 sps:$4 sm:$0xff]  }
0x1dea   : > { %4143 = vmatpush1.bf16.msra.mxu0 %v6458_v57  ;;  %v6512_v57 = vld [vmem:[#allocation2 + $0x520] ss:$24 sps:$4 sm:$0xff]  }
0x1deb   : > { %4144 = vmatprep.subr.bf16.mxu0 %v6466_v3 }
0x1dee   : > { %4145 = vmatpush1.bf16.msra.mxu0 %v6464_v4 }
0x1def   : > { %4146 = vmatprep.subr.bf16.mxu0 %v6472_v27 }
0x1df2   : > { %4147 = vmatpush1.bf16.msra.mxu0 %v6470_v15 }
0x1df3   : > { %4148 = vmatprep.subr.bf16.mxu0 %v6478_v16 }
0x1df6   : > { %4149 = vmatpush1.bf16.msra.mxu0 %v6476_v17 }
0x1df7   : > { %4150 = vmatprep.subr.bf16.mxu0 %v6484_v20 }
0x1ea5   : > { %v3665_v23 = vpop.f32.mrf.mxu0 }
0x1ea6   : > { %v3666_v25 = vadd.f32 %v3665_v23, %v3582_v22  ;;  %v6482_v22 = vld [vmem:[#allocation2 + $0x4e0] ss:$24 sps:$4 sm:$0xff]   ;;  %v6487_v23 = vld [vmem:[#allocation2 + $0x4ec] ss:$24 sps:$4 sm:$0xff]  }
0x1ea7   : > { %v5937_v28 = vpop.f32.mrf.mxu0  ;;  %4151 = vmatpush1.bf16.msra.mxu0 %v6482_v22 }
0x1ea8   : > { %v3672_v29 = vmul.f32 0.044715, %v3666_v25  ;;  %v3671_v37 = vmul.f32 0.5, %v3666_v25  ;;  %v6490_v28 = vld [vmem:[#allocation2 + $0x4b4] ss:$24 sps:$4 sm:$0xff]  }
0x1ea9   : > { %v3668_v41 = vpop.f32.mrf.mxu0  ;;  %4152 = vmatprep.subr.bf16.mxu0 %v6490_v28 }
0x1eaa   : > { %v3673_v30 = vmul.f32 %v3672_v29, %v3666_v25  ;;  %v6488_v29 = vld [vmem:[#allocation2 + $0x4b0] ss:$24 sps:$4 sm:$0xff]   ;;  %v6493_v41 = vld [vmem:[#allocation2 + $0x4bc] ss:$24 sps:$4 sm:$0xff]  }
0x1eab   : > { %v5938_v31 = vpop.f32.mrf.mxu0  ;;  %4153 = vmatpush1.bf16.msra.mxu0 %v6488_v29 }
0x1eac   : > { %v3674_v32 = vmul.f32 %v3673_v30, %v3666_v25  ;;  %v6491_v30 = vld [vmem:[#allocation2 + $0x4b8] ss:$24 sps:$4 sm:$0xff]   ;;  %v6496_v31 = vld [vmem:[#allocation2 + $0x484] ss:$24 sps:$4 sm:$0xff]  }
0x1ead   : > { %4154 = vmatprep.subr.bf16.mxu0 %v6496_v31 }
0x1eae   : > { %v3675_v33 = vadd.f32 %v3674_v32, %v3666_v25  ;;  %v6485_v25 = vld [vmem:[#allocation2 + $0x4e8] ss:$24 sps:$4 sm:$0xff]  }
0x1eaf   : > { %v6494_v32 = vld [vmem:[#allocation2 + $0x480] ss:$24 sps:$4 sm:$0xff]  }
0x1eb0   : > { %v3676_v35 = vmul.f32 0.7978846, %v3675_v33  ;;  %v6499_v33 = vld [vmem:[#allocation2 + $0x48c] ss:$24 sps:$4 sm:$0xff]   ;;  %4155 = vmatpush1.bf16.msra.mxu0 %v6494_v32 }
0x1eb2   : > { %6596 = vtanh.f32 %v3676_v35  ;;  %v6497_v35 = vld [vmem:[#allocation2 + $0x488] ss:$24 sps:$4 sm:$0xff]  }
0x1ebf   : > { %v6597_v5 = vpop.eup %6596 }
0x1ec0   : > { %v3678_v7 = vadd.f32 1.0, %v6597_v5  ;;  %v6502_v5 = vld [vmem:[#allocation2 + $0x5e4] ss:$24 sps:$4 sm:$0xff]  }
0x1ec1   : > { %4222 = vmatprep.subr.bf16.mxu0 %v6502_v5 }
0x1ec2   : > { %v3679_v38 = vmul.f32 %v3678_v7, %v3671_v37 }
0x1ec4   : > { %v3697_v39 = vpack.c.bf16 %v3679_v38, %v3679_v38 }
0x1ec6   : > { %5956 = vmatmul.mubr.bf16.vlgmr.msra.gmra.mxu1 %v3697_v39  ;;  %v3806_v39 = vrot.slane %v7371_v63, %v7008_v51 }
0x1ec7   : > { %4213 = vmatprep.mubr.bf16.mxu1 %v6771_v36  ;;  %4182 = vmatpush1.bf16.msra.mxu1 %v6455_v54  ;;  %v6508_v54 = vld [vmem:[#allocation2 + $0x584] ss:$24 sps:$4 sm:$0xff]  }
0x1ec8   : > { %4183 = vmatprep.subr.bf16.mxu1 %v6463_v56  ;;  %v6514_v56 = vld [vmem:[#allocation2 + $0x524] ss:$24 sps:$4 sm:$0xff]  }
0x1ecb   : > { %4184 = vmatpush1.bf16.msra.mxu1 %v6461_v58  ;;  %v6517_v58 = vld [vmem:[#allocation2 + $0x4f4] ss:$24 sps:$4 sm:$0xff]  }
0x1ecc   : > { %4185 = vmatprep.subr.bf16.mxu1 %v6469_v11 }
0x1f86   : > { %v3784_v42 = vpop.f32.mrf.mxu1 }
0x1f87   : > { %v3785_v43 = vadd.f32 %v3784_v42, %v3701_v34 }
0x1f88   : > { %v5957_v44 = vpop.f32.mrf.mxu1 }
0x1f89   : > { %v3790_v45 = vadd.f32 %v3785_v43, %v3560_v9  ;;  %v6467_v9 = vld [vmem:[#allocation2 + $0x578] ss:$24 sps:$4 sm:$0xff]   ;;  %v3811_v43 = vrot.slane %v7371_v63, %v7000_v48 }
0x1f8a   : > { %v3787_v46 = vpop.f32.mrf.mxu1  ;;  %4186 = vmatpush1.bf16.msra.mxu1 %v6467_v9  ;;  %v6506_v63 = vld [vmem:[#allocation2 + $0x580] ss:$24 sps:$4 sm:$0xff]  }
0x1f8b   : > { %3791 = vadd.xlane.f32.xlu0 %v3790_v45  ;;  %4187 = vmatprep.subr.bf16.mxu1 %v6475_v52  ;;  %v6500_v46 = vld [vmem:[#allocation2 + $0x5e0] ss:$24 sps:$4 sm:$0xff]  }
0x1f8c   : > { %v5958_v47 = vpop.f32.mrf.mxu1 }
0x1f8e   : > { %4188 = vmatpush1.bf16.msra.mxu1 %v6473_v40 }
0x1f8f   : > { %4189 = vmatprep.subr.bf16.mxu1 %v6481_v18 }
0x1f92   : > { %4190 = vmatpush1.bf16.msra.mxu1 %v6479_v19 }
0x1f93   : > { %4191 = vmatprep.subr.bf16.mxu1 %v6487_v23 }
0x1f96   : > { %4192 = vmatpush1.bf16.msra.mxu1 %v6485_v25 }
0x1f97   : > { %4193 = vmatprep.subr.bf16.mxu1 %v6493_v41 }
0x1f9a   : > { %4194 = vmatpush1.bf16.msra.mxu1 %v6491_v30 }
0x1f9b   : > { %4195 = vmatprep.subr.bf16.mxu1 %v6499_v33 }
0x1f9e   : > { %4196 = vmatpush1.bf16.msra.mxu1 %v6497_v35 }
0x1f9f   : > { %5959 = vmatprep.subr.bf16.mxu1 %v6770_v13 }
0x2014   : > { %v3792_v60 = vpop.xlane.xlu0 %3791 }
0x2015   : > { %v3793_v61 = vmul.f32 0.03125, %v3792_v60  ;;  %v6515_v60 = vld [vmem:[#allocation2 + $0x4f0] ss:$24 sps:$4 sm:$0xff]  }
0x2017   : > { %v3794_v62 = vsub.f32 %v3790_v45, %v3793_v61  ;;  %v6518_v61 = vld [vmem:[#allocation2 + $0x4c0] ss:$24 sps:$4 sm:$0xff]  }
0x2019   : > { %v3795_v0 = vmul.f32 %v6932_v14, %v3794_v62  ;;  %v6523_v62 = vld [vmem:[#allocation2 + $0x494] ss:$24 sps:$4 sm:$0xff]  }
0x201b   : > { %v3796_v1 = vmul.f32 %v3795_v0, %v3795_v0 }
0x201d   : > { %3797 = vadd.xlane.f32.xlu1 %v3796_v1  ;;  %v7409_v1 = vld [vmem:[%s7573_s7 + $0x30] sm:$0xff] }
0x201e   : > { %v4271_v3 = vrot.slane %v7409_v1, %v6963_v6  ;;  %v4276_v9 = vrot.slane %v7409_v1, %v6971_v8  ;;  %v4266_v40 = vrot.slane %v7409_v1, %v6976_v12 }
0x20a6   : > { %v3798_v37 = vpop.xlane.xlu1 %3797 }
0x20a7   : > { %v3799_v7 = vmul.f32 0.03125, %v3798_v37 }
0x20a9   : > { %v3800_v38 = vadd.f32 1e-12, %v3799_v7 }
0x20ab   : > { %6598 = vrsqrt.f32 %v3800_v38 }
0x20b8   : > { %v6599_v34 = vpop.eup %6598 }
0x20b9   : > { %v3802_v42 = vmul.f32 %v6599_v34, %v3795_v0  ;;  %v6521_v0 = vld [vmem:[#allocation2 + $0x490] ss:$24 sps:$4 sm:$0xff]  }
0x20bb   : > { %v3807_v44 = vmul.f32 %v3806_v39, %v3802_v42 }
0x20bd   : > { %v7396_v45 = vadd.f32 %v3811_v43, %v3807_v44 }
0x20bf   : > { %v3899_v47 = vpack.c.bf16 %v7396_v45, %v7396_v45 }
0x20c1   : > { %4173 = vmatmul.mubr.bf16.vlgmr.msra.gmra.mxu0 %v3899_v47  ;;  %4214 = vmatmul.mubr.bf16.vlgmr.msra.gmra.mxu1 %v3899_v47 }
0x20c2   : > { %4223 = vmatpush1.bf16.msra.mxu0 %v6500_v46  ;;  %4254 = vmatprep.mubr.bf16.mxu0 %v6771_v36  ;;  %v6520_v36 = vld [vmem:[#allocation2 + $0x4c4] ss:$24 sps:$4 sm:$0xff]  }
0x20c3   : > { %4224 = vmatprep.subr.bf16.mxu0 %v6505_v49  ;;  %5961 = vmatprep.mubr.msk.bf16.mxu1 %vm6772_vm1, %v6770_v13 }
0x20c6   : > { %4225 = vmatpush1.bf16.msra.mxu0 %v6503_v53 }
0x20c7   : > { %4226 = vmatprep.subr.bf16.mxu0 %v6508_v54  ;;  %v4393_v54 = vrot.slane %v7409_v1, %v7005_v50 }
0x20ca   : > { %4227 = vmatpush1.bf16.msra.mxu0 %v6506_v63 }
0x20cb   : > { %4228 = vmatprep.subr.bf16.mxu0 %v6511_v24  ;;  %v4383_v24 = vrot.slane %v7409_v1, %v7008_v51 }
0x20ce   : > { %4229 = vmatpush1.bf16.msra.mxu0 %v6509_v55 }
0x20cf   : > { %4230 = vmatprep.subr.bf16.mxu0 %v6514_v56 }
0x20d2   : > { %4231 = vmatpush1.bf16.msra.mxu0 %v6512_v57 }
0x20d3   : > { %4232 = vmatprep.subr.bf16.mxu0 %v6517_v58 }
0x20d6   : > { %4233 = vmatpush1.bf16.msra.mxu0 %v6515_v60 }
0x20d7   : > { %4234 = vmatprep.subr.bf16.mxu0 %v6520_v36 }
0x20da   : > { %4235 = vmatpush1.bf16.msra.mxu0 %v6518_v61 }
0x20db   : > { %4236 = vmatprep.subr.bf16.mxu0 %v6523_v62 }
0x20de   : > { %4237 = vmatpush1.bf16.msra.mxu0 %v6521_v0 }
0x20df   : > { %5983 = vmatprep.subr.bf16.mxu0 %v6770_v13 }
0x20e1   : > { %4255 = vmatmul.mubr.bf16.vlgmr.msra.gmra.mxu0 %v3899_v47  ;;  %v4388_v47 = vrot.slane %v7409_v1, %v7000_v48 }
0x20e2   : > { %5999 = vmatprep.mubr.msk.bf16.mxu0 %vm6772_vm1, %v6770_v13 }
0x2181   : > { %v4174_v4 = vpop.f32.mrf.mxu0  ;;  %v4215_v11 = vpop.f32.mrf.mxu1 }
0x2182   : > { %v4277_v19 = vadd.f32 %v4276_v9, %v4215_v11  ;;  %v4267_v23 = vadd.f32 %v4266_v40, %v4174_v4 }
0x2183   : > { %v4176_v27 = vpop.f32.mrf.mxu0  ;;  %v4217_v15 = vpop.f32.mrf.mxu1 }
0x2184   : > { %v4272_v52 = vadd.f32 %v4271_v3, %v4176_v27  ;;  %v4332_v25 = vpack.c.bf16 %v4277_v19, %v4277_v19  ;;  %v4278_v28 = vpack.c.bf16 %v4267_v23, %v4267_v23  ;;  %v4384_v58 = vadd.f32 %v4383_v24, %v4217_v15  ;;  %v6535_v23 = vld [vmem:[#allocation5 + $0x1e0] sm:$0xff]  }
0x2185   : > { %v4178_v16 = vpop.f32.mrf.mxu0  ;;  %v4219_v17 = vpop.f32.mrf.mxu1 }
0x2186   : > { %v4279_v18 = vpack.c.bf16 %v4272_v52, %v4272_v52  ;;  %v4337_v29 = vsel %vm917_vm2, %v4332_v25, 0  ;;  %v4395_v36 = vpack.c.bf16 %v4384_v58, %v4384_v58  ;;  %v6536_v25 = vld [vmem:[#allocation5 + $0x1d8] sm:$0xff]  }
0x2187   : > { %v4179_v20 = vpop.f32.mrf.mxu0  ;;  %v4220_v22 = vpop.f32.mrf.mxu1 }
0x2188   : > { %5960 = vmatpush3.bf16.xpose.msra.mxu1 %v4279_v18  ;;  %v6532_v20 = vld [vmem:[#allocation5 + $0x1f8] sm:$0xff]   ;;  %v6533_v22 = vld [vmem:[#allocation5 + $0x1f0] sm:$0xff]  }
0x2189   : > { %5965 = vmatprep.subr.bf16.mxu1 %v6770_v13  ;;  %5984 = vmatpush3.bf16.msra.mxu0 %v6532_v20 }
0x218a   : > { %5985 = vmatprep.subr.bf16.mxu0 %v6770_v13 }
0x218d   : > { %5986 = vmatpush3.bf16.msra.mxu0 %v6533_v22 }
0x218e   : > { %5987 = vmatprep.subr.bf16.mxu0 %v6770_v13 }
0x218f   : > { %5962 = vmatmul.mubr.bf16.vlgmr.msra.gmra.mxu1 %v4278_v28  ;;  %v6537_v28 = vld [vmem:[#allocation5 + $0x1d0] sm:$0xff]  }
0x2190   : > { %5966 = vmatpush3.bf16.msra.mxu1 %v4337_v29  ;;  %5967 = vmatprep.mubr.msk.bf16.mxu1 %vm6772_vm1, %v6770_v13  ;;  %v6538_v29 = vld [vmem:[#allocation5 + $0x1c8] sm:$0xff]  }
0x2191   : > { %5971 = vmatprep.subr.bf16.mxu1 %v6770_v13 }
0x21a1   : > { %v4256_v41 = vpop.f32.mrf.mxu0 }
0x21a2   : > { %v4389_v53 = vadd.f32 %v4388_v47, %v4256_v41 }
0x21a3   : > { %v4258_v30 = vpop.f32.mrf.mxu0 }
0x21a4   : > { %v4396_v56 = vpack.c.bf16 %v4389_v53, %v4389_v53  ;;  %v4394_v57 = vadd.f32 %v4393_v54, %v4258_v30 }
0x21a5   : > { %v4260_v31 = vpop.f32.mrf.mxu0 }
0x21a6   : > { %v4449_v60 = vpack.c.bf16 %v4394_v57, %v4394_v57 }
0x21a7   : > { %v4261_v32 = vpop.f32.mrf.mxu0 }
0x21a8   : > { %v4454_v50 = vsel %vm917_vm2, %v4449_v60, 0  ;;  %v6524_v32 = vld [vmem:[#allocation5 + $0x1b8] sm:$0xff]  }
0x224f   : > { %v4314_v33 = vpop.f32.mrf.mxu1 }
0x2250   : > { %v4315_v35 = vadd.f32 %v7284_v10, %v4314_v33 }
0x2251   : > { %v5963_v5 = vpop.f32.mrf.mxu1 }
0x2252   : > { %v4320_v37 = vsel %vm900_vm3, %v4315_v35, -inf  ;;  %v6526_v5 = vld [vmem:[#allocation5 + $0x1a8] sm:$0xff]  }
0x2253   : > { %4321 = vmax.xlane.f32.xlu0 %v4320_v37  ;;  %v4317_v7 = vpop.f32.mrf.mxu1  ;;  %v6527_v37 = vld [vmem:[#allocation5 + $0x1a0] sm:$0xff]  }
0x2254   : > { %v6528_v7 = vld [vmem:[#allocation5 + $0x198] sm:$0xff]  }
0x2255   : > { %v5964_v38 = vpop.f32.mrf.mxu1 }
0x2256   : > { %v6529_v38 = vld [vmem:[#allocation5 + $0x190] sm:$0xff]  }
0x22dc   : > { %v4322_v39 = vpop.xlane.xlu0 %4321 }
0x22dd   : > { %v4323_v34 = vsub.f32 %v4315_v35, %v4322_v39  ;;  %v6525_v35 = vld [vmem:[#allocation5 + $0x1b0] sm:$0xff]   ;;  %v6530_v39 = vld [vmem:[#allocation5 + $0x188] sm:$0xff]  }
0x22df   : > { %v4324_v42 = vmul.f32 1.442695, %v4323_v34  ;;  %v6531_v34 = vld [vmem:[#allocation5 + $0x180] sm:$0xff]  }
0x22e1   : > { %6600 = vpow2.f32 %v4324_v42 }
0x22ee   : > { %v6601_v43 = vpop.eup %6600 }
0x22ef   : > { %v4326_v44 = vsel %vm900_vm3, %v6601_v43, 0.0 }
0x22f0   : > { %4327 = vadd.xlane.f32.xlu1 %v4326_v44 }
0x2379   : > { %v4328_v46 = vpop.xlane.xlu1 %4327 }
0x237a   : > { %6602 = vrcp.f32 %v4328_v46 }
0x2387   : > { %v6603_v49 = vpop.eup %6602 }
0x2388   : > { %v4330_v63 = vmul.f32 %v6603_v49, %v6601_v43  ;;  %v6539_v43 = vld [vmem:[#allocation5 + $0x1c0] sm:$0xff]  }
0x238a   : > { %v4331_v55 = vpack.c.bf16 %v4330_v63, %v4330_v63 }
0x238c   : > { %5968 = vmatmul.mubr.msk.bf16.vlgmr.msra.gmra.mxu1 %vm900_vm3, %v4331_v55 }
0x238d   : > { %5972 = vmatpush3.bf16.xpose.msra.mxu1 %v4396_v56  ;;  %5973 = vmatprep.mubr.msk.bf16.mxu1 %vm6772_vm1, %v6770_v13  ;;  %v4676_v56 = vrot.slane %v7409_v1, %v7053_v59 }
0x238e   : > { %5977 = vmatprep.subr.bf16.mxu1 %v6770_v13 }
0x2394   : > { %5974 = vmatmul.mubr.bf16.vlgmr.msra.gmra.mxu1 %v4395_v36 }
0x2395   : > { %5978 = vmatpush3.bf16.msra.mxu1 %v4454_v50  ;;  %5979 = vmatprep.mubr.msk.bf16.mxu1 %vm6772_vm1, %v6770_v13 }
0x2396   : > { %6003 = vmatprep.subr.bf16.mxu1 %v6770_v13 }
0x244c   : > { %v7439_v61 = vpop.f32.mrf.mxu1 }
0x244d   : > { %v4379_v42 = vpack.c.bf16 %v7439_v61, %v7439_v61 }
0x244e   : > { %v5969_v62 = vpop.f32.mrf.mxu1 }
0x2450   : > { %v4376_v0 = vpop.f32.mrf.mxu1 }
0x2451   : > { %v6540_v0 = vld [vmem:[%s7571_s5 + $0xf8] sm:$0xff]  }
0x2452   : > { %v5970_v3 = vpop.f32.mrf.mxu1 }
0x2453   : > { %v6541_v3 = vld [vmem:[%s7571_s5 + $0xf0] sm:$0xff]  }
0x2454   : > { %v4431_v4 = vpop.f32.mrf.mxu1 }
0x2455   : > { %v4432_v11 = vadd.f32 %v7284_v10, %v4431_v4  ;;  %v6534_v10 = vld [vmem:[#allocation5 + $0x1e8] sm:$0xff]  }
0x2456   : > { %v5975_v9 = vpop.f32.mrf.mxu1  ;;  %5988 = vmatpush3.bf16.msra.mxu0 %v6534_v10  ;;  %v7507_v10 = vld [vmem:[%s7573_s7 + $0x38] sm:$0xff] }
0x2457   : > { %v4437_v27 = vsel %vm900_vm3, %v4432_v11, -inf  ;;  %5989 = vmatprep.subr.bf16.mxu0 %v6770_v13 }
0x2458   : > { %4438 = vmax.xlane.f32.xlu0 %v4437_v27  ;;  %v4434_v15 = vpop.f32.mrf.mxu1 }
0x2459   : > { %v6542_v15 = vld [vmem:[%s7571_s5 + $0xe8] sm:$0xff]  }
0x245a   : > { %v5976_v52 = vpop.f32.mrf.mxu1  ;;  %5990 = vmatpush3.bf16.msra.mxu0 %v6535_v23  ;;  %v4694_v23 = vrot.slane %v7409_v1, %v7091_v26  ;;  %v6551_v26 = vld [vmem:[#allocation7 + $0xe0] sm:$0xff]   ;;  %v6552_v1 = vld [vmem:[#allocation7 + $0xd8] sm:$0xff]  }
0x245b   : > { %5991 = vmatprep.subr.bf16.mxu0 %v6770_v13  ;;  %v6543_v52 = vld [vmem:[%s7571_s5 + $0xe0] sm:$0xff]  }
0x245e   : > { %5992 = vmatpush3.bf16.msra.mxu0 %v6536_v25 }
0x245f   : > { %5993 = vmatprep.subr.bf16.mxu0 %v6770_v13 }
0x2462   : > { %5994 = vmatpush3.bf16.msra.mxu0 %v6537_v28 }
0x2463   : > { %5995 = vmatprep.subr.bf16.mxu0 %v6770_v13 }
0x2466   : > { %5996 = vmatpush3.bf16.msra.mxu0 %v6538_v29  ;;  %v4699_v29 = vrot.slane %v7507_v10, %v6976_v12  ;;  %v6553_v12 = vld [vmem:[#allocation7 + $0xd0] sm:$0xff]  }
0x2467   : > { %5997 = vmatprep.subr.bf16.mxu0 %v6770_v13 }
0x246a   : > { %5998 = vmatpush3.bf16.msra.mxu0 %v6539_v43 }
0x246b   : > { %6023 = vmatprep.subr.bf16.mxu0 %v6770_v13 }
0x24e1   : > { %v4439_v40 = vpop.xlane.xlu0 %4438 }
0x24e2   : > { %v4440_v16 = vsub.f32 %v4432_v11, %v4439_v40  ;;  %v6544_v40 = vld [vmem:[%s7571_s5 + $0xd8] sm:$0xff]  }
0x24e4   : > { %v4441_v17 = vmul.f32 1.442695, %v4440_v16  ;;  %v6545_v16 = vld [vmem:[%s7571_s5 + $0xd0] sm:$0xff]  }
0x24e6   : > { %6604 = vpow2.f32 %v4441_v17  ;;  %v6546_v17 = vld [vmem:[%s7571_s5 + $0xc8] sm:$0xff]  }
0x24f3   : > { %v6605_v18 = vpop.eup %6604 }
0x24f4   : > { %v4443_v19 = vsel %vm900_vm3, %v6605_v18, 0.0 }
0x24f5   : > { %4444 = vadd.xlane.f32.xlu1 %v4443_v19 }
0x257e   : > { %v4445_v41 = vpop.xlane.xlu1 %4444 }
0x257f   : > { %6606 = vrcp.f32 %v4445_v41 }
0x258c   : > { %v6607_v30 = vpop.eup %6606 }
0x258d   : > { %v4447_v31 = vmul.f32 %v6607_v30, %v6605_v18  ;;  %v6547_v18 = vld [vmem:[%s7571_s5 + $0xc0] sm:$0xff]  }
0x258f   : > { %v4448_v33 = vpack.c.bf16 %v4447_v31, %v4447_v31 }
0x2591   : > { %5980 = vmatmul.mubr.msk.bf16.vlgmr.msra.gmra.mxu1 %vm900_vm3, %v4448_v33  ;;  %v6549_v33 = vld [vmem:[#allocation7 + $0xf0] sm:$0xff]  }
0x2592   : > { %6004 = vmatpush3.bf16.msra.mxu1 %v6524_v32  ;;  %6019 = vmatprep.mubr.msk.bf16.mxu1 %vm6772_vm1, %v6770_v13  ;;  %v6548_v32 = vld [vmem:[#allocation7 + $0xf8] sm:$0xff]  }
0x2593   : > { %6005 = vmatprep.subr.bf16.mxu1 %v6770_v13 }
0x2596   : > { %6006 = vmatpush3.bf16.msra.mxu1 %v6525_v35  ;;  %v6550_v35 = vld [vmem:[#allocation7 + $0xe8] sm:$0xff]  }
0x2597   : > { %6007 = vmatprep.subr.bf16.mxu1 %v6770_v13 }
0x259a   : > { %6008 = vmatpush3.bf16.msra.mxu1 %v6526_v5  ;;  %v6554_v5 = vld [vmem:[#allocation7 + $0xc8] sm:$0xff]  }
0x259b   : > { %6009 = vmatprep.subr.bf16.mxu1 %v6770_v13 }
0x259e   : > { %6010 = vmatpush3.bf16.msra.mxu1 %v6527_v37  ;;  %v6555_v37 = vld [vmem:[#allocation7 + $0xc0] sm:$0xff]  }
0x259f   : > { %6011 = vmatprep.subr.bf16.mxu1 %v6770_v13 }
0x25a2   : > { %6012 = vmatpush3.bf16.msra.mxu1 %v6528_v7  ;;  %v4722_v7 = vrot.slane %v7507_v10, %v6963_v6  ;;  %v4841_v6 = vrot.slane %v7507_v10, %v6971_v8  ;;  %v4946_v8 = vrot.slane %v7507_v10, %v7008_v51 }
0x25a3   : > { %6013 = vmatprep.subr.bf16.mxu1 %v6770_v13 }
0x25a6   : > { %6014 = vmatpush3.bf16.msra.mxu1 %v6529_v38 }
0x25a7   : > { %6015 = vmatprep.subr.bf16.mxu1 %v6770_v13 }
0x25aa   : > { %6016 = vmatpush3.bf16.msra.mxu1 %v6530_v39 }
0x25ab   : > { %6017 = vmatprep.subr.bf16.mxu1 %v6770_v13 }
0x25ae   : > { %6018 = vmatpush3.bf16.msra.mxu1 %v6531_v34 }
0x25af   : > { %6043 = vmatprep.subr.bf16.mxu1 %v6770_v13 }
0x25b1   : > { %6020 = vmatmul.mubr.bf16.vlgmr.msra.gmra.mxu1 %v4379_v42 }
0x25b2   : > { %6059 = vmatprep.mubr.msk.bf16.mxu1 %vm6772_vm1, %v6770_v13  ;;  %6044 = vmatpush3.bf16.msra.mxu1 %v6548_v32 }
0x25b3   : > { %6045 = vmatprep.subr.bf16.mxu1 %v6770_v13 }
0x25b6   : > { %6046 = vmatpush3.bf16.msra.mxu1 %v6549_v33 }
0x25b7   : > { %6047 = vmatprep.subr.bf16.mxu1 %v6770_v13 }
0x25ba   : > { %6048 = vmatpush3.bf16.msra.mxu1 %v6550_v35 }
0x25bb   : > { %6049 = vmatprep.subr.bf16.mxu1 %v6770_v13 }
0x25be   : > { %6050 = vmatpush3.bf16.msra.mxu1 %v6551_v26 }
0x25bf   : > { %6051 = vmatprep.subr.bf16.mxu1 %v6770_v13 }
0x25c2   : > { %6052 = vmatpush3.bf16.msra.mxu1 %v6552_v1 }
0x25c3   : > { %6053 = vmatprep.subr.bf16.mxu1 %v6770_v13 }
0x25c6   : > { %6054 = vmatpush3.bf16.msra.mxu1 %v6553_v12 }
0x25c7   : > { %6055 = vmatprep.subr.bf16.mxu1 %v6770_v13 }
0x25ca   : > { %6056 = vmatpush3.bf16.msra.mxu1 %v6554_v5 }
0x25cb   : > { %6057 = vmatprep.subr.bf16.mxu1 %v6770_v13 }
0x25ce   : > { %6058 = vmatpush3.bf16.msra.mxu1 %v6555_v37 }
0x2651   : > { %v4490_v44 = vpop.f32.mrf.mxu1 }
0x2652   : > { %v4496_v46 = vpack.c.bf16 %v4490_v44, %v4490_v44 }
0x2653   : > { %v5981_v47 = vpop.f32.mrf.mxu1 }
0x2654   : > { %6000 = vmatmul.mubr.bf16.vlgmr.msra.gmra.mxu0 %v4496_v46 }
0x2655   : > { %v4493_v49 = vpop.f32.mrf.mxu1  ;;  %6039 = vmatprep.mubr.msk.bf16.mxu0 %vm6772_vm1, %v6770_v13  ;;  %6024 = vmatpush3.bf16.msra.mxu0 %v6540_v0 }
0x2656   : > { %6025 = vmatprep.subr.bf16.mxu0 %v6770_v13 }
0x2657   : > { %v5982_v53 = vpop.f32.mrf.mxu1 }
0x2659   : > { %6026 = vmatpush3.bf16.msra.mxu0 %v6541_v3 }
0x265a   : > { %6027 = vmatprep.subr.bf16.mxu0 %v6770_v13 }
0x265d   : > { %6028 = vmatpush3.bf16.msra.mxu0 %v6542_v15 }
0x265e   : > { %6029 = vmatprep.subr.bf16.mxu0 %v6770_v13 }
0x2661   : > { %6030 = vmatpush3.bf16.msra.mxu0 %v6543_v52  ;;  %v4951_v52 = vrot.slane %v7507_v10, %v7000_v48 }
0x2662   : > { %6031 = vmatprep.subr.bf16.mxu0 %v6770_v13 }
0x2665   : > { %6032 = vmatpush3.bf16.msra.mxu0 %v6544_v40 }
0x2666   : > { %6033 = vmatprep.subr.bf16.mxu0 %v6770_v13 }
0x2669   : > { %6034 = vmatpush3.bf16.msra.mxu0 %v6545_v16 }
0x266a   : > { %6035 = vmatprep.subr.bf16.mxu0 %v6770_v13 }
0x266d   : > { %6036 = vmatpush3.bf16.msra.mxu0 %v6546_v17 }
0x266e   : > { %6037 = vmatprep.subr.bf16.mxu0 %v6770_v13 }
0x2671   : > { %v4667_v54 = vpop.f32.mrf.mxu1  ;;  %6038 = vmatpush3.bf16.msra.mxu0 %v6547_v18 }
0x2673   : > { %v6021_v63 = vpop.f32.mrf.mxu1 }
0x2675   : > { %v4670_v24 = vpop.f32.mrf.mxu1 }
0x2677   : > { %v6022_v55 = vpop.f32.mrf.mxu1 }
0x2714   : > { %v4579_v57 = vpop.f32.mrf.mxu0 }
0x2715   : > { %v4668_v58 = vadd.f32 %v4667_v54, %v4579_v57 }
0x2716   : > { %v6001_v60 = vpop.f32.mrf.mxu0 }
0x2717   : > { %v4677_v36 = vadd.f32 %v4676_v56, %v4668_v58 }
0x2718   : > { %v4582_v50 = vpop.f32.mrf.mxu0 }
0x2719   : > { %v4678_v61 = vadd.f32 %v4677_v36, %v7396_v45 }
0x271a   : > { %v6002_v62 = vpop.f32.mrf.mxu0 }
0x271b   : > { %4679 = vadd.xlane.f32.xlu0 %v4678_v61 }
0x27a4   : > { %v4680_v59 = vpop.xlane.xlu0 %4679 }
0x27a5   : > { %v4681_v4 = vmul.f32 0.03125, %v4680_v59 }
0x27a7   : > { %v4682_v11 = vsub.f32 %v4678_v61, %v4681_v4 }
0x27a9   : > { %v4683_v9 = vmul.f32 %v6932_v14, %v4682_v11 }
0x27ab   : > { %v4684_v27 = vmul.f32 %v4683_v9, %v4683_v9 }
0x27ad   : > { %4685 = vadd.xlane.f32.xlu1 %v4684_v27 }
0x2836   : > { %v4686_v19 = vpop.xlane.xlu1 %4685 }
0x2837   : > { %v4687_v20 = vmul.f32 0.03125, %v4686_v19 }
0x2839   : > { %v4688_v22 = vadd.f32 1e-12, %v4687_v20 }
0x283b   : > { %6608 = vrsqrt.f32 %v4688_v22 }
0x2848   : > { %v6609_v25 = vpop.eup %6608 }
0x2849   : > { %v4690_v28 = vmul.f32 %v6609_v25, %v4683_v9 }
0x284b   : > { %v4695_v41 = vmul.f32 %v4694_v23, %v4690_v28 }
0x284d   : > { %v4700_v30 = vadd.f32 %v4699_v29, %v4695_v41 }
0x284f   : > { %v4718_v31 = vpack.c.bf16 %v4700_v30, %v4700_v30 }
0x2851   : > { %6040 = vmatmul.mubr.bf16.vlgmr.msra.gmra.mxu0 %v4718_v31 }
0x2911   : > { %v4805_v38 = vpop.f32.mrf.mxu0 }
0x2912   : > { %v4806_v39 = vadd.f32 %v4805_v38, %v4722_v7 }
0x2913   : > { %v6041_v34 = vpop.f32.mrf.mxu0 }
0x2914   : > { %v4812_v42 = vmul.f32 0.044715, %v4806_v39  ;;  %v4811_v63 = vmul.f32 0.5, %v4806_v39 }
0x2915   : > { %v4808_v43 = vpop.f32.mrf.mxu0 }
0x2916   : > { %v4813_v44 = vmul.f32 %v4812_v42, %v4806_v39 }
0x2917   : > { %v6042_v46 = vpop.f32.mrf.mxu0 }
0x2918   : > { %v4814_v47 = vmul.f32 %v4813_v44, %v4806_v39 }
0x291a   : > { %v4815_v49 = vadd.f32 %v4814_v47, %v4806_v39 }
0x291c   : > { %v4816_v53 = vmul.f32 0.7978846, %v4815_v49 }
0x291e   : > { %6610 = vtanh.f32 %v4816_v53 }
0x292b   : > { %v6611_v54 = vpop.eup %6610 }
0x292c   : > { %v4818_v24 = vadd.f32 1.0, %v6611_v54 }
0x292e   : > { %v4819_v55 = vmul.f32 %v4818_v24, %v4811_v63 }
0x2930   : > { %v4837_v13 = vpack.c.bf16 %v4819_v55, %v4819_v55 }
0x2932   : > { %6060 = vmatmul.mubr.bf16.vlgmr.msra.gmra.mxu1 %v4837_v13 }
0x29f2   : > { %v4924_v56 = vpop.f32.mrf.mxu1 }
0x29f3   : > { %v4925_v57 = vadd.f32 %v4924_v56, %v4841_v6 }
0x29f4   : > { %v6061_v58 = vpop.f32.mrf.mxu1 }
0x29f5   : > { %v4930_v60 = vadd.f32 %v4925_v57, %v4700_v30 }
0x29f6   : > { %v4927_v36 = vpop.f32.mrf.mxu1 }
0x29f7   : > { %4931 = vadd.xlane.f32.xlu0 %v4930_v60 }
0x29f8   : > { %v6062_v50 = vpop.f32.mrf.mxu1 }
0x2a80   : > { %v4932_v61 = vpop.xlane.xlu0 %4931 }
0x2a81   : > { %v4933_v62 = vmul.f32 0.03125, %v4932_v61 }
0x2a83   : > { %v4934_v0 = vsub.f32 %v4930_v60, %v4933_v62 }
0x2a85   : > { %v4935_v3 = vmul.f32 %v6932_v14, %v4934_v0  ;;  %v2673_v14 = vadd.f32 %v7257_v21, %v7121_v2 }
0x2a87   : > { %v4936_v59 = vmul.f32 %v4935_v3, %v4935_v3  ;;  %v3813_v16 = vadd.f32 %v7396_v45, %v2673_v14 }
0x2a89   : > { %4937 = vadd.xlane.f32.xlu1 %v4936_v59 }
0x2b12   : > { %v4938_v4 = vpop.xlane.xlu1 %4937 }
0x2b13   : > { %v4939_v11 = vmul.f32 0.03125, %v4938_v4 }
0x2b15   : > { %v4940_v9 = vadd.f32 1e-12, %v4939_v11 }
0x2b17   : > { %6612 = vrsqrt.f32 %v4940_v9 }
0x2b24   : > { %v6613_v27 = vpop.eup %6612 }
0x2b25   : > { %v4942_v15 = vmul.f32 %v6613_v27, %v4935_v3 }
0x2b27   : > { %v4947_v40 = vmul.f32 %v4946_v8, %v4942_v15 }
0x2b29   : > { %v4952_v17 = vadd.f32 %v4951_v52, %v4947_v40 }
0x2b2b   : > { %v4953_v18 = vadd.f32 %v4952_v17, %v3813_v16 }
0x2b2d   : > { %v4954_v19 = vmul.f32 0.25, %v4953_v18 }
0x2b2f   : > { %4955 = vst [vmem:[%s351_s21] sm:$0xff] %v4954_v19 }
0x2b30   : > { %6706 = shalt.err (!%p6703_p0)
}
0x2b31   : > { %s6707_s25 = scalar_lea.hbm %s4968_s10, 128  ;;  %s6711_s18 = scalar_lea.hbm %s7574_s8, 256 }
0x2b32   : > { %p6708_p1 = scmp.ne.s32.totalorder %s4968_s10, %s6707_s25  ;;  %p6712_p4 = scmp.lt.s32.totalorder %s4968_s10, %s7574_s8 }
0x2b33   : > { %p6713_p13 = scmp.lt.s32.totalorder %s6711_s18, %s6707_s25 }
0x2b34   : > { %p6709_p2 = pnand %p6708_p1, %p6857_p5 }
0x2b35   : > { %p6714_p9 = por %p6713_p13, %p6712_p4 }
0x2b36   : > { %p6710_p3 = pneg %p6709_p2 }
0x2b38   : > { %p6715_p10 = pnand %p6714_p9, %p6710_p3 }
0x2b3a   : > { %6718 = shalt.err (!%p6715_p10)
}
0x2b3b   : > { %6075 = dma.vmem_to_hbm [thread:$0]  (%p6857_p5), %s4971_s23, 128, %s4968_s10, %s4957_s22  }
0x2b3c PF: > { %p6097_p12 = scmp.ge.s32.totalorder %s6761_s30, 2  ;;  %s4982_s26 = sand.u32 1, %s6749_s27  }
0x2b3d   : > { %s4983_s12 = scalar_lea.sflag [#allocation4], %s4982_s26 }
0x2b3e   : > { %p6088_p7 = pnand %p6097_p12, %p6861_p6 }
0x2b40   : > { %p6089_p8 = pneg %p6088_p7 }
0x2b42   : > { %6744 = dma.done.wait (%p6089_p8), %s4983_s12, 128  }
0x2b43   : > { %6746 = vsyncadd (%p6089_p8), %s4983_s12, 4294967168  ;;  %p20_p11 = scmp.ge.s32.totalorder %s6844_s11, 4   ;;  %s7579_s27 = smov %s6753_s28 }
0x2b44   : > { %s7580_s28 = smov %s6757_s29  ;;  %s7581_s29 = smov %s6855_s14 }
0x2b45   : > { %s7582_s30 = smov %s6844_s11  ;;  %22 = sbr.rel (!%p20_p11) target bundleno = 5 (0x5), region = 118 }
0x2b4a   :  { %4988 = vsyncpa [#allocation3], 1 }
0x2b4b   :  { %4990 = vsyncpa [#allocation3 + $0x1], 1 }
0x2b4c   :  { %4991 = vsyncpa [#allocation6], 1 }
0x2b4d   :  { %4992 = vsyncpa [#allocation4], 1 }
0x2b4e   :  { %4994 = vsyncpa [#allocation4 + $0x1], 1 }

</bundles_post_ra>
